<compile_context>
chip_gen: v7x
topology: tpu7x:2x2x1
jax: 0.10.0
libtpu: 0.0.40
codegen_flags: <defaults>
</compile_context>

<pallas_src>
import functools

import jax
import jax.numpy as jnp
from jax import lax
from jax.experimental import pallas as pl
from jax.experimental.pallas import tpu as pltpu


def _round_up(x, m):
    return (x + m - 1) // m * m


def _pick_tile_m(M, desired=512):
    """Largest row tile <= desired, but force >= 2 grid steps when M allows so
    the 'parallel' axis can be sharded across both TensorCores on v7x."""
    tile = min(desired, _round_up(M, 8))
    if M > 8 and pl.cdiv(M, tile) < 2:
        tile = _round_up(pl.cdiv(M, 2), 8)
    return max(tile, 8)


# ---------------------------------------------------------------------------
# Kernel 1: fused matmul   out = [relu_out]([relu_in](x) @ W + b)
# x and W are bf16 (native MXU path); accumulation and bias stay f32.
# ---------------------------------------------------------------------------
def _fused_matmul_kernel(x_ref, w_ref, b_ref, o_ref, *, relu_in, relu_out):
    x = x_ref[...]                                   # (tile_m, K) bf16
    if relu_in:
        x = jnp.maximum(x, 0)
    acc = jnp.dot(x, w_ref[...], preferred_element_type=jnp.float32)
    acc = acc + b_ref[...]                           # (1, N) f32 broadcast
    if relu_out:
        acc = jnp.maximum(acc, 0.0)
    o_ref[...] = acc.astype(o_ref.dtype)


def fused_matmul(x, w, b2d, *, relu_in=False, relu_out=False, tile_m=512):
    M, K = x.shape
    K2, N = w.shape
    assert K == K2, (K, K2)
    tile = _pick_tile_m(M, tile_m)
    kernel = functools.partial(_fused_matmul_kernel,
                               relu_in=relu_in, relu_out=relu_out)
    return pl.pallas_call(
        kernel,
        grid_spec=pltpu.PrefetchScalarGridSpec(
            num_scalar_prefetch=0,
            grid=(pl.cdiv(M, tile),),
            in_specs=[
                pl.BlockSpec((tile, K), lambda i: (i, 0)),   # activation tile
                pl.BlockSpec((K, N), lambda i: (0, 0)),      # resident weight
                pl.BlockSpec((1, N), lambda i: (0, 0)),      # resident bias
            ],
            out_specs=pl.BlockSpec((tile, N), lambda i: (i, 0)),
        ),
        out_shape=jax.ShapeDtypeStruct((M, N), jnp.float32),
        compiler_params=pltpu.CompilerParams(
            dimension_semantics=("parallel",)),
    )(x, w, b2d)


# ---------------------------------------------------------------------------
# Kernel 2: whole residual block in one call
#   o = relu(relu(patches) @ W1 + b1) @ W2 + b2 + h
# ---------------------------------------------------------------------------
def _resblock_kernel(p_ref, w1_ref, b1_ref, w2_ref, b2_ref, h_ref, o_ref):
    p = jnp.maximum(p_ref[...], 0)                   # ReLU on bf16 patches
    t = jnp.dot(p, w1_ref[...], preferred_element_type=jnp.float32)
    t = jnp.maximum(t + b1_ref[...], 0.0)            # mid ReLU in f32
    t = t.astype(jnp.bfloat16)                       # stays on-chip
    o = jnp.dot(t, w2_ref[...], preferred_element_type=jnp.float32)
    o_ref[...] = (o + b2_ref[...] + h_ref[...]).astype(o_ref.dtype)


# ---------------------------------------------------------------------------
# Layout glue (XLA): im2col + phase interleave (pure data movement)
# ---------------------------------------------------------------------------
def _im2col_3x3(x_nhwc):
    B, H, W, C = x_nhwc.shape
    xp = jnp.pad(x_nhwc, ((0, 0), (1, 1), (1, 1), (0, 0)))
    cols = [xp[:, dh:dh + H, dw:dw + W, :]
            for dh in range(3) for dw in range(3)]
    return jnp.concatenate(cols, axis=-1).reshape(B * H * W, 9 * C)


def _conv3x3_weight_matrix(w_oihw):
    cout, cin, kh, kw = w_oihw.shape
    return jnp.transpose(w_oihw, (2, 3, 1, 0)).reshape(kh * kw * cin, cout)


def _conv1x1_weight_matrix(w_oihw):
    return jnp.transpose(w_oihw[:, :, 0, 0], (1, 0))           # (Cin, Cout)


# (input-row offset, kernel row) pairs per output-row phase for k=4,s=2,p=1
_PHASE_TAPS = {0: ((0, 1), (-1, 3)), 1: ((0, 2), (1, 0))}


def _convT_phase_weight_matrix(w_iohw):
    """ConvTranspose2d(4,2,1) weights -> (9*Cin, 4*Cout) matrix.

    The 4 sub-pixel phases share one 3x3 im2col; unused taps of each phase
    are zero so one wide-N matmul computes all phases (lane-dense output)."""
    cin, cout = w_iohw.shape[0], w_iohw.shape[1]
    zero = jnp.zeros((cin, cout), w_iohw.dtype)
    phase_cols = []
    for a in (0, 1):                                 # output row phase
        for c in (0, 1):                             # output col phase
            taps = {}
            for (dh, kh) in _PHASE_TAPS[a]:
                for (dw, kw) in _PHASE_TAPS[c]:
                    taps[(dh, dw)] = w_iohw[:, :, kh, kw]
            rows = [taps.get((dh, dw), zero)
                    for dh in (-1, 0, 1) for dw in (-1, 0, 1)]  # im2col order
            phase_cols.append(jnp.concatenate(rows, axis=0))    # (9*Cin, Cout)
    return jnp.concatenate(phase_cols, axis=1)                  # (9*Cin, 4*Cout)


def prepare_decoder_params(params, *, stride):
    """One-time re-layout of PyTorch-style weights into MXU-ready bf16 matmul
    matrices + f32 (1, N) biases (hoisted out of every forward call)."""
    bf, f32 = jnp.bfloat16, jnp.float32
    p = {
        "conv_in_w": _conv3x3_weight_matrix(params["conv_in_w"]).astype(bf),
        "conv_in_b": params["conv_in_b"].reshape(1, -1).astype(f32),
        "res_blocks": [],
    }
    for blk in params["res_blocks"]:
        p["res_blocks"].append({
            "w1": _conv3x3_weight_matrix(blk["w1"]).astype(bf),
            "b1": blk["b1"].reshape(1, -1).astype(f32),
            "w2": _conv1x1_weight_matrix(blk["w2"]).astype(bf),
            "b2": blk["b2"].reshape(1, -1).astype(f32),
        })
    p["up1_w"] = _convT_phase_weight_matrix(params["up1_w"]).astype(bf)
    p["up1_b"] = jnp.tile(params["up1_b"], 4).reshape(1, -1).astype(f32)
    if stride == 4:
        p["up2_w"] = _convT_phase_weight_matrix(params["up2_w"]).astype(bf)
        p["up2_b"] = jnp.tile(params["up2_b"], 4).reshape(1, -1).astype(f32)
    return p


# ---------------------------------------------------------------------------
# Conv layers built on the Pallas kernels (NHWC activations, f32 stream)
# ---------------------------------------------------------------------------
def conv3x3(x_nhwc, w_mat, b2d, **kw):
    B, H, W, _ = x_nhwc.shape
    patches = _im2col_3x3(x_nhwc.astype(jnp.bfloat16))
    out = fused_matmul(patches, w_mat, b2d, **kw)
    return out.reshape(B, H, W, -1)


def resblock_apply(h_nhwc, blk, *, tile_m=512):
    B, H, W, C = h_nhwc.shape
    M = B * H * W
    patches = _im2col_3x3(h_nhwc.astype(jnp.bfloat16))       # (M, 9C) bf16
    hf = h_nhwc.reshape(M, C)                                # f32 residual
    K1 = patches.shape[1]
    Cm = blk["w1"].shape[1]
    tile = _pick_tile_m(M, tile_m)
    out = pl.pallas_call(
        _resblock_kernel,
        grid_spec=pltpu.PrefetchScalarGridSpec(
            num_scalar_prefetch=0,
            grid=(pl.cdiv(M, tile),),
            in_specs=[
                pl.BlockSpec((tile, K1), lambda i: (i, 0)),  # patches tile
                pl.BlockSpec((K1, Cm), lambda i: (0, 0)),    # resident W1
                pl.BlockSpec((1, Cm), lambda i: (0, 0)),     # resident b1
                pl.BlockSpec((Cm, C), lambda i: (0, 0)),     # resident W2
                pl.BlockSpec((1, C), lambda i: (0, 0)),      # resident b2
                pl.BlockSpec((tile, C), lambda i: (i, 0)),   # residual tile
            ],
            out_specs=pl.BlockSpec((tile, C), lambda i: (i, 0)),
        ),
        out_shape=jax.ShapeDtypeStruct((M, C), jnp.float32),
        compiler_params=pltpu.CompilerParams(
            dimension_semantics=("parallel",)),
    )(patches, blk["w1"], blk["b1"], blk["w2"], blk["b2"], hf)
    return out.reshape(B, H, W, C)


def conv_transpose4x4_s2(x_nhwc, w_mat, b2d, *, relu_in=False, relu_out=False):
    """ConvTranspose2d(4, stride=2, padding=1): ONE wide-N fused matmul over a
    shared 3x3 im2col (4 phases along N), then a single interleave reshape."""
    B, H, W, _ = x_nhwc.shape
    cout = w_mat.shape[1] // 4
    patches = _im2col_3x3(x_nhwc.astype(jnp.bfloat16))
    y = fused_matmul(patches, w_mat, b2d, relu_in=relu_in, relu_out=relu_out)
    y = y.reshape(B, H, W, 2, 2, cout)                       # (.., a, c, Cout)
    y = jnp.transpose(y, (0, 1, 3, 2, 4, 5))                 # (B, H, 2, W, 2, C)
    return y.reshape(B, 2 * H, 2 * W, cout)


# ---------------------------------------------------------------------------
# Decoder forward (Pallas path) — 5 pallas_calls total for stride=4
# ---------------------------------------------------------------------------
def decoder_forward(x_nhwc, prepped, *, stride):
    h = conv3x3(x_nhwc, prepped["conv_in_w"], prepped["conv_in_b"])
    for blk in prepped["res_blocks"]:
        h = resblock_apply(h, blk)
    # trailing ReLU is fused as relu_in of the first upsampling conv
    if stride == 4:
        h = conv_transpose4x4_s2(h, prepped["up1_w"], prepped["up1_b"],
                                 relu_in=True, relu_out=True)
        h = conv_transpose4x4_s2(h, prepped["up2_w"], prepped["up2_b"])
    elif stride == 2:
        h = conv_transpose4x4_s2(h, prepped["up1_w"], prepped["up1_b"],
                                 relu_in=True)
    else:
        raise ValueError(f"unsupported stride {stride}")
    return h


# ---------------------------------------------------------------------------
# Pure-JAX reference (mirrors the PyTorch module, f32, highest precision)
# ---------------------------------------------------------------------------
def _conv2d_ref(x, w_oihw, b, padding):
    w_hwio = jnp.transpose(w_oihw, (2, 3, 1, 0))
    y = lax.conv_general_dilated(
        x, w_hwio, window_strides=(1, 1),
        padding=((padding, padding), (padding, padding)),
        dimension_numbers=("NHWC", "HWIO", "NHWC"),
        precision=lax.Precision.HIGHEST)
    return y + b[None, None, None, :]


def _conv_transpose2d_ref(x, w_iohw, b):
    w_hwio = jnp.transpose(w_iohw[:, :, ::-1, ::-1], (2, 3, 0, 1))
    y = lax.conv_general_dilated(
        x, w_hwio, window_strides=(1, 1), padding=((2, 2), (2, 2)),
        lhs_dilation=(2, 2), dimension_numbers=("NHWC", "HWIO", "NHWC"),
        precision=lax.Precision.HIGHEST)
    return y + b[None, None, None, :]


def decoder_reference(x, params, *, stride):
    h = _conv2d_ref(x, params["conv_in_w"], params["conv_in_b"], 1)
    for blk in params["res_blocks"]:
        r = jax.nn.relu(h)
        r = _conv2d_ref(r, blk["w1"], blk["b1"], 1)
        r = jax.nn.relu(r)
        r = _conv2d_ref(r, blk["w2"], blk["b2"], 0)
        h = h + r
    h = jax.nn.relu(h)
    if stride == 4:
        h = _conv_transpose2d_ref(h, params["up1_w"], params["up1_b"])
        h = jax.nn.relu(h)
        h = _conv_transpose2d_ref(h, params["up2_w"], params["up2_b"])
    else:
        h = _conv_transpose2d_ref(h, params["up1_w"], params["up1_b"])
    return h


def _uniform(key, shape, bound):
    return jax.random.uniform(key, shape, jnp.float32, -bound, bound)


def init_decoder_params(key, *, in_channel, out_channel, channel,
                        n_res_block, n_res_channel, stride):
    keys = iter(jax.random.split(key, 8 + 4 * n_res_block))

    def conv(cout, cin, k):
        bound = 1.0 / (cin * k * k) ** 0.5
        return (_uniform(next(keys), (cout, cin, k, k), bound),
                _uniform(next(keys), (cout,), bound))

    def convT(cin, cout, k):
        bound = 1.0 / (cout * k * k) ** 0.5
        return (_uniform(next(keys), (cin, cout, k, k), bound),
                _uniform(next(keys), (cout,), bound))

    w, b = conv(channel, in_channel, 3)
    params = {"conv_in_w": w, "conv_in_b": b, "res_blocks": []}
    for _ in range(n_res_block):
        w1, b1 = conv(n_res_channel, channel, 3)
        w2, b2 = conv(channel, n_res_channel, 1)
        params["res_blocks"].append({"w1": w1, "b1": b1, "w2": w2, "b2": b2})
    if stride == 4:
        params["up1_w"], params["up1_b"] = convT(channel, channel // 2, 4)
        params["up2_w"], params["up2_b"] = convT(channel // 2, out_channel, 4)
    else:
        params["up1_w"], params["up1_b"] = convT(channel, out_channel, 4)
    return params


if __name__ == "__main__":
    # Decoder hyper-params (synthetic, deterministic init — no checkpoint)
    in_channel, out_channel, channel = 32, 3, 64
    n_res_block, n_res_channel, stride = 2, 32, 4
    B, H, W = 2, 16, 16

    key = jax.random.PRNGKey(0)
    k_params, k_x = jax.random.split(key)
    params = init_decoder_params(
        k_params, in_channel=in_channel, out_channel=out_channel,
        channel=channel, n_res_block=n_res_block,
        n_res_channel=n_res_channel, stride=stride)
    prepped = prepare_decoder_params(params, stride=stride)   # one-time prep

    # NHWC activations (the PyTorch module takes NCHW (B, in_channel, H, W)).
    x = jax.random.normal(k_x, (B, H, W, in_channel), dtype=jnp.float32)

    fwd = jax.jit(functools.partial(decoder_forward, stride=stride))
    out = fwd(x, prepped)
    jax.block_until_ready(out)

    # sanity check against pure-JAX (lax.conv, f32 HIGHEST precision) reference
    ref = decoder_reference(x, params, stride=stride)
    assert out.shape == (B, 4 * H, 4 * W, out_channel), out.shape
    max_err = float(jnp.max(jnp.abs(out - ref)))
    # bf16 MXU inputs with f32 accumulation: loosened tolerance vs f32 ref.
    assert max_err < 6e-2, f"max abs error vs reference: {max_err}"

    print("KERNEL_OK")
</pallas_src>

<mosaic_0001>
module attributes {stable_mosaic.version = 11 : i64} {
  func.func @_fused_matmul_kernel(%arg0: i32, %arg1: memref<256x288xbf16, #tpu.memory_space<vmem>>, %arg2: memref<288x64xbf16, #tpu.memory_space<vmem>>, %arg3: memref<1x64xf32, #tpu.memory_space<vmem>>, %arg4: memref<256x64xf32, #tpu.memory_space<vmem>>) attributes {dimension_semantics = [#tpu.dimension_semantics<parallel>], iteration_bounds = array<i64: 2>, scalar_prefetch = 0 : i64, scratch_operands = 0 : i64, tpu.core_type = #tpu.core_type<tc>, window_params = [{transform_indices = @transform_0, window_bounds = array<i64: 256, 288>}, {pipeline_mode = #tpu.pipeline_mode<synchronous>, transform_indices = @transform_1, window_bounds = array<i64: 288, 64>}, {pipeline_mode = #tpu.pipeline_mode<synchronous>, transform_indices = @transform_2, window_bounds = array<i64: 1, 64>}, {transform_indices = @transform_3, window_bounds = array<i64: 256, 64>}]} {
    %c0 = arith.constant 0 : index
    %c0_0 = arith.constant 0 : index
    %0 = vector.load %arg1[%c0, %c0_0] : memref<256x288xbf16, #tpu.memory_space<vmem>>, vector<256x288xbf16>
    %c0_1 = arith.constant 0 : index
    %c0_2 = arith.constant 0 : index
    %1 = vector.load %arg2[%c0_1, %c0_2] : memref<288x64xbf16, #tpu.memory_space<vmem>>, vector<288x64xbf16>
    %cst = arith.constant dense<0.000000e+00> : vector<256x64xf32>
    %2 = tpu.matmul %0, %1, %cst {dimension_numbers = #tpu.dot_dimension_numbers<[1], [0], [0], [1], [0, 0, 1, 1], [], []>} : vector<256x288xbf16>, vector<288x64xbf16>, vector<256x64xf32> -> vector<256x64xf32>
    %c0_3 = arith.constant 0 : index
    %c0_4 = arith.constant 0 : index
    %3 = vector.load %arg3[%c0_3, %c0_4] : memref<1x64xf32, #tpu.memory_space<vmem>>, vector<1x64xf32>
    %4 = vector.broadcast %3 : vector<1x64xf32> to vector<256x64xf32>
    %5 = arith.addf %2, %4 : vector<256x64xf32>
    %c0_5 = arith.constant 0 : index
    %c0_6 = arith.constant 0 : index
    %6 = vector.load %arg4[%c0_5, %c0_6] : memref<256x64xf32, #tpu.memory_space<vmem>>, vector<256x64xf32>
    tpu.vector_store %arg4[%c0_5, %c0_6], %5 {strides = array<i32>} : memref<256x64xf32, #tpu.memory_space<vmem>>, vector<256x64xf32>,
    return
  }
  func.func @transform_0(%arg0: i32) -> (i32, i32) {
    %c0_i32 = arith.constant 0 : i32
    %c0_i32_0 = arith.constant 0 : i32
    return %arg0, %c0_i32 : i32, i32
  }
  func.func @transform_1(%arg0: i32) -> (i32, i32) {
    %c0_i32 = arith.constant 0 : i32
    %c0_i32_0 = arith.constant 0 : i32
    %c0_i32_1 = arith.constant 0 : i32
    return %c0_i32, %c0_i32_0 : i32, i32
  }
  func.func @transform_2(%arg0: i32) -> (i32, i32) {
    %c0_i32 = arith.constant 0 : i32
    %c0_i32_0 = arith.constant 0 : i32
    %c0_i32_1 = arith.constant 0 : i32
    return %c0_i32, %c0_i32_0 : i32, i32
  }
  func.func @transform_3(%arg0: i32) -> (i32, i32) {
    %c0_i32 = arith.constant 0 : i32
    %c0_i32_0 = arith.constant 0 : i32
    return %arg0, %c0_i32 : i32, i32
  }
}

module attributes {stable_mosaic.version = 11 : i64} {
  func.func @_resblock_kernel(%arg0: i32, %arg1: memref<256x576xbf16, #tpu.memory_space<vmem>>, %arg2: memref<576x32xbf16, #tpu.memory_space<vmem>>, %arg3: memref<1x32xf32, #tpu.memory_space<vmem>>, %arg4: memref<32x64xbf16, #tpu.memory_space<vmem>>, %arg5: memref<1x64xf32, #tpu.memory_space<vmem>>, %arg6: memref<256x64xf32, #tpu.memory_space<vmem>>, %arg7: memref<256x64xf32, #tpu.memory_space<vmem>>) attributes {dimension_semantics = [#tpu.dimension_semantics<parallel>], iteration_bounds = array<i64: 2>, scalar_prefetch = 0 : i64, scratch_operands = 0 : i64, tpu.core_type = #tpu.core_type<tc>, window_params = [{transform_indices = @transform_0, window_bounds = array<i64: 256, 576>}, {pipeline_mode = #tpu.pipeline_mode<synchronous>, transform_indices = @transform_1, window_bounds = array<i64: 576, 32>}, {pipeline_mode = #tpu.pipeline_mode<synchronous>, transform_indices = @transform_2, window_bounds = array<i64: 1, 32>}, {pipeline_mode = #tpu.pipeline_mode<synchronous>, transform_indices = @transform_3, window_bounds = array<i64: 32, 64>}, {pipeline_mode = #tpu.pipeline_mode<synchronous>, transform_indices = @transform_4, window_bounds = array<i64: 1, 64>}, {transform_indices = @transform_5, window_bounds = array<i64: 256, 64>}, {transform_indices = @transform_6, window_bounds = array<i64: 256, 64>}]} {
    %c0 = arith.constant 0 : index
    %c0_0 = arith.constant 0 : index
    %0 = vector.load %arg1[%c0, %c0_0] : memref<256x576xbf16, #tpu.memory_space<vmem>>, vector<256x576xbf16>
    %cst = arith.constant 0.000000e+00 : bf16
    %1 = vector.broadcast %cst : bf16 to vector<256x576xbf16>
    %2 = arith.maximumf %0, %1 : vector<256x576xbf16>
    %c0_1 = arith.constant 0 : index
    %c0_2 = arith.constant 0 : index
    %3 = vector.load %arg2[%c0_1, %c0_2] : memref<576x32xbf16, #tpu.memory_space<vmem>>, vector<576x32xbf16>
    %cst_3 = arith.constant dense<0.000000e+00> : vector<256x32xf32>
    %4 = tpu.matmul %2, %3, %cst_3 {dimension_numbers = #tpu.dot_dimension_numbers<[1], [0], [0], [1], [0, 0, 1, 1], [], []>} : vector<256x576xbf16>, vector<576x32xbf16>, vector<256x32xf32> -> vector<256x32xf32>
    %c0_4 = arith.constant 0 : index
    %c0_5 = arith.constant 0 : index
    %5 = vector.load %arg3[%c0_4, %c0_5] : memref<1x32xf32, #tpu.memory_space<vmem>>, vector<1x32xf32>
    %6 = vector.broadcast %5 : vector<1x32xf32> to vector<256x32xf32>
    %7 = arith.addf %4, %6 : vector<256x32xf32>
    %cst_6 = arith.constant 0.000000e+00 : f32
    %8 = vector.broadcast %cst_6 : f32 to vector<256x32xf32>
    %9 = arith.maximumf %7, %8 : vector<256x32xf32>
    %10 = arith.truncf %9 : vector<256x32xf32> to vector<256x32xbf16>
    %c0_7 = arith.constant 0 : index
    %c0_8 = arith.constant 0 : index
    %11 = vector.load %arg4[%c0_7, %c0_8] : memref<32x64xbf16, #tpu.memory_space<vmem>>, vector<32x64xbf16>
    %cst_9 = arith.constant dense<0.000000e+00> : vector<256x64xf32>
    %12 = tpu.matmul %10, %11, %cst_9 {dimension_numbers = #tpu.dot_dimension_numbers<[1], [0], [0], [1], [0, 0, 1, 1], [], []>} : vector<256x32xbf16>, vector<32x64xbf16>, vector<256x64xf32> -> vector<256x64xf32>
    %c0_10 = arith.constant 0 : index
    %c0_11 = arith.constant 0 : index
    %13 = vector.load %arg5[%c0_10, %c0_11] : memref<1x64xf32, #tpu.memory_space<vmem>>, vector<1x64xf32>
    %14 = vector.broadcast %13 : vector<1x64xf32> to vector<256x64xf32>
    %15 = arith.addf %12, %14 : vector<256x64xf32>
    %c0_12 = arith.constant 0 : index
    %c0_13 = arith.constant 0 : index
    %16 = vector.load %arg6[%c0_12, %c0_13] : memref<256x64xf32, #tpu.memory_space<vmem>>, vector<256x64xf32>
    %17 = arith.addf %15, %16 : vector<256x64xf32>
    %c0_14 = arith.constant 0 : index
    %c0_15 = arith.constant 0 : index
    %18 = vector.load %arg7[%c0_14, %c0_15] : memref<256x64xf32, #tpu.memory_space<vmem>>, vector<256x64xf32>
    tpu.vector_store %arg7[%c0_14, %c0_15], %17 {strides = array<i32>} : memref<256x64xf32, #tpu.memory_space<vmem>>, vector<256x64xf32>,
    return
  }
  func.func @transform_0(%arg0: i32) -> (i32, i32) {
    %c0_i32 = arith.constant 0 : i32
    %c0_i32_0 = arith.constant 0 : i32
    return %arg0, %c0_i32 : i32, i32
  }
  func.func @transform_1(%arg0: i32) -> (i32, i32) {
    %c0_i32 = arith.constant 0 : i32
    %c0_i32_0 = arith.constant 0 : i32
    %c0_i32_1 = arith.constant 0 : i32
    return %c0_i32, %c0_i32_0 : i32, i32
  }
  func.func @transform_2(%arg0: i32) -> (i32, i32) {
    %c0_i32 = arith.constant 0 : i32
    %c0_i32_0 = arith.constant 0 : i32
    %c0_i32_1 = arith.constant 0 : i32
    return %c0_i32, %c0_i32_0 : i32, i32
  }
  func.func @transform_3(%arg0: i32) -> (i32, i32) {
    %c0_i32 = arith.constant 0 : i32
    %c0_i32_0 = arith.constant 0 : i32
    %c0_i32_1 = arith.constant 0 : i32
    return %c0_i32, %c0_i32_0 : i32, i32
  }
  func.func @transform_4(%arg0: i32) -> (i32, i32) {
    %c0_i32 = arith.constant 0 : i32
    %c0_i32_0 = arith.constant 0 : i32
    %c0_i32_1 = arith.constant 0 : i32
    return %c0_i32, %c0_i32_0 : i32, i32
  }
  func.func @transform_5(%arg0: i32) -> (i32, i32) {
    %c0_i32 = arith.constant 0 : i32
    %c0_i32_0 = arith.constant 0 : i32
    return %arg0, %c0_i32 : i32, i32
  }
  func.func @transform_6(%arg0: i32) -> (i32, i32) {
    %c0_i32 = arith.constant 0 : i32
    %c0_i32_0 = arith.constant 0 : i32
    return %arg0, %c0_i32 : i32, i32
  }
}

module attributes {stable_mosaic.version = 11 : i64} {
  func.func @_fused_matmul_kernel(%arg0: i32, %arg1: memref<256x576xbf16, #tpu.memory_space<vmem>>, %arg2: memref<576x128xbf16, #tpu.memory_space<vmem>>, %arg3: memref<1x128xf32, #tpu.memory_space<vmem>>, %arg4: memref<256x128xf32, #tpu.memory_space<vmem>>) attributes {dimension_semantics = [#tpu.dimension_semantics<parallel>], iteration_bounds = array<i64: 2>, scalar_prefetch = 0 : i64, scratch_operands = 0 : i64, tpu.core_type = #tpu.core_type<tc>, window_params = [{transform_indices = @transform_0, window_bounds = array<i64: 256, 576>}, {pipeline_mode = #tpu.pipeline_mode<synchronous>, transform_indices = @transform_1, window_bounds = array<i64: 576, 128>}, {pipeline_mode = #tpu.pipeline_mode<synchronous>, transform_indices = @transform_2, window_bounds = array<i64: 1, 128>}, {transform_indices = @transform_3, window_bounds = array<i64: 256, 128>}]} {
    %c0 = arith.constant 0 : index
    %c0_0 = arith.constant 0 : index
    %0 = vector.load %arg1[%c0, %c0_0] : memref<256x576xbf16, #tpu.memory_space<vmem>>, vector<256x576xbf16>
    %cst = arith.constant 0.000000e+00 : bf16
    %1 = vector.broadcast %cst : bf16 to vector<256x576xbf16>
    %2 = arith.maximumf %0, %1 : vector<256x576xbf16>
    %c0_1 = arith.constant 0 : index
    %c0_2 = arith.constant 0 : index
    %3 = vector.load %arg2[%c0_1, %c0_2] : memref<576x128xbf16, #tpu.memory_space<vmem>>, vector<576x128xbf16>
    %cst_3 = arith.constant dense<0.000000e+00> : vector<256x128xf32>
    %4 = tpu.matmul %2, %3, %cst_3 {dimension_numbers = #tpu.dot_dimension_numbers<[1], [0], [0], [1], [0, 0, 1, 1], [], []>} : vector<256x576xbf16>, vector<576x128xbf16>, vector<256x128xf32> -> vector<256x128xf32>
    %c0_4 = arith.constant 0 : index
    %c0_5 = arith.constant 0 : index
    %5 = vector.load %arg3[%c0_4, %c0_5] : memref<1x128xf32, #tpu.memory_space<vmem>>, vector<1x128xf32>
    %6 = vector.broadcast %5 : vector<1x128xf32> to vector<256x128xf32>
    %7 = arith.addf %4, %6 : vector<256x128xf32>
    %cst_6 = arith.constant 0.000000e+00 : f32
    %8 = vector.broadcast %cst_6 : f32 to vector<256x128xf32>
    %9 = arith.maximumf %7, %8 : vector<256x128xf32>
    %c0_7 = arith.constant 0 : index
    %c0_8 = arith.constant 0 : index
    %10 = vector.load %arg4[%c0_7, %c0_8] : memref<256x128xf32, #tpu.memory_space<vmem>>, vector<256x128xf32>
    tpu.vector_store %arg4[%c0_7, %c0_8], %9 {strides = array<i32>} : memref<256x128xf32, #tpu.memory_space<vmem>>, vector<256x128xf32>,
    return
  }
  func.func @transform_0(%arg0: i32) -> (i32, i32) {
    %c0_i32 = arith.constant 0 : i32
    %c0_i32_0 = arith.constant 0 : i32
    return %arg0, %c0_i32 : i32, i32
  }
  func.func @transform_1(%arg0: i32) -> (i32, i32) {
    %c0_i32 = arith.constant 0 : i32
    %c0_i32_0 = arith.constant 0 : i32
    %c0_i32_1 = arith.constant 0 : i32
    return %c0_i32, %c0_i32_0 : i32, i32
  }
  func.func @transform_2(%arg0: i32) -> (i32, i32) {
    %c0_i32 = arith.constant 0 : i32
    %c0_i32_0 = arith.constant 0 : i32
    %c0_i32_1 = arith.constant 0 : i32
    return %c0_i32, %c0_i32_0 : i32, i32
  }
  func.func @transform_3(%arg0: i32) -> (i32, i32) {
    %c0_i32 = arith.constant 0 : i32
    %c0_i32_0 = arith.constant 0 : i32
    return %arg0, %c0_i32 : i32, i32
  }
}

module attributes {stable_mosaic.version = 11 : i64} {
  func.func @_fused_matmul_kernel(%arg0: i32, %arg1: memref<512x288xbf16, #tpu.memory_space<vmem>>, %arg2: memref<288x12xbf16, #tpu.memory_space<vmem>>, %arg3: memref<1x12xf32, #tpu.memory_space<vmem>>, %arg4: memref<512x12xf32, #tpu.memory_space<vmem>>) attributes {dimension_semantics = [#tpu.dimension_semantics<parallel>], iteration_bounds = array<i64: 4>, scalar_prefetch = 0 : i64, scratch_operands = 0 : i64, tpu.core_type = #tpu.core_type<tc>, window_params = [{transform_indices = @transform_0, window_bounds = array<i64: 512, 288>}, {pipeline_mode = #tpu.pipeline_mode<synchronous>, transform_indices = @transform_1, window_bounds = array<i64: 288, 12>}, {pipeline_mode = #tpu.pipeline_mode<synchronous>, transform_indices = @transform_2, window_bounds = array<i64: 1, 12>}, {transform_indices = @transform_3, window_bounds = array<i64: 512, 12>}]} {
    %c0 = arith.constant 0 : index
    %c0_0 = arith.constant 0 : index
    %0 = vector.load %arg1[%c0, %c0_0] : memref<512x288xbf16, #tpu.memory_space<vmem>>, vector<512x288xbf16>
    %c0_1 = arith.constant 0 : index
    %c0_2 = arith.constant 0 : index
    %1 = vector.load %arg2[%c0_1, %c0_2] : memref<288x12xbf16, #tpu.memory_space<vmem>>, vector<288x12xbf16>
    %cst = arith.constant dense<0.000000e+00> : vector<512x12xf32>
    %2 = tpu.matmul %0, %1, %cst {dimension_numbers = #tpu.dot_dimension_numbers<[1], [0], [0], [1], [0, 0, 1, 1], [], []>} : vector<512x288xbf16>, vector<288x12xbf16>, vector<512x12xf32> -> vector<512x12xf32>
    %c0_3 = arith.constant 0 : index
    %c0_4 = arith.constant 0 : index
    %3 = vector.load %arg3[%c0_3, %c0_4] : memref<1x12xf32, #tpu.memory_space<vmem>>, vector<1x12xf32>
    %4 = vector.broadcast %3 : vector<1x12xf32> to vector<512x12xf32>
    %5 = arith.addf %2, %4 : vector<512x12xf32>
    %c0_5 = arith.constant 0 : index
    %c0_6 = arith.constant 0 : index
    %6 = vector.load %arg4[%c0_5, %c0_6] : memref<512x12xf32, #tpu.memory_space<vmem>>, vector<512x12xf32>
    tpu.vector_store %arg4[%c0_5, %c0_6], %5 {strides = array<i32>} : memref<512x12xf32, #tpu.memory_space<vmem>>, vector<512x12xf32>,
    return
  }
  func.func @transform_0(%arg0: i32) -> (i32, i32) {
    %c0_i32 = arith.constant 0 : i32
    %c0_i32_0 = arith.constant 0 : i32
    return %arg0, %c0_i32 : i32, i32
  }
  func.func @transform_1(%arg0: i32) -> (i32, i32) {
    %c0_i32 = arith.constant 0 : i32
    %c0_i32_0 = arith.constant 0 : i32
    %c0_i32_1 = arith.constant 0 : i32
    return %c0_i32, %c0_i32_0 : i32, i32
  }
  func.func @transform_2(%arg0: i32) -> (i32, i32) {
    %c0_i32 = arith.constant 0 : i32
    %c0_i32_0 = arith.constant 0 : i32
    %c0_i32_1 = arith.constant 0 : i32
    return %c0_i32, %c0_i32_0 : i32, i32
  }
  func.func @transform_3(%arg0: i32) -> (i32, i32) {
    %c0_i32 = arith.constant 0 : i32
    %c0_i32_0 = arith.constant 0 : i32
    return %arg0, %c0_i32 : i32, i32
  }
}

</mosaic_0001>

<bundles_post_ra>
// kernel: decoder_forward.5
= control target key start
LH: loop header
LB: loop body
LE: loop exit
PB: predicated region body
PF: predicated region fallthrough
CT: control target
= control target key end

     0   :  { %8 = vsyncpa [#allocation3], 0  ;;  %s1559_s12 = smov 0   ;;  %s1872_s0 = inlined_call_operand.vmem [shape: bf16[512,288], index: 0, kind: input, shape index: {}]   ;;  %s1873_s1 = inlined_call_operand.vmem [shape: bf16[288,64], index: 1, kind: input, shape index: {}]   ;;  %s1874_s2 = inlined_call_operand.hbm [shape: f32[1,64], index: 2, kind: input, shape index: {}]   ;;  %s1875_s3 = inlined_call_operand.vmem [shape: f32[512,64], index: 3, kind: output, shape index: {}]  }
   0x1 LB: > { %s1118_s13 = sadd.s32 4294967295, %s1536_s12   ;;  %p1120_p0 = scmp.ge.s32.totalorder %s1536_s12, 1  ;;  %s1536_s12 = sphi %s1559_s12, %s14_s12  }
   0x2   : > { %p113_p1 = scmp.lt.s32.totalorder %s1536_s12, 3  ;;  %p1573_p3 = scmp.eq.s32.totalorder %s1118_s13, 0 }
   0x3   : > { %s1538_s16 = smov [#allocation2]   ;;  %s1498_s21 = scalar_lea.hbm %s1874_s2, 16 }
   0x4   : > { %p1567_p2 = pnand %p1120_p0, %p113_p1  ;;  %s129_s17 = sshll.u32 %s1538_s16, 4  ;;  %s130_s17 = int_to_ptr.vmem [resolvable:$true] %s129_s17 }
   0x5   : > { %s1880_s15 = scalar_select %p1573_p3, 1, 0 }
   0x6   : > { %s1879_s14 = scalar_select %p1567_p2, 1, 0 }
   0x7   : > { %p1401_p4 = pneg %p1567_p2  ;;  %p1499_p6 = scmp.ne.s32.totalorder %s1874_s2, %s1498_s21 }
   0x8   : > { %p1505_p10 = scmp.lt.u32.totalorder %s1498_s21, %s1874_s2 }
   0x9   : > { %p1581_p5 = pnand %p1573_p3, %p1401_p4 }
   0xb   : > { %p1500_p7 = pneg %p1581_p5 }
   0xd   : > { %p1501_p8 = pnand %p1500_p7, %p1499_p6 }
   0xf   : > { %p1502_p9 = pneg %p1501_p8 }
  0x11   : > { %p1507_p11 = pnand %p1505_p10, %p1502_p9 }
  0x13   : > { %1510 = shalt.err (!%p1507_p11)
}
  0x14   : > { %s1511_s26 = scalar_lea.vmem %s130_s17, 16  ;;  %s1518_s27 = scalar_lea.vmem %s130_s17, 32 }
  0x15   : > { %p1512_p12 = scmp.ne.s32.totalorder %s130_s17, %s1511_s26  ;;  %p1519_p1 = scmp.lt.s32.totalorder %s130_s17, %s130_s17 }
  0x16   : > { %p1520_p4 = scmp.lt.s32.totalorder %s1518_s27, %s1511_s26 }
  0x17   : > { %p1514_p13 = pnand %p1512_p12, %p1500_p7 }
  0x18   : > { %p1521_p3 = por %p1520_p4, %p1519_p1 }
  0x19   : > { %p1515_p0 = pneg %p1514_p13 }
  0x1b   : > { %p1522_p2 = pnand %p1521_p3, %p1515_p0 }
  0x1d   : > { %1525 = shalt.err (!%p1522_p2)
}
  0x1e   : > { %1404 = dma.hbm_to_vmem [thread:$0]  (!%p1581_p5), %s1874_s2, 16, %s130_s17, [#allocation3]  }
  0x1f   : > { %p1882_p6 = scmp.ne.s32.totalorder %s1879_s14, 0 }
  0x20   : > { %p1883_p8 = scmp.ne.s32.totalorder (!%p1882_p6), %s1880_s15, 0 }
  0x21   : > { %152 = sbr.rel (%p1882_p6) target bundleno = 384 (0x180), region = 32 }
  0x28   : > { %1531 = dma.done.wait (%p1883_p8), [#allocation3], 16  }
  0x29   : > { %1533 = vsyncadd (%p1883_p8), [#allocation3], 4294967280  ;;  %s1125_s30 = sshll.u32 %s1118_s13, 5  ;;  %v1416_v0 = vld [vmem:[%s1873_s1 + $0x40] sm:$0xff]   ;;  %v1418_v2 = vld [vmem:[%s1873_s1 + $0x48] sm:$0xff]   ;;  %vm646_vm0 = vcmask 261120  }
  0x2a   : > { %v1417_v1 = vld [vmem:[%s1873_s1] sm:$0xff]   ;;  %1214 = vmatprep.subr.bf16.mxu0 %v1416_v0  ;;  %1380 = vmatprep.subr.bf16.mxu1 %v1416_v0  ;;  %p178_p2 = scmp.lt.s32.totalorder %s1125_s30, 63  ;;  %v1419_v3 = vld [vmem:[%s1873_s1 + $0x8] sm:$0xff]   ;;  %v1420_v4 = vld [vmem:[%s1873_s1 + $0x50] sm:$0xff]   ;;  %vm1017_vm1 = vcmask 523264  }
  0x2b   : > { %1215 = vmatpush3.bf16.msra.mxu0 %v1417_v1  ;;  %1388 = vmatpush3.bf16.msra.mxu1 %v1417_v1  ;;  %v1421_v5 = vld [vmem:[%s1873_s1 + $0x10] sm:$0xff]   ;;  %v1422_v6 = vld [vmem:[%s1873_s1 + $0x58] sm:$0xff]   ;;  %v1424_v8 = vld [vmem:[%s1873_s1 + $0x60] sm:$0xff]  }
  0x2c   : > { %1216 = vmatprep.subr.bf16.mxu0 %v1418_v2  ;;  %1381 = vmatprep.subr.bf16.mxu1 %v1418_v2  ;;  %s1885_s30 = smov (!%p178_p2, %s1125_s30), 63  ;;  %v1423_v7 = vld [vmem:[%s1873_s1 + $0x18] sm:$0xff]   ;;  %v1425_v9 = vld [vmem:[%s1873_s1 + $0x20] sm:$0xff]   ;;  %v1426_v10 = vld [vmem:[%s1873_s1 + $0x68] sm:$0xff]  }
  0x2d   : > { %s1396_s19 = smul.u32 12, %s1885_s30  ;;  %v1427_v13 = vld [vmem:[%s1873_s1 + $0x28] sm:$0xff]   ;;  %v1428_v14 = vld [vmem:[%s1873_s1 + $0x70] sm:$0xff]   ;;  %v1430_v16 = vld [vmem:[%s1873_s1 + $0x78] sm:$0xff]   ;;  %s1128_s20 = sshll.u32 %s1885_s30, 3 }
  0x2e   : > { %v1429_v15 = vld [vmem:[%s1873_s1 + $0x30] sm:$0xff]   ;;  %v1431_v17 = vld [vmem:[%s1873_s1 + $0x38] sm:$0xff]   ;;  %v1438_v18 = vld [vmem:[%s1873_s1 + $0x80] sm:$0xff]   ;;  %s1758_s23 = scalar_lea.vmem %s1875_s3, %s1128_s20 }
  0x2f   : > { %1217 = vmatpush3.bf16.msra.mxu0 %v1419_v3  ;;  %1389 = vmatpush3.bf16.msra.mxu1 %v1419_v3  ;;  %s1642_s26 = scalar_lea.vmem %s1872_s0, %s1396_s19  ;;  %v1451_v23 = vld [vmem:[%s1873_s1 + $0x88] sm:$0xff]  }
  0x30   : > { %1218 = vmatprep.subr.bf16.mxu0 %v1420_v4  ;;  %1382 = vmatprep.subr.bf16.mxu1 %v1420_v4  ;;  %v1434_v11 = vld [vmem:[%s1642_s26 + $0x4] ss:$12 sps:$4 sm:$0xff]   ;;  %v1432_v19 = vld [vmem:[%s1642_s26] ss:$12 sps:$4 sm:$0xff]   ;;  %v1439_v21 = vld [vmem:[%s1642_s26 + $0x1c] ss:$12 sps:$4 sm:$0xff]  }
  0x31   : > { %v1437_v12 = vld [vmem:[%s1642_s26 + $0x124] ss:$12 sps:$4 sm:$0xff]   ;;  %727 = vmatprep.mubr.bf16.mxu0 %v1434_v11  ;;  %v1435_v20 = vld [vmem:[%s1642_s26 + $0x120] ss:$12 sps:$4 sm:$0xff]   ;;  %v1441_v22 = vld [vmem:[%s1642_s26 + $0x13c] ss:$12 sps:$4 sm:$0xff]  }
  0x32   : > { %823 = vmatprep.mubr.bf16.mxu1 %v1437_v12  ;;  %v1443_v24 = vld [vmem:[%s1642_s26 + $0x18] ss:$12 sps:$4 sm:$0xff]   ;;  %v1445_v26 = vld [vmem:[%s1642_s26 + $0x34] ss:$12 sps:$4 sm:$0xff]   ;;  %v1449_v28 = vld [vmem:[%s1642_s26 + $0x30] ss:$12 sps:$4 sm:$0xff]  }
  0x33   : > { %1219 = vmatpush3.bf16.msra.mxu0 %v1421_v5  ;;  %1390 = vmatpush3.bf16.msra.mxu1 %v1421_v5  ;;  %v1444_v25 = vld [vmem:[%s1642_s26 + $0x138] ss:$12 sps:$4 sm:$0xff]   ;;  %v1447_v27 = vld [vmem:[%s1642_s26 + $0x154] ss:$12 sps:$4 sm:$0xff]   ;;  %v1450_v29 = vld [vmem:[%s1642_s26 + $0x150] ss:$12 sps:$4 sm:$0xff]  }
  0x34   : > { %1220 = vmatprep.subr.bf16.mxu0 %v1422_v6  ;;  %1383 = vmatprep.subr.bf16.mxu1 %v1422_v6  ;;  %v1452_v30 = vld [vmem:[%s1642_s26 + $0x4c] ss:$12 sps:$4 sm:$0xff]   ;;  %v1456_v32 = vld [vmem:[%s1642_s26 + $0x48] ss:$12 sps:$4 sm:$0xff]   ;;  %v1458_v34 = vld [vmem:[%s1642_s26 + $0x64] ss:$12 sps:$4 sm:$0xff]  }
  0x35   : > { %v1454_v31 = vld [vmem:[%s1642_s26 + $0x16c] ss:$12 sps:$4 sm:$0xff]   ;;  %v1457_v33 = vld [vmem:[%s1642_s26 + $0x168] ss:$12 sps:$4 sm:$0xff]   ;;  %v1467_v41 = vld [vmem:[%s1642_s26 + $0x50] ss:$12 sps:$4 sm:$0xff]  }
  0x36   : > { %v1460_v35 = vld [vmem:[%s1642_s26 + $0x8] ss:$12 sps:$4 sm:$0xff]   ;;  %v1461_v36 = vld [vmem:[%s1642_s26 + $0x60] ss:$12 sps:$4 sm:$0xff]   ;;  %v1465_v39 = vld [vmem:[%s1642_s26 + $0x38] ss:$12 sps:$4 sm:$0xff]  }
  0x37   : > { %1221 = vmatpush3.bf16.msra.mxu0 %v1423_v7  ;;  %1391 = vmatpush3.bf16.msra.mxu1 %v1423_v7  ;;  %v1462_v37 = vld [vmem:[%s1642_s26 + $0x20] ss:$12 sps:$4 sm:$0xff]   ;;  %v1463_v38 = vld [vmem:[%s1642_s26 + $0x7c] ss:$12 sps:$4 sm:$0xff]   ;;  %v1466_v40 = vld [vmem:[%s1642_s26 + $0x78] ss:$12 sps:$4 sm:$0xff]  }
  0x38   : > { %1222 = vmatprep.subr.bf16.mxu0 %v1424_v8  ;;  %1384 = vmatprep.subr.bf16.mxu1 %v1424_v8  ;;  %v1468_v42 = vld [vmem:[%s1642_s26 + $0x94] ss:$12 sps:$4 sm:$0xff]   ;;  %v1471_v44 = vld [vmem:[%s1642_s26 + $0x90] ss:$12 sps:$4 sm:$0xff]   ;;  %v1473_v46 = vld [vmem:[%s1642_s26 + $0xac] ss:$12 sps:$4 sm:$0xff]  }
  0x39   : > { %v1470_v43 = vld [vmem:[%s1642_s26 + $0x68] ss:$12 sps:$4 sm:$0xff]   ;;  %v1472_v45 = vld [vmem:[%s1642_s26 + $0x80] ss:$12 sps:$4 sm:$0xff]   ;;  %v1475_v47 = vld [vmem:[%s1642_s26 + $0x98] ss:$12 sps:$4 sm:$0xff]  }
  0x3a   : > { %v1476_v48 = vld [vmem:[%s1642_s26 + $0xa8] ss:$12 sps:$4 sm:$0xff]   ;;  %v1477_v49 = vld [vmem:[%s1642_s26 + $0xb0] ss:$12 sps:$4 sm:$0xff]   ;;  %v1481_v52 = vld [vmem:[%s1642_s26 + $0xc0] ss:$12 sps:$4 sm:$0xff]  }
  0x3b   : > { %1223 = vmatpush3.bf16.msra.mxu0 %v1425_v9  ;;  %1392 = vmatpush3.bf16.msra.mxu1 %v1425_v9  ;;  %v1478_v50 = vld [vmem:[%s1642_s26 + $0xc4] ss:$12 sps:$4 sm:$0xff]   ;;  %v1480_v51 = vld [vmem:[%s1642_s26 + $0xc8] ss:$12 sps:$4 sm:$0xff]   ;;  %v1482_v53 = vld [vmem:[%s1642_s26 + $0xe0] ss:$12 sps:$4 sm:$0xff]  }
  0x3c   : > { %1224 = vmatprep.subr.bf16.mxu0 %v1426_v10  ;;  %1385 = vmatprep.subr.bf16.mxu1 %v1426_v10  ;;  %v1483_v54 = vld [vmem:[%s1642_s26 + $0xdc] ss:$12 sps:$4 sm:$0xff]   ;;  %v1485_v55 = vld [vmem:[%s1642_s26 + $0xf8] ss:$12 sps:$4 sm:$0xff]   ;;  %v1488_v58 = vld [vmem:[%s1642_s26 + $0xf4] ss:$12 sps:$4 sm:$0xff]  }
  0x3d   : > { %v1486_v56 = vld [vmem:[%s1642_s26 + $0xd8] ss:$12 sps:$4 sm:$0xff]   ;;  %v1487_v57 = vld [vmem:[%s1642_s26 + $0x110] ss:$12 sps:$4 sm:$0xff]   ;;  %v1490_v59 = vld [vmem:[%s1642_s26 + $0x128] ss:$12 sps:$4 sm:$0xff]  }
  0x3e   : > { %v1491_v60 = vld [vmem:[%s1642_s26 + $0xf0] ss:$12 sps:$4 sm:$0xff]   ;;  %v1492_v61 = vld [vmem:[%s1642_s26 + $0x140] ss:$12 sps:$4 sm:$0xff]   ;;  %v1495_v63 = vld [vmem:[%s1642_s26 + $0x158] ss:$12 sps:$4 sm:$0xff]  }
  0x3f   : > { %1225 = vmatpush3.bf16.msra.mxu0 %v1427_v13  ;;  %1393 = vmatpush3.bf16.msra.mxu1 %v1427_v13  ;;  %v1493_v62 = vld [vmem:[%s1642_s26 + $0x10c] ss:$12 sps:$4 sm:$0xff]   ;;  %v1496_v0 = vld [vmem:[%s1642_s26 + $0x108] ss:$12 sps:$4 sm:$0xff]   ;;  %v1497_v1 = vld [vmem:[%s1642_s26 + $0x170] ss:$12 sps:$4 sm:$0xff]  }
  0x40   : > { %1226 = vmatprep.subr.bf16.mxu0 %v1428_v14  ;;  %1386 = vmatprep.subr.bf16.mxu1 %v1428_v14 }
  0x43   : > { %1227 = vmatpush3.bf16.msra.mxu0 %v1429_v15  ;;  %1394 = vmatpush3.bf16.msra.mxu1 %v1429_v15 }
  0x44   : > { %1228 = vmatprep.subr.bf16.mxu0 %v1430_v16  ;;  %1387 = vmatprep.subr.bf16.mxu1 %v1430_v16 }
  0x47   : > { %1229 = vmatpush3.bf16.msra.mxu0 %v1431_v17  ;;  %1395 = vmatpush3.bf16.msra.mxu1 %v1431_v17 }
  0x48   : > { %1344 = vmatprep.subr.bf16.mxu1 %v1438_v18 }
  0x4a   : > { %728 = vmatmul.mubr.bf16.vlgmr.msra.gmra.mrb[0].mxu0 %v1432_v19  ;;  %824 = vmatmul.mubr.bf16.vlgmr.msra.gmra.mrb[0].mxu1 %v1435_v20 }
  0x4b   : > { %1345 = vmatpush3.bf16.msra.mxu1 %v1438_v18  ;;  %735 = vmatprep.mubr.bf16.mxu0 %v1439_v21 }
  0x4c   : > { %831 = vmatprep.mubr.bf16.mxu1 %v1441_v22  ;;  %1346 = vmatprep.subr.bf16.mxu1 %v1451_v23 }
  0x4f   : > { %1347 = vmatpush3.bf16.msra.mxu1 %v1451_v23 }
  0x52   : > { %736 = vmatmul.mubr.bf16.gmra.mrb[4].mxu0 %v1443_v24  ;;  %832 = vmatmul.mubr.bf16.gmra.mrb[4].mxu1 %v1444_v25 }
  0x53   : > { %743 = vmatprep.mubr.bf16.mxu0 %v1445_v26  ;;  %839 = vmatprep.mubr.bf16.mxu1 %v1447_v27 }
  0x5a   : > { %744 = vmatmul.mubr.bf16.gmra.mrb[8].mxu0 %v1449_v28  ;;  %840 = vmatmul.mubr.bf16.gmra.mrb[8].mxu1 %v1450_v29 }
  0x5b   : > { %751 = vmatprep.mubr.bf16.mxu0 %v1452_v30  ;;  %847 = vmatprep.mubr.bf16.mxu1 %v1454_v31 }
  0x62   : > { %752 = vmatmul.mubr.bf16.gmra.mrb[12].mxu0 %v1456_v32  ;;  %848 = vmatmul.mubr.bf16.gmra.mrb[12].mxu1 %v1457_v33 }
  0x63   : > { %759 = vmatprep.mubr.bf16.mxu0 %v1458_v34  ;;  %1348 = vmatprep.mubr.msk.bf16.mxu1 %vm646_vm0, %v1460_v35 }
  0x6a   : > { %760 = vmatmul.mubr.bf16.gmra.mrb[16].mxu0 %v1461_v36  ;;  %1349 = vmatmul.mubr.msk.bf16.vlgmr.msra.gmra.mrb[16].mxu1 %vm646_vm0, %v1462_v37 }
  0x6b   : > { %767 = vmatprep.mubr.bf16.mxu0 %v1463_v38  ;;  %1352 = vmatprep.mubr.msk.bf16.mxu1 %vm646_vm0, %v1465_v39 }
  0x72   : > { %768 = vmatmul.mubr.bf16.gmra.mrb[20].mxu0 %v1466_v40  ;;  %1353 = vmatmul.mubr.msk.bf16.gmra.mrb[20].mxu1 %vm646_vm0, %v1467_v41 }
  0x73   : > { %775 = vmatprep.mubr.bf16.mxu0 %v1468_v42  ;;  %1356 = vmatprep.mubr.msk.bf16.mxu1 %vm646_vm0, %v1470_v43 }
  0x7a   : > { %776 = vmatmul.mubr.bf16.gmra.mrb[24].mxu0 %v1471_v44  ;;  %1357 = vmatmul.mubr.msk.bf16.gmra.mrb[24].mxu1 %vm646_vm0, %v1472_v45 }
  0x7b   : > { %783 = vmatprep.mubr.bf16.mxu0 %v1473_v46  ;;  %1360 = vmatprep.mubr.msk.bf16.mxu1 %vm646_vm0, %v1475_v47 }
  0x82   : > { %784 = vmatmul.mubr.bf16.gmra.mrb[28].mxu0 %v1476_v48  ;;  %1361 = vmatmul.mubr.msk.bf16.gmra.mrb[28].mxu1 %vm646_vm0, %v1477_v49 }
  0x83   : > { %791 = vmatprep.mubr.bf16.mxu0 %v1478_v50  ;;  %1364 = vmatprep.mubr.msk.bf16.mxu1 %vm646_vm0, %v1480_v51  ;;  %v1752_v50 = vld [vmem:[#allocation2] ss:$0 sm:$0xff] }
  0x8a   : > { %792 = vmatmul.mubr.bf16.gmra.mrb[32].mxu0 %v1481_v52  ;;  %1365 = vmatmul.mubr.msk.bf16.gmra.mrb[32].mxu1 %vm646_vm0, %v1482_v53 }
  0x8b   : > { %799 = vmatprep.mubr.bf16.mxu0 %v1483_v54  ;;  %1368 = vmatprep.mubr.msk.bf16.mxu1 %vm646_vm0, %v1485_v55 }
  0x92   : > { %800 = vmatmul.mubr.bf16.gmra.mrb[36].mxu0 %v1486_v56  ;;  %1369 = vmatmul.mubr.msk.bf16.gmra.mrb[36].mxu1 %vm646_vm0, %v1487_v57 }
  0x93   : > { %807 = vmatprep.mubr.bf16.mxu0 %v1488_v58  ;;  %1372 = vmatprep.mubr.msk.bf16.mxu1 %vm646_vm0, %v1490_v59 }
  0x9a   : > { %808 = vmatmul.mubr.bf16.gmra.mrb[40].mxu0 %v1491_v60  ;;  %1373 = vmatmul.mubr.msk.bf16.gmra.mrb[40].mxu1 %vm646_vm0, %v1492_v61 }
  0x9b   : > { %815 = vmatprep.mubr.bf16.mxu0 %v1493_v62  ;;  %1376 = vmatprep.mubr.msk.bf16.mxu1 %vm646_vm0, %v1495_v63 }
  0xa2   : > { %816 = vmatmul.mubr.bf16.gmra.mrb[44].mxu0 %v1496_v0  ;;  %1377 = vmatmul.mubr.msk.bf16.gmra.mrb[44].mxu1 %vm646_vm0, %v1497_v1 }
 0x11d   : > { %v1230_v2 = vpop.f32.mrb[0].mxu0  ;;  %v1302_v3 = vpop.f32.mrb[0].mxu1 }
 0x11e   : > { %v1231_v4 = vpop.f32.mrb[1].mxu0  ;;  %v1303_v5 = vpop.f32.mrb[1].mxu1 }
 0x11f   : > { %v1232_v6 = vadd.f32 %v1231_v4, %v1230_v2  ;;  %v1233_v7 = vpop.f32.mrb[2].mxu0  ;;  %v1735_v8 = vadd.f32 %v1303_v5, %v1302_v3  ;;  %v1305_v9 = vpop.f32.mrb[2].mxu1 }
 0x120   : > { %v1234_v10 = vpop.f32.mrb[3].mxu0  ;;  %v1306_v11 = vpop.f32.mrb[3].mxu1 }
 0x121   : > { %v1235_v12 = vadd.f32 %v1234_v10, %v1233_v7  ;;  %v1737_v13 = vadd.f32 %v1306_v11, %v1305_v9  ;;  %v730_v54 = vadd.f32 %v1232_v6, %v1752_v50 }
 0x123   : > { %v733_v63 = vadd.f32 %v1235_v12, %v1752_v50 }
 0x125   : > { %v1236_v14 = vpop.f32.mrb[4].mxu0  ;;  %v1308_v15 = vpop.f32.mrb[4].mxu1 }
 0x126   : > { %v1237_v16 = vpop.f32.mrb[5].mxu0  ;;  %v1309_v17 = vpop.f32.mrb[5].mxu1 }
 0x127   : > { %v1238_v18 = vadd.f32 %v1237_v16, %v1236_v14  ;;  %v1239_v19 = vpop.f32.mrb[6].mxu0  ;;  %v1739_v20 = vadd.f32 %v1309_v17, %v1308_v15  ;;  %v1311_v21 = vpop.f32.mrb[6].mxu1 }
 0x128   : > { %v1240_v22 = vpop.f32.mrb[7].mxu0  ;;  %v1312_v23 = vpop.f32.mrb[7].mxu1 }
 0x129   : > { %v1241_v24 = vadd.f32 %v1240_v22, %v1239_v19  ;;  %v1741_v25 = vadd.f32 %v1312_v23, %v1311_v21  ;;  %v738_v51 = vadd.f32 %v1238_v18, %v1752_v50 }
 0x12b   : > { %v741_v58 = vadd.f32 %v1241_v24, %v1752_v50 }
 0x12d   : > { %v1242_v26 = vpop.f32.mrb[8].mxu0  ;;  %v1314_v27 = vpop.f32.mrb[8].mxu1 }
 0x12e   : > { %v1243_v28 = vpop.f32.mrb[9].mxu0  ;;  %v1315_v29 = vpop.f32.mrb[9].mxu1 }
 0x12f   : > { %v1244_v30 = vadd.f32 %v1243_v28, %v1242_v26  ;;  %v1245_v31 = vpop.f32.mrb[10].mxu0  ;;  %v1743_v32 = vadd.f32 %v1315_v29, %v1314_v27  ;;  %v1317_v33 = vpop.f32.mrb[10].mxu1 }
 0x130   : > { %v1246_v34 = vpop.f32.mrb[11].mxu0  ;;  %v1318_v35 = vpop.f32.mrb[11].mxu1 }
 0x131   : > { %v1247_v36 = vadd.f32 %v1246_v34, %v1245_v31  ;;  %v1745_v37 = vadd.f32 %v1318_v35, %v1317_v33  ;;  %v746_v9 = vadd.f32 %v1244_v30, %v1752_v50 }
 0x133   : > { %v749_v19 = vadd.f32 %v1247_v36, %v1752_v50 }
 0x135   : > { %v1248_v38 = vpop.f32.mrb[12].mxu0  ;;  %v1320_v39 = vpop.f32.mrb[12].mxu1 }
 0x136   : > { %v1249_v40 = vpop.f32.mrb[13].mxu0  ;;  %v1321_v41 = vpop.f32.mrb[13].mxu1 }
 0x137   : > { %v1250_v42 = vadd.f32 %v1249_v40, %v1248_v38  ;;  %v1251_v43 = vpop.f32.mrb[14].mxu0  ;;  %v1747_v44 = vadd.f32 %v1321_v41, %v1320_v39  ;;  %v1323_v45 = vpop.f32.mrb[14].mxu1 }
 0x138   : > { %v1252_v46 = vpop.f32.mrb[15].mxu0  ;;  %v1324_v47 = vpop.f32.mrb[15].mxu1 }
 0x139   : > { %v1253_v48 = vadd.f32 %v1252_v46, %v1251_v43  ;;  %v1749_v49 = vadd.f32 %v1324_v47, %v1323_v45  ;;  %v754_v5 = vadd.f32 %v1250_v42, %v1752_v50 }
 0x13b   : > { %v757_v14 = vadd.f32 %v1253_v48, %v1752_v50 }
 0x13d   : > { %v1254_v52 = vpop.f32.mrb[16].mxu0  ;;  %v1350_v53 = vpop.f32.mrb[16].mxu1 }
 0x13e   : > { %v899_v55 = vadd.f32 %v1350_v53, %v738_v51  ;;  %v1255_v56 = vpop.f32.mrb[17].mxu0  ;;  %v890_v57 = vpop.f32.mrb[17].mxu1 }
 0x13f   : > { %v1256_v59 = vadd.f32 %v1255_v56, %v1254_v52  ;;  %v891_v60 = vadd.f32 %v890_v57, %v730_v54  ;;  %v1257_v61 = vpop.f32.mrb[18].mxu0  ;;  %v1351_v62 = vpop.f32.mrb[18].mxu1 }
 0x140   : > { %1020 = vst.msk [vmem:[%s1758_s23 + $0x10] sm:$0xff] %vm1017_vm1, %v899_v55  ;;  %v902_v0 = vadd.f32 %v1351_v62, %v741_v58  ;;  %v1258_v1 = vpop.f32.mrb[19].mxu0  ;;  %v893_v2 = vpop.f32.mrb[19].mxu1 }
 0x141   : > { %1018 = vst.msk [vmem:[%s1758_s23] sm:$0xff] %vm1017_vm1, %v891_v60  ;;  %v1259_v3 = vadd.f32 %v1258_v1, %v1257_v61  ;;  %v894_v4 = vadd.f32 %v893_v2, %v733_v63  ;;  %v762_v30 = vadd.f32 %v1256_v59, %v1752_v50 }
 0x142   : > { %1021 = vst.msk [vmem:[%s1758_s23 + $0x18] sm:$0xff] %vm1017_vm1, %v902_v0 }
 0x143   : > { %1019 = vst.msk [vmem:[%s1758_s23 + $0x8] sm:$0xff] %vm1017_vm1, %v894_v4  ;;  %v765_v41 = vadd.f32 %v1259_v3, %v1752_v50 }
 0x145   : > { %v1260_v6 = vpop.f32.mrb[20].mxu0  ;;  %v1354_v7 = vpop.f32.mrb[20].mxu1 }
 0x146   : > { %v915_v10 = vadd.f32 %v1354_v7, %v754_v5  ;;  %v1261_v11 = vpop.f32.mrb[21].mxu0  ;;  %v906_v12 = vpop.f32.mrb[21].mxu1 }
 0x147   : > { %v1262_v15 = vadd.f32 %v1261_v11, %v1260_v6  ;;  %v907_v16 = vadd.f32 %v906_v12, %v746_v9  ;;  %v1263_v17 = vpop.f32.mrb[22].mxu0  ;;  %v1355_v18 = vpop.f32.mrb[22].mxu1 }
 0x148   : > { %1024 = vst.msk [vmem:[%s1758_s23 + $0x30] sm:$0xff] %vm1017_vm1, %v915_v10  ;;  %v918_v21 = vadd.f32 %v1355_v18, %v757_v14  ;;  %v1264_v22 = vpop.f32.mrb[23].mxu0  ;;  %v909_v23 = vpop.f32.mrb[23].mxu1 }
 0x149   : > { %1022 = vst.msk [vmem:[%s1758_s23 + $0x20] sm:$0xff] %vm1017_vm1, %v907_v16  ;;  %v1265_v24 = vadd.f32 %v1264_v22, %v1263_v17  ;;  %v910_v26 = vadd.f32 %v909_v23, %v749_v19  ;;  %v770_v27 = vadd.f32 %v1262_v15, %v1752_v50 }
 0x14a   : > { %1025 = vst.msk [vmem:[%s1758_s23 + $0x38] sm:$0xff] %vm1017_vm1, %v918_v21 }
 0x14b   : > { %1023 = vst.msk [vmem:[%s1758_s23 + $0x28] sm:$0xff] %vm1017_vm1, %v910_v26  ;;  %v773_v35 = vadd.f32 %v1265_v24, %v1752_v50 }
 0x14d   : > { %v1266_v28 = vpop.f32.mrb[24].mxu0  ;;  %v1358_v29 = vpop.f32.mrb[24].mxu1 }
 0x14e   : > { %v931_v31 = vadd.f32 %v1358_v29, %v770_v27  ;;  %v1267_v33 = vpop.f32.mrb[25].mxu0  ;;  %v922_v34 = vpop.f32.mrb[25].mxu1 }
 0x14f   : > { %v1268_v36 = vadd.f32 %v1267_v33, %v1266_v28  ;;  %v923_v38 = vadd.f32 %v922_v34, %v762_v30  ;;  %v1269_v39 = vpop.f32.mrb[26].mxu0  ;;  %v1359_v40 = vpop.f32.mrb[26].mxu1 }
 0x150   : > { %1028 = vst.msk [vmem:[%s1758_s23 + $0x50] sm:$0xff] %vm1017_vm1, %v931_v31  ;;  %v934_v42 = vadd.f32 %v1359_v40, %v773_v35  ;;  %v1270_v43 = vpop.f32.mrb[27].mxu0  ;;  %v925_v45 = vpop.f32.mrb[27].mxu1 }
 0x151   : > { %1026 = vst.msk [vmem:[%s1758_s23 + $0x40] sm:$0xff] %vm1017_vm1, %v923_v38  ;;  %v1271_v46 = vadd.f32 %v1270_v43, %v1269_v39  ;;  %v926_v47 = vadd.f32 %v925_v45, %v765_v41  ;;  %v778_v52 = vadd.f32 %v1268_v36, %v1752_v50  ;;  %v834_v36 = vadd.f32 %v1739_v20, %v1752_v50 }
 0x152   : > { %1029 = vst.msk [vmem:[%s1758_s23 + $0x58] sm:$0xff] %vm1017_vm1, %v934_v42  ;;  %v826_v41 = vadd.f32 %v1735_v8, %v1752_v50 }
 0x153   : > { %1027 = vst.msk [vmem:[%s1758_s23 + $0x48] sm:$0xff] %vm1017_vm1, %v926_v47  ;;  %v781_v59 = vadd.f32 %v1271_v46, %v1752_v50  ;;  %v837_v46 = vadd.f32 %v1741_v25, %v1752_v50 }
 0x155   : > { %v1272_v48 = vpop.f32.mrb[28].mxu0  ;;  %v1362_v51 = vpop.f32.mrb[28].mxu1 }
 0x156   : > { %v1273_v53 = vpop.f32.mrb[29].mxu0  ;;  %v938_v54 = vpop.f32.mrb[29].mxu1 }
 0x157   : > { %v1274_v55 = vadd.f32 %v1273_v53, %v1272_v48  ;;  %v939_v56 = vadd.f32 %v938_v54, %v778_v52  ;;  %v1275_v57 = vpop.f32.mrb[30].mxu0  ;;  %v1363_v58 = vpop.f32.mrb[30].mxu1  ;;  %v829_v52 = vadd.f32 %v1737_v13, %v1752_v50  ;;  %v850_v13 = vadd.f32 %v1747_v44, %v1752_v50 }
 0x158   : > { %v1276_v60 = vpop.f32.mrb[31].mxu0  ;;  %v941_v61 = vpop.f32.mrb[31].mxu1 }
 0x159   : > { %v786_v62 = vadd.f32 %v1274_v55, %v1752_v50  ;;  %1030 = vst.msk [vmem:[%s1758_s23 + $0x60] sm:$0xff] %vm1017_vm1, %v939_v56  ;;  %v1277_v63 = vadd.f32 %v1276_v60, %v1275_v57  ;;  %v942_v0 = vadd.f32 %v941_v61, %v781_v59 }
 0x15b   : > { %v947_v1 = vadd.f32 %v1362_v51, %v786_v62  ;;  %v789_v2 = vadd.f32 %v1277_v63, %v1752_v50  ;;  %1031 = vst.msk [vmem:[%s1758_s23 + $0x68] sm:$0xff] %vm1017_vm1, %v942_v0  ;;  %v842_v62 = vadd.f32 %v1743_v32, %v1752_v50  ;;  %v845_v32 = vadd.f32 %v1745_v37, %v1752_v50 }
 0x15d   : > { %1032 = vst.msk [vmem:[%s1758_s23 + $0x70] sm:$0xff] %vm1017_vm1, %v947_v1  ;;  %v950_v3 = vadd.f32 %v1363_v58, %v789_v2  ;;  %v1278_v4 = vpop.f32.mrb[32].mxu0  ;;  %v1366_v5 = vpop.f32.mrb[32].mxu1  ;;  %v853_v2 = vadd.f32 %v1749_v49, %v1752_v50 }
 0x15e   : > { %v1279_v6 = vpop.f32.mrb[33].mxu0  ;;  %v954_v7 = vpop.f32.mrb[33].mxu1 }
 0x15f   : > { %1033 = vst.msk [vmem:[%s1758_s23 + $0x78] sm:$0xff] %vm1017_vm1, %v950_v3  ;;  %v1280_v9 = vadd.f32 %v1279_v6, %v1278_v4  ;;  %v1281_v10 = vpop.f32.mrb[34].mxu0  ;;  %v1367_v11 = vpop.f32.mrb[34].mxu1 }
 0x160   : > { %v1282_v12 = vpop.f32.mrb[35].mxu0  ;;  %v957_v14 = vpop.f32.mrb[35].mxu1 }
 0x161   : > { %v794_v15 = vadd.f32 %v1280_v9, %v1752_v50  ;;  %v1283_v16 = vadd.f32 %v1282_v12, %v1281_v10 }
 0x163   : > { %v955_v17 = vadd.f32 %v954_v7, %v794_v15  ;;  %v797_v18 = vadd.f32 %v1283_v16, %v1752_v50 }
 0x165   : > { %1034 = vst.msk [vmem:[%s1758_s23 + $0x80] sm:$0xff] %vm1017_vm1, %v955_v17  ;;  %v958_v19 = vadd.f32 %v957_v14, %v797_v18  ;;  %v1284_v21 = vpop.f32.mrb[36].mxu0  ;;  %v1811_v22 = vpop.f32.mrb[36].mxu1 }
 0x166   : > { %v1285_v23 = vpop.f32.mrb[37].mxu0  ;;  %v970_v24 = vpop.f32.mrb[37].mxu1 }
 0x167   : > { %1035 = vst.msk [vmem:[%s1758_s23 + $0x88] sm:$0xff] %vm1017_vm1, %v958_v19  ;;  %v1286_v26 = vadd.f32 %v1285_v23, %v1284_v21  ;;  %v1287_v27 = vpop.f32.mrb[38].mxu0  ;;  %v1815_v28 = vpop.f32.mrb[38].mxu1 }
 0x168   : > { %v1288_v29 = vpop.f32.mrb[39].mxu0  ;;  %v973_v30 = vpop.f32.mrb[39].mxu1 }
 0x169   : > { %v802_v31 = vadd.f32 %v1286_v26, %v1752_v50  ;;  %v1289_v33 = vadd.f32 %v1288_v29, %v1287_v27 }
 0x16b   : > { %v963_v34 = vadd.f32 %v1366_v5, %v802_v31  ;;  %v805_v35 = vadd.f32 %v1289_v33, %v1752_v50 }
 0x16d   : > { %1036 = vst.msk [vmem:[%s1758_s23 + $0x90] sm:$0xff] %vm1017_vm1, %v963_v34  ;;  %v966_v38 = vadd.f32 %v1367_v11, %v805_v35  ;;  %v1290_v39 = vpop.f32.mrb[40].mxu0  ;;  %v1374_v40 = vpop.f32.mrb[40].mxu1 }
 0x16e   : > { %v995_v42 = vadd.f32 %v1374_v40, %v834_v36  ;;  %v1291_v43 = vpop.f32.mrb[41].mxu0  ;;  %v986_v45 = vpop.f32.mrb[41].mxu1 }
 0x16f   : > { %1037 = vst.msk [vmem:[%s1758_s23 + $0x98] sm:$0xff] %vm1017_vm1, %v966_v38  ;;  %v1292_v20 = vadd.f32 %v1291_v43, %v1290_v39  ;;  %v987_v47 = vadd.f32 %v986_v45, %v826_v41  ;;  %v1293_v48 = vpop.f32.mrb[42].mxu0  ;;  %v1375_v51 = vpop.f32.mrb[42].mxu1 }
 0x170   : > { %1044 = vst.msk [vmem:[%s1758_s23 + $0xd0] sm:$0xff] %vm1017_vm1, %v995_v42  ;;  %v998_v8 = vadd.f32 %v1375_v51, %v837_v46  ;;  %v1294_v53 = vpop.f32.mrb[43].mxu0  ;;  %v989_v54 = vpop.f32.mrb[43].mxu1 }
 0x171   : > { %v810_v55 = vadd.f32 %v1292_v20, %v1752_v50  ;;  %1042 = vst.msk [vmem:[%s1758_s23 + $0xc0] sm:$0xff] %vm1017_vm1, %v987_v47  ;;  %v1295_v25 = vadd.f32 %v1294_v53, %v1293_v48  ;;  %v990_v56 = vadd.f32 %v989_v54, %v829_v52 }
 0x172   : > { %1045 = vst.msk [vmem:[%s1758_s23 + $0xd8] sm:$0xff] %vm1017_vm1, %v998_v8 }
 0x173   : > { %v971_v57 = vadd.f32 %v970_v24, %v810_v55  ;;  %v813_v58 = vadd.f32 %v1295_v25, %v1752_v50  ;;  %1043 = vst.msk [vmem:[%s1758_s23 + $0xc8] sm:$0xff] %vm1017_vm1, %v990_v56 }
 0x175   : > { %1038 = vst.msk [vmem:[%s1758_s23 + $0xa0] sm:$0xff] %vm1017_vm1, %v971_v57  ;;  %v974_v59 = vadd.f32 %v973_v30, %v813_v58  ;;  %v1296_v60 = vpop.f32.mrb[44].mxu0  ;;  %v1378_v61 = vpop.f32.mrb[44].mxu1 }
 0x176   : > { %v1011_v63 = vadd.f32 %v1378_v61, %v850_v13  ;;  %v1297_v0 = vpop.f32.mrb[45].mxu0  ;;  %v1002_v1 = vpop.f32.mrb[45].mxu1 }
 0x177   : > { %1039 = vst.msk [vmem:[%s1758_s23 + $0xa8] sm:$0xff] %vm1017_vm1, %v974_v59  ;;  %v1298_v44 = vadd.f32 %v1297_v0, %v1296_v60  ;;  %v1003_v3 = vadd.f32 %v1002_v1, %v842_v62  ;;  %v1299_v4 = vpop.f32.mrb[46].mxu0  ;;  %v1379_v5 = vpop.f32.mrb[46].mxu1 }
 0x178   : > { %1048 = vst.msk [vmem:[%s1758_s23 + $0xf0] sm:$0xff] %vm1017_vm1, %v1011_v63  ;;  %v1014_v6 = vadd.f32 %v1379_v5, %v853_v2  ;;  %v1300_v7 = vpop.f32.mrb[47].mxu0  ;;  %v1005_v9 = vpop.f32.mrb[47].mxu1 }
 0x179   : > { %v818_v10 = vadd.f32 %v1298_v44, %v1752_v50  ;;  %1046 = vst.msk [vmem:[%s1758_s23 + $0xe0] sm:$0xff] %vm1017_vm1, %v1003_v3  ;;  %v1301_v49 = vadd.f32 %v1300_v7, %v1299_v4  ;;  %v1006_v11 = vadd.f32 %v1005_v9, %v845_v32 }
 0x17a   : > { %1049 = vst.msk [vmem:[%s1758_s23 + $0xf8] sm:$0xff] %vm1017_vm1, %v1014_v6 }
 0x17b   : > { %v979_v12 = vadd.f32 %v1811_v22, %v818_v10  ;;  %v821_v14 = vadd.f32 %v1301_v49, %v1752_v50  ;;  %1047 = vst.msk [vmem:[%s1758_s23 + $0xe8] sm:$0xff] %vm1017_vm1, %v1006_v11 }
 0x17d   : > { %1040 = vst.msk [vmem:[%s1758_s23 + $0xb0] sm:$0xff] %vm1017_vm1, %v979_v12  ;;  %v982_v37 = vadd.f32 %v1815_v28, %v821_v14 }
 0x17f   : > { %1041 = vst.msk [vmem:[%s1758_s23 + $0xb8] sm:$0xff] %vm1017_vm1, %v982_v37 }
 0x180 PF: > { %s14_s12 = sadd.s32 1, %s1536_s12  }
 0x181   : > { %p11_p3 = scmp.ge.s32.totalorder %s14_s12, 4  }
 0x183   :  { %13 = sbr.rel (!%p11_p3) target bundleno = 1 (0x1), region = 67 }
 0x18a   :  { %1072 = vsyncpa [#allocation3], 1 }
 0x18b   :  { %1074 = vsyncpa [#allocation3 + $0x1], 1 }

// kernel: decoder_forward.6
= control target key start
LH: loop header
LB: loop body
LE: loop exit
PB: predicated region body
PF: predicated region fallthrough
CT: control target
= control target key end

     0   :  { %s2740_s21 = smov 0   ;;  %s3820_s0 = inlined_call_operand.vmem [shape: bf16[512,576], index: 0, kind: input, shape index: {}]   ;;  %s3821_s1 = inlined_call_operand.vmem [shape: bf16[576,32], index: 1, kind: input, shape index: {}]   ;;  %s3822_s2 = inlined_call_operand.vmem [shape: f32[1,32], index: 2, kind: input, shape index: {}]   ;;  %s3823_s3 = inlined_call_operand.vmem [shape: bf16[32,64], index: 3, kind: input, shape index: {}]   ;;  %s3824_s4 = inlined_call_operand.vmem [shape: f32[1,64], index: 4, kind: input, shape index: {}]   ;;  %s3825_s5 = inlined_call_operand.vmem [shape: f32[512,64], index: 5, kind: input, shape index: {}]   ;;  %s3826_s6 = inlined_call_operand.vmem [shape: f32[512,64], index: 6, kind: output, shape index: {}]  }
   0x1 LB: > { %s2145_s22 = sadd.s32 4294967295, %s2702_s21   ;;  %p2149_p0 = scmp.ge.s32.totalorder %s2702_s21, 1  ;;  %s2702_s21 = sphi %s2740_s21, %s16_s21  }
   0x2   : > { %p225_p1 = scmp.lt.s32.totalorder %s2702_s21, 3 }
   0x4   : > { %p226_p2 = pnand %p2149_p0, %p225_p1 }
   0x6   : > { %229 = sbr.rel (%p226_p2) target bundleno = 672 (0x2a0), region = 44 }
   0xd   : > { %v2658_v0 = vld [vmem:[%s3821_s1 + $0x40] sm:$0xff]   ;;  %v2662_v4 = vld [vmem:[%s3821_s1 + $0x48] sm:$0xff]   ;;  %v2666_v8 = vld [vmem:[%s3821_s1 + $0x50] sm:$0xff]   ;;  %s2150_s29 = sshll.u32 %s2145_s22, 5  ;;  %v3832_v33 = vmov 0   ;;  %vm1168_vm0 = vcmask 523264  }
   0xe   : > { %v2659_v1 = vld [vmem:[%s3821_s1] sm:$0xff]   ;;  %2310 = vmatprep.subr.bf16.mxu0 %v2658_v0  ;;  %v2663_v5 = vld [vmem:[%s3821_s1 + $0x8] sm:$0xff]   ;;  %v2667_v9 = vld [vmem:[%s3821_s1 + $0x10] sm:$0xff]   ;;  %p262_p3 = scmp.lt.s32.totalorder %s2150_s29, 63  ;;  %vm1771_vm1 = vcmask 261120  }
   0xf   : > { %v2660_v2 = vld [vmem:[%s3821_s1 + $0xc0] sm:$0xff]   ;;  %2311 = vmatpush3.bf16.msra.mxu0 %v2659_v1  ;;  %v2664_v6 = vld [vmem:[%s3821_s1 + $0xc8] sm:$0xff]   ;;  %v2668_v10 = vld [vmem:[%s3821_s1 + $0xd0] sm:$0xff]  }
  0x10   : > { %v2661_v3 = vld [vmem:[%s3821_s1 + $0x80] sm:$0xff]   ;;  %2422 = vmatprep.subr.bf16.mxu1 %v2660_v2  ;;  %2312 = vmatprep.subr.bf16.mxu0 %v2662_v4  ;;  %v2665_v7 = vld [vmem:[%s3821_s1 + $0x88] sm:$0xff]   ;;  %v2669_v11 = vld [vmem:[%s3821_s1 + $0x90] sm:$0xff]   ;;  %s3925_s29 = smov (!%p262_p3, %s2150_s29), 63 }
  0x11   : > { %2423 = vmatpush3.bf16.msra.mxu1 %v2661_v3  ;;  %v2670_v12 = vld [vmem:[%s3821_s1 + $0x58] sm:$0xff]   ;;  %v2674_v16 = vld [vmem:[%s3821_s1 + $0x60] sm:$0xff]   ;;  %v2678_v20 = vld [vmem:[%s3821_s1 + $0x68] sm:$0xff]   ;;  %s2648_s30 = smul.u32 20, %s3925_s29  ;;  %s2153_s15 = sshll.u32 %s3925_s29, 3 }
  0x12   : > { %2424 = vmatprep.subr.bf16.mxu1 %v2664_v6  ;;  %v2671_v13 = vld [vmem:[%s3821_s1 + $0x18] sm:$0xff]   ;;  %v2675_v17 = vld [vmem:[%s3821_s1 + $0x20] sm:$0xff]   ;;  %v2679_v21 = vld [vmem:[%s3821_s1 + $0x28] sm:$0xff]   ;;  %s3677_s18 = scalar_lea.vmem %s3825_s5, %s2153_s15  ;;  %s3690_s24 = scalar_lea.vmem %s3826_s6, %s2153_s15 }
  0x13   : > { %2313 = vmatpush3.bf16.msra.mxu0 %v2663_v5  ;;  %v2672_v14 = vld [vmem:[%s3821_s1 + $0xd8] sm:$0xff]   ;;  %v2676_v18 = vld [vmem:[%s3821_s1 + $0xe0] sm:$0xff]   ;;  %v2680_v22 = vld [vmem:[%s3821_s1 + $0xe8] sm:$0xff]   ;;  %s2843_s16 = scalar_lea.vmem %s3820_s0, %s2648_s30 }
  0x14   : > { %2314 = vmatprep.subr.bf16.mxu0 %v2666_v8  ;;  %v2673_v15 = vld [vmem:[%s3821_s1 + $0x98] sm:$0xff]   ;;  %v2677_v19 = vld [vmem:[%s3821_s1 + $0xa0] sm:$0xff]   ;;  %v2681_v23 = vld [vmem:[%s3821_s1 + $0xa8] sm:$0xff]  }
  0x15   : > { %2425 = vmatpush3.bf16.msra.mxu1 %v2665_v7  ;;  %v2682_v24 = vld [vmem:[%s3821_s1 + $0x70] sm:$0xff]   ;;  %v2686_v28 = vld [vmem:[%s3821_s1 + $0x78] sm:$0xff]   ;;  %v281_v31 = vld [vmem:[%s2843_s16] sm:$0xff] }
  0x16   : > { %2426 = vmatprep.subr.bf16.mxu1 %v2668_v10  ;;  %v2683_v25 = vld [vmem:[%s3821_s1 + $0x30] sm:$0xff]   ;;  %v2687_v29 = vld [vmem:[%s3821_s1 + $0x38] sm:$0xff]   ;;  %v377_v34 = vmax.bf16 %v3832_v33, %v281_v31  ;;  %v2690_v37 = vld [vmem:[%s3821_s1 + $0x100] sm:$0xff]  }
  0x17   : > { %2315 = vmatpush3.bf16.msra.mxu0 %v2667_v9  ;;  %v2684_v26 = vld [vmem:[%s3821_s1 + $0xf0] sm:$0xff]   ;;  %v2688_v30 = vld [vmem:[%s3821_s1 + $0xf8] sm:$0xff]   ;;  %v282_v38 = vld [vmem:[%s2843_s16 + $0x8] sm:$0xff] }
  0x18   : > { %2316 = vmatprep.subr.bf16.mxu0 %v2670_v12  ;;  %v2685_v27 = vld [vmem:[%s3821_s1 + $0xb0] sm:$0xff]   ;;  %v2689_v36 = vld [vmem:[%s3821_s1 + $0xb8] sm:$0xff]   ;;  %v378_v42 = vmax.bf16 %v3832_v33, %v282_v38  ;;  %v287_v43 = vld [vmem:[%s2843_s16 + $0x28] sm:$0xff] }
  0x19   : > { %2427 = vmatpush3.bf16.msra.mxu1 %v2669_v11  ;;  %v284_v32 = vld [vmem:[%s2843_s16 + $0x14] sm:$0xff]  ;;  %v285_v41 = vld [vmem:[%s2843_s16 + $0x1c] sm:$0xff]  ;;  %v383_v46 = vmax.bf16 %v3832_v33, %v287_v43  ;;  %v291_v49 = vld [vmem:[%s2843_s16 + $0x44] sm:$0xff] }
  0x1a   : > { %2428 = vmatprep.subr.bf16.mxu1 %v2672_v14  ;;  %v380_v35 = vmax.bf16 %v3832_v33, %v284_v32  ;;  %v290_v44 = vld [vmem:[%s2843_s16 + $0x3c] sm:$0xff]  ;;  %v381_v45 = vmax.bf16 %v3832_v33, %v285_v41  ;;  %v288_v48 = vld [vmem:[%s2843_s16 + $0x30] sm:$0xff]  ;;  %v387_v52 = vmax.bf16 %v3832_v33, %v291_v49  ;;  %v296_v53 = vld [vmem:[%s2843_s16 + $0x64] sm:$0xff] }
  0x1b   : > { %2317 = vmatpush3.bf16.msra.mxu0 %v2671_v13  ;;  %v386_v47 = vmax.bf16 %v3832_v33, %v290_v44  ;;  %v293_v50 = vld [vmem:[%s2843_s16 + $0x50] sm:$0xff]  ;;  %v384_v51 = vmax.bf16 %v3832_v33, %v288_v48  ;;  %v2879_v59 = vmax.bf16 %v3832_v33, %v296_v53  ;;  %v294_v60 = vld [vmem:[%s2843_s16 + $0x58] sm:$0xff]  ;;  %v2691_v62 = vld [vmem:[%s3821_s1 + $0x108] sm:$0xff]  }
  0x1c   : > { %2318 = vmatprep.subr.bf16.mxu0 %v2674_v16  ;;  %v2158_v39 = vcombine.high %v377_v34, %v380_v35  ;;  %v2157_v40 = vcombine.low %v377_v34, %v380_v35  ;;  %v2160_v54 = vcombine.high %v378_v42, %v381_v45  ;;  %v2159_v55 = vcombine.low %v378_v42, %v381_v45  ;;  %v297_v61 = vld [vmem:[%s2843_s16 + $0x6c] sm:$0xff]  ;;  %v299_v63 = vld [vmem:[%s2843_s16 + $0x78] sm:$0xff]  ;;  %v300_v4 = vld [vmem:[%s2843_s16 + $0x80] sm:$0xff] }
  0x1d   : > { %2429 = vmatpush3.bf16.msra.mxu1 %v2673_v15  ;;  %v2163_v56 = vcombine.high %v383_v46, %v386_v47  ;;  %v2165_v57 = vcombine.high %v384_v51, %v387_v52  ;;  %v2876_v58 = vmax.bf16 %v3832_v33, %v293_v50  ;;  %v2162_v0 = vcombine.low %v383_v46, %v386_v47  ;;  %v302_v3 = vld [vmem:[%s2843_s16 + $0x8c] sm:$0xff]  ;;  %v303_v5 = vld [vmem:[%s2843_s16 + $0x94] sm:$0xff]  ;;  %v305_v7 = vld [vmem:[%s2843_s16 + $0xa0] sm:$0xff] }
  0x1e   : > { %2430 = vmatprep.subr.bf16.mxu1 %v2676_v18  ;;  %1249 = vmatprep.mubr.bf16.mxu0 %v2158_v39  ;;  %v2888_v1 = vmax.bf16 %v3832_v33, %v294_v60  ;;  %v2891_v2 = vmax.bf16 %v3832_v33, %v297_v61  ;;  %v308_v8 = vld [vmem:[%s2843_s16 + $0xb4] sm:$0xff]  ;;  %v306_v9 = vld [vmem:[%s2843_s16 + $0xa8] sm:$0xff]  ;;  %v309_v10 = vld [vmem:[%s2843_s16 + $0xbc] sm:$0xff]  ;;  %v2164_v13 = vcombine.low %v384_v51, %v387_v52 }
  0x1f   : > { %2319 = vmatpush3.bf16.msra.mxu0 %v2675_v17  ;;  %1410 = vmatprep.mubr.bf16.mxu1 %v2160_v54  ;;  %v2168_v6 = vcombine.high %v2876_v58, %v2879_v59  ;;  %v311_v11 = vld [vmem:[%s2843_s16 + $0xc8] sm:$0xff]  ;;  %v314_v12 = vld [vmem:[%s2843_s16 + $0xdc] sm:$0xff]  ;;  %v2905_v14 = vmax.bf16 %v3832_v33, %v299_v63  ;;  %v2908_v15 = vmax.bf16 %v3832_v33, %v302_v3  ;;  %v312_v17 = vld [vmem:[%s2843_s16 + $0xd0] sm:$0xff] }
  0x20   : > { %2320 = vmatprep.subr.bf16.mxu0 %v2678_v20  ;;  %v2911_v16 = vmax.bf16 %v3832_v33, %v300_v4  ;;  %v315_v18 = vld [vmem:[%s2843_s16 + $0xe4] sm:$0xff]  ;;  %v2918_v20 = vmax.bf16 %v3832_v33, %v303_v5  ;;  %v2167_v32 = vcombine.low %v2876_v58, %v2879_v59  ;;  %v2169_v34 = vcombine.low %v2888_v1, %v2891_v2  ;;  %v338_v38 = vld [vmem:[%s2843_s16 + $0x17c] sm:$0xff]  ;;  %v321_v43 = vld [vmem:[%s2843_s16 + $0x10c] sm:$0xff] }
  0x21   : > { %2431 = vmatpush3.bf16.msra.mxu1 %v2677_v19  ;;  %v2170_v19 = vcombine.high %v2888_v1, %v2891_v2  ;;  %v320_v31 = vld [vmem:[%s2843_s16 + $0x104] sm:$0xff]  ;;  %v2173_v35 = vcombine.high %v2905_v14, %v2908_v15  ;;  %v2172_v39 = vcombine.low %v2905_v14, %v2908_v15  ;;  %v336_v44 = vld [vmem:[%s2843_s16 + $0x170] sm:$0xff]  ;;  %v342_v52 = vld [vmem:[%s2843_s16 + $0x198] sm:$0xff]  ;;  %v3012_v2 = vmax.bf16 %v3832_v33, %v321_v43 }
  0x22   : > { %2432 = vmatprep.subr.bf16.mxu1 %v2680_v22  ;;  %v2924_v22 = vmax.bf16 %v3832_v33, %v308_v8  ;;  %v2174_v41 = vcombine.low %v2911_v16, %v2918_v20  ;;  %v339_v45 = vld [vmem:[%s2843_s16 + $0x184] sm:$0xff]  ;;  %v341_v50 = vld [vmem:[%s2843_s16 + $0x190] sm:$0xff]  ;;  %v347_v58 = vld [vmem:[%s2843_s16 + $0x1b8] sm:$0xff]  ;;  %v2996_v60 = vmax.bf16 %v3832_v33, %v320_v31  ;;  %v2999_v61 = vmax.bf16 %v3832_v33, %v336_v44 }
  0x23   : > { %2321 = vmatpush3.bf16.msra.mxu0 %v2679_v21  ;;  %v2921_v21 = vmax.bf16 %v3832_v33, %v305_v7  ;;  %v344_v51 = vld [vmem:[%s2843_s16 + $0x1a4] sm:$0xff]  ;;  %v350_v63 = vld [vmem:[%s2843_s16 + $0x1cc] sm:$0xff]  ;;  %v375_v31 = vld [vmem:[%s2843_s16 + $0x274] sm:$0xff] }
  0x24   : > { %2322 = vmatprep.subr.bf16.mxu0 %v2682_v24  ;;  %v2930_v24 = vmax.bf16 %v3832_v33, %v309_v10  ;;  %v348_v5 = vld [vmem:[%s2843_s16 + $0x1c0] sm:$0xff]  ;;  %v3028_v10 = vmax.bf16 %v3832_v33, %v344_v51  ;;  %v374_v43 = vld [vmem:[%s2843_s16 + $0x26c] sm:$0xff]  ;;  %v313_v4 = vld [vmem:[%s2843_s16 + $0xd8] sm:$0xf] }
  0x25   : > { %2433 = vmatpush3.bf16.msra.mxu1 %v2681_v23  ;;  %v2927_v23 = vmax.bf16 %v3832_v33, %v306_v9  ;;  %v2178_v42 = vcombine.high %v2921_v21, %v2924_v22  ;;  %v2177_v46 = vcombine.low %v2921_v21, %v2924_v22  ;;  %v3025_v9 = vmax.bf16 %v3832_v33, %v341_v50  ;;  %v360_v50 = vld [vmem:[%s2843_s16 + $0x210] sm:$0xff]  ;;  %v363_v51 = vld [vmem:[%s2843_s16 + $0x224] sm:$0xff]  ;;  %v328_v54 = vld [vmem:[%s2843_s16 + $0x13c] sm:$0xf] }
  0x26   : > { %2434 = vmatprep.subr.bf16.mxu1 %v2684_v26  ;;  %v2936_v26 = vmax.bf16 %v3832_v33, %v314_v12  ;;  %v372_v44 = vld [vmem:[%s2843_s16 + $0x260] sm:$0xff]  ;;  %v283_v14 = vld [vmem:[%s2843_s16 + $0x10] sm:$0xf]  ;;  %v322_v3 = vld [vmem:[%s2843_s16 + $0x114] sm:$0xf]  ;;  %v3256_v22 = vmax.bf16 %v3832_v33, %v328_v54 }
  0x27   : > { %2323 = vmatpush3.bf16.msra.mxu0 %v2683_v25  ;;  %v2933_v25 = vmax.bf16 %v3832_v33, %v311_v11  ;;  %v2180_v47 = vcombine.high %v2927_v23, %v2930_v24  ;;  %v3031_v11 = vmax.bf16 %v3832_v33, %v342_v52  ;;  %v331_v48 = vld [vmem:[%s2843_s16 + $0x150] sm:$0xf]  ;;  %v334_v49 = vld [vmem:[%s2843_s16 + $0x164] sm:$0xf] }
  0x28   : > { %2324 = vmatprep.subr.bf16.mxu0 %v2686_v28  ;;  %v2942_v28 = vmax.bf16 %v3832_v33, %v312_v17  ;;  %v3040_v17 = vmax.bf16 %v3832_v33, %v350_v63  ;;  %v3271_v54 = vmax.bf16 %v3832_v33, %v334_v49 }
  0x29   : > { %2435 = vmatpush3.bf16.msra.mxu1 %v2685_v27  ;;  %v2692_v27 = vld [vmem:[%s3821_s1 + $0x110] sm:$0xff]   ;;  %v3850_v21 = vcombine.high %v2933_v25, %v2936_v26 }
  0x2a   : > { %2436 = vmatprep.subr.bf16.mxu1 %v2688_v30  ;;  %v317_v30 = vld [vmem:[%s2843_s16 + $0xf0] sm:$0xff]  ;;  %3853 = vst [vmem:[#allocation8_spill] sm:$0xff] %v3271_v54  ;;  %v324_v54 = vld [vmem:[%s2843_s16 + $0x120] sm:$0xff] }
  0x2b   : > { %2325 = vmatpush3.bf16.msra.mxu0 %v2687_v29  ;;  %v2945_v29 = vmax.bf16 %v3832_v33, %v315_v18  ;;  %v2993_v59 = vmax.bf16 %v3832_v33, %v317_v30  ;;  %v353_v18 = vld [vmem:[%s2843_s16 + $0x1e0] sm:$0xff]  ;;  %v301_v30 = vld [vmem:[%s2843_s16 + $0x88] sm:$0xf] }
  0x2c   : > { %2572 = vmatprep.subr.bf16.mxu0 %v2690_v37 }
  0x2d   : > { %2437 = vmatpush3.bf16.msra.mxu1 %v2689_v36  ;;  %v318_v36 = vld [vmem:[%s2843_s16 + $0xf8] sm:$0xff] }
  0x2e   : > { %1250 = vmatmul.mubr.bf16.vlgmr.msra.gmra.mrb[0].mxu0 %v2157_v40  ;;  %v2175_v40 = vcombine.high %v2911_v16, %v2918_v20  ;;  %v3009_v1 = vmax.bf16 %v3832_v33, %v318_v36  ;;  %v357_v36 = vld [vmem:[%s2843_s16 + $0x1fc] sm:$0xff] }
  0x2f   : > { %2573 = vmatpush3.bf16.msra.mxu0 %v2690_v37  ;;  %1257 = vmatprep.mubr.bf16.mxu0 %v2163_v56  ;;  %v335_v37 = vld [vmem:[%s2843_s16 + $0x168] sm:$0xff]  ;;  %v2988_v56 = vmax.bf16 %v3832_v33, %v338_v38  ;;  %v362_v38 = vld [vmem:[%s2843_s16 + $0x21c] sm:$0xff] }
  0x30   : > { %1411 = vmatmul.mubr.bf16.vlgmr.msra.gmra.mrb[0].mxu1 %v2159_v55  ;;  %2574 = vmatprep.subr.bf16.mxu0 %v2691_v62  ;;  %v2985_v55 = vmax.bf16 %v3832_v33, %v335_v37  ;;  %v359_v37 = vld [vmem:[%s2843_s16 + $0x208] sm:$0xff]  ;;  %v3088_v52 = vmax.bf16 %v3832_v33, %v362_v38 }
  0x31   : > { %1418 = vmatprep.mubr.bf16.mxu1 %v2165_v57  ;;  %v345_v57 = vld [vmem:[%s2843_s16 + $0x1ac] sm:$0xff] }
  0x32   : > { %v3034_v12 = vmax.bf16 %v3832_v33, %v345_v57  ;;  %v3073_v57 = vmax.bf16 %v3832_v33, %v353_v18  ;;  %v365_v18 = vld [vmem:[%s2843_s16 + $0x230] sm:$0xff] }
  0x33   : > { %2575 = vmatpush3.bf16.msra.mxu0 %v2691_v62  ;;  %v3002_v62 = vmax.bf16 %v3832_v33, %v339_v45  ;;  %v368_v45 = vld [vmem:[%s2843_s16 + $0x244] sm:$0xff]  ;;  %v369_v38 = vld [vmem:[%s2843_s16 + $0x24c] sm:$0xff] }
  0x34   : > { %2576 = vmatprep.subr.bf16.mxu0 %v2692_v27 }
  0x36   : > { %1258 = vmatmul.mubr.bf16.gmra.mrb[4].mxu0 %v2162_v0  ;;  %v2693_v0 = vld [vmem:[%s3821_s1 + $0x118] sm:$0xff]  }
  0x37   : > { %1265 = vmatprep.mubr.bf16.mxu0 %v2168_v6  ;;  %2577 = vmatpush3.bf16.msra.mxu0 %v2692_v27  ;;  %v351_v6 = vld [vmem:[%s2843_s16 + $0x1d4] sm:$0xff]  ;;  %v354_v27 = vld [vmem:[%s2843_s16 + $0x1e8] sm:$0xff] }
  0x38   : > { %1419 = vmatmul.mubr.bf16.gmra.mrb[4].mxu1 %v2164_v13  ;;  %v3037_v13 = vmax.bf16 %v3832_v33, %v347_v58  ;;  %2578 = vmatprep.subr.bf16.mxu0 %v2693_v0  ;;  %v3079_v63 = vmax.bf16 %v3832_v33, %v354_v27  ;;  %v3131_v27 = vmax.bf16 %v3832_v33, %v368_v45  ;;  %v298_v45 = vld [vmem:[%s2843_s16 + $0x74] sm:$0xf] }
  0x39   : > { %1426 = vmatprep.mubr.bf16.mxu1 %v2170_v19  ;;  %v356_v19 = vld [vmem:[%s2843_s16 + $0x1f4] sm:$0xff]  ;;  %v3199_v16 = vmax.bf16 %v3832_v33, %v298_v45  ;;  %v325_v45 = vld [vmem:[%s2843_s16 + $0x128] sm:$0xf] }
  0x3a   : > { %v3076_v58 = vmax.bf16 %v3832_v33, %v356_v19  ;;  %v366_v19 = vld [vmem:[%s2843_s16 + $0x238] sm:$0xff] }
  0x3b   : > { %2579 = vmatpush3.bf16.msra.mxu0 %v2693_v0  ;;  %v289_v0 = vld [vmem:[%s2843_s16 + $0x38] sm:$0xf]  ;;  %v3137_v8 = vmax.bf16 %v3832_v33, %v366_v19  ;;  %v3182_v19 = vmax.bf16 %v3832_v33, %v283_v14  ;;  %3847 = vst [vmem:[#allocation4_spill] sm:$0xff] %v3199_v16  ;;  %v316_v14 = vld [vmem:[%s2843_s16 + $0xec] sm:$0xf] }
  0x3c   : > { %v346_v16 = vld [vmem:[%s2843_s16 + $0x1b4] sm:$0xf] }
  0x3d   : > { %v3288_v49 = vmax.bf16 %v3832_v33, %v346_v16  ;;  %v358_v16 = vld [vmem:[%s2843_s16 + $0x204] sm:$0xf] }
  0x3e   : > { %1266 = vmatmul.mubr.bf16.gmra.mrb[8].mxu0 %v2167_v32  ;;  %v3050_v32 = vmax.bf16 %v3832_v33, %v348_v5  ;;  %v3082_v5 = vmax.bf16 %v3832_v33, %v357_v36  ;;  %v3098_v36 = vmax.bf16 %v3832_v33, %v360_v50  ;;  %v3128_v50 = vmax.bf16 %v3832_v33, %v365_v18 }
  0x3f   : > { %1273 = vmatprep.mubr.bf16.mxu0 %v2173_v35  ;;  %v3053_v35 = vmax.bf16 %v3832_v33, %v351_v6  ;;  %v3085_v6 = vmax.bf16 %v3832_v33, %v359_v37  ;;  %v3101_v37 = vmax.bf16 %v3832_v33, %v363_v51  ;;  %v286_v51 = vld [vmem:[%s2843_s16 + $0x24] sm:$0xf]  ;;  %v3146_v18 = vmax.bf16 %v3832_v33, %v374_v43 }
  0x40   : > { %1427 = vmatmul.mubr.bf16.gmra.mrb[8].mxu1 %v2169_v34  ;;  %v292_v34 = vld [vmem:[%s2843_s16 + $0x4c] sm:$0xf]  ;;  %v3162_v43 = vmax.bf16 %v3832_v33, %v375_v31  ;;  %v3185_v20 = vmax.bf16 %v3832_v33, %v286_v51  ;;  %v3190_v31 = vmax.bf16 %v3832_v33, %v289_v0  ;;  %v319_v51 = vld [vmem:[%s2843_s16 + $0x100] sm:$0xf]  ;;  %v3207_v0 = vmax.bf16 %v3832_v33, %v301_v30 }
  0x41   : > { %1434 = vmatprep.mubr.bf16.mxu1 %v2175_v40  ;;  %v371_v40 = vld [vmem:[%s2843_s16 + $0x258] sm:$0xff]  ;;  %v3193_v7 = vmax.bf16 %v3832_v33, %v292_v34  ;;  %v343_v30 = vld [vmem:[%s2843_s16 + $0x1a0] sm:$0xf]  ;;  %3857 = vst [vmem:[#allocation11_spill] sm:$0xff] %v3288_v49 }
  0x42   : > { %v3143_v15 = vmax.bf16 %v3832_v33, %v371_v40  ;;  %v307_v40 = vld [vmem:[%s2843_s16 + $0xb0] sm:$0xf]  ;;  %3845 = vst [vmem:[#allocation2_spill] sm:$0xff] %v3185_v20  ;;  %v337_v20 = vld [vmem:[%s2843_s16 + $0x178] sm:$0xf] }
  0x46   : > { %1274 = vmatmul.mubr.bf16.gmra.mrb[12].mxu0 %v2172_v39  ;;  %v295_v39 = vld [vmem:[%s2843_s16 + $0x60] sm:$0xf] }
  0x47   : > { %1281 = vmatprep.mubr.bf16.mxu0 %v2178_v42  ;;  %v3140_v42 = vmax.bf16 %v3832_v33, %v369_v38  ;;  %v3159_v38 = vmax.bf16 %v3832_v33, %v372_v44  ;;  %v304_v44 = vld [vmem:[%s2843_s16 + $0x9c] sm:$0xf] }
  0x48   : > { %1435 = vmatmul.mubr.bf16.gmra.mrb[12].mxu1 %v2174_v41  ;;  %v310_v41 = vld [vmem:[%s2843_s16 + $0xc4] sm:$0xf]  ;;  %v3210_v34 = vmax.bf16 %v3832_v33, %v304_v44  ;;  %v3245_v44 = vmax.bf16 %v3832_v33, %v322_v3  ;;  %v3852_v3 = vcombine.low %v2927_v23, %v2930_v24 }
  0x49   : > { %1442 = vmatprep.mubr.bf16.mxu1 %v2180_v47  ;;  %v3196_v47 = vmax.bf16 %v3832_v33, %v295_v39  ;;  %v3213_v39 = vmax.bf16 %v3832_v33, %v307_v40  ;;  %v3226_v53 = vmax.bf16 %v3832_v33, %v310_v41  ;;  %v3229_v40 = vmax.bf16 %v3832_v33, %v313_v4  ;;  %v340_v4 = vld [vmem:[%s2843_s16 + $0x18c] sm:$0xf] }
  0x4a   : > { %3848 = vst [vmem:[#allocation5_spill] sm:$0xff] %v3210_v34  ;;  %v3242_v41 = vmax.bf16 %v3832_v33, %v319_v51  ;;  %v349_v51 = vld [vmem:[%s2843_s16 + $0x1c8] sm:$0xf]  ;;  %v352_v34 = vld [vmem:[%s2843_s16 + $0x1dc] sm:$0xf]  ;;  %v3282_v24 = vmax.bf16 %v3832_v33, %v340_v4 }
  0x4b   : > { %3846 = vst [vmem:[#allocation3_spill] sm:$0xff] %v3196_v47  ;;  %3849 = vst [vmem:[#allocation6_spill] sm:$0xff] %v3226_v53  ;;  %v3855_v53 = vcombine.high %v2942_v28, %v2945_v29  ;;  %v3295_v23 = vmax.bf16 %v3832_v33, %v349_v51  ;;  %v3298_v4 = vmax.bf16 %v3832_v33, %v352_v34 }
  0x4c   : > { %3856 = vst [vmem:[#allocation10_spill] sm:$0xff] %v3282_v24  ;;  %v3860_v34 = vcombine.low %v2933_v25, %v2936_v26  ;;  %v3861_v24 = vmov 0   ;;  %v361_v26 = vld [vmem:[%s2843_s16 + $0x218] sm:$0xf] }
  0x4d   : > { %3858 = vst [vmem:[#allocation12_spill] sm:$0xff] %v3295_v23  ;;  %3859 = vst [vmem:[#allocation13_spill] sm:$0xff] %v3298_v4  ;;  %v3325_v25 = vmax.bf16 %v3861_v24, %v358_v16  ;;  %v3330_v51 = vmax.bf16 %v3861_v24, %v361_v26  ;;  %v329_v4 = vld [vmem:[%s2843_s16 + $0x140] sm:$0xff]  ;;  %v376_v23 = vld [vmem:[%s2843_s16 + $0x27c] sm:$0xf] }
  0x4e   : > { %1282 = vmatmul.mubr.bf16.gmra.mrb[16].mxu0 %v2177_v46  ;;  %v3239_v46 = vmax.bf16 %v3832_v33, %v316_v14  ;;  %v3259_v14 = vmax.bf16 %v3832_v33, %v331_v48  ;;  %v3274_v48 = vmax.bf16 %v3832_v33, %v337_v20  ;;  %v2188_v20 = vcombine.high %v2993_v59, %v2996_v60 }
  0x4f   : > { %1289 = vmatprep.mubr.bf16.mxu0 %v3850_v21  ;;  %v3253_v21 = vmax.bf16 %v3832_v33, %v325_v45  ;;  %v323_v45 = vld [vmem:[%s2843_s16 + $0x118] sm:$0xff]  ;;  %3863 = vst [vmem:[#allocation15_spill] sm:$0xff] %v3325_v25  ;;  %3864 = vst [vmem:[#allocation16_spill] sm:$0xff] %v3330_v51  ;;  %v373_v51 = vld [vmem:[%s2843_s16 + $0x268] sm:$0xf] }
  0x50   : > { %3851 = vst [vmem:[#allocation7_spill] sm:$0xff] %v3259_v14  ;;  %1443 = vmatmul.mubr.bf16.gmra.mrb[16].mxu1 %v3852_v3  ;;  %3854 = vst [vmem:[#allocation9_spill] sm:$0xff] %v3274_v48  ;;  %v3285_v3 = vmax.bf16 %v3832_v33, %v343_v30  ;;  %v326_v30 = vld [vmem:[%s2843_s16 + $0x12c] sm:$0xff]  ;;  %v2190_v33 = vcombine.high %v3009_v1, %v3012_v2  ;;  %v419_v48 = vmax.bf16 %v3861_v24, %v323_v45 }
  0x51   : > { %1450 = vmatprep.mubr.bf16.mxu1 %v3855_v53  ;;  %v2184_v53 = vcombine.low %v2942_v28, %v2945_v29  ;;  %v355_v14 = vld [vmem:[%s2843_s16 + $0x1f0] sm:$0xf]  ;;  %v422_v47 = vmax.bf16 %v3861_v24, %v326_v30  ;;  %v327_v28 = vld [vmem:[%s2843_s16 + $0x134] sm:$0xff]  ;;  %v420_v30 = vmax.bf16 %v3861_v24, %v324_v54  ;;  %v425_v54 = vmax.bf16 %v3861_v24, %v329_v4 }
  0x52   : > { %v3322_v29 = vmax.bf16 %v3861_v24, %v355_v14  ;;  %v2187_v14 = vcombine.low %v2993_v59, %v2996_v60  ;;  %v423_v16 = vmax.bf16 %v3861_v24, %v327_v28  ;;  %v330_v59 = vld [vmem:[%s2843_s16 + $0x148] sm:$0xff]  ;;  %v370_v60 = vld [vmem:[%s2843_s16 + $0x254] sm:$0xf] }
  0x54   : > { %3862 = vst [vmem:[#allocation14_spill] sm:$0xff] %v3322_v29  ;;  %v2195_v25 = vcombine.high %v420_v30, %v423_v16  ;;  %v333_v29 = vld [vmem:[%s2843_s16 + $0x15c] sm:$0xff]  ;;  %v2194_v49 = vcombine.low %v420_v30, %v423_v16  ;;  %v3872_v30 = vcombine.low %v3025_v9, %v3028_v10  ;;  %v3886_v16 = vcombine.low %v3098_v36, %v3101_v37 }
  0x56   : > { %1290 = vmatmul.mubr.bf16.gmra.mrb[20].mxu0 %v3860_v34  ;;  %v364_v34 = vld [vmem:[%s2843_s16 + $0x22c] sm:$0xf] }
  0x57   : > { %1297 = vmatprep.mubr.bf16.mxu0 %v2188_v20  ;;  %v3333_v45 = vmax.bf16 %v3861_v24, %v364_v34  ;;  %v2193_v34 = vcombine.high %v419_v48, %v422_v47  ;;  %v2189_v20 = vcombine.low %v3009_v1, %v3012_v2  ;;  %v3362_v1 = vmax.bf16 %v3861_v24, %v373_v51 }
  0x58   : > { %1451 = vmatmul.mubr.bf16.gmra.mrb[20].mxu1 %v2184_v53  ;;  %v332_v53 = vld [vmem:[%s2843_s16 + $0x154] sm:$0xff]  ;;  %v3365_v2 = vmax.bf16 %v3861_v24, %v376_v23 }
  0x59   : > { %3865 = vst [vmem:[#allocation17_spill] sm:$0xff] %v3333_v45  ;;  %1458 = vmatprep.mubr.bf16.mxu1 %v2190_v33  ;;  %v367_v33 = vld [vmem:[%s2843_s16 + $0x240] sm:$0xf]  ;;  %v428_v28 = vmax.bf16 %v3861_v24, %v332_v53  ;;  %v3357_v45 = vmax.bf16 %v3861_v24, %v370_v60  ;;  %v429_v53 = vmax.bf16 %v3861_v24, %v333_v29 }
  0x5a   : > { %v3354_v26 = vmax.bf16 %v3861_v24, %v367_v33  ;;  %v2236_v33 = vcombine.low %v3362_v1, %v3365_v2  ;;  %v3870_v29 = vcombine.low %v2999_v61, %v3002_v62  ;;  %v3910_v2 = vld [vmem:[#allocation9_spill] sm:$0xff] }
  0x5b   : > { %v2198_v60 = vcombine.high %v425_v54, %v428_v28  ;;  %v2197_v23 = vcombine.low %v425_v54, %v428_v28  ;;  %v3898_v54 = vld [vmem:[#allocation4_spill] sm:$0xff] }
  0x5c   : > { %v2231_v4 = vcombine.low %v3354_v26, %v3357_v45 }
  0x5e   : > { %1298 = vmatmul.mubr.bf16.gmra.mrb[24].mxu0 %v2187_v14  ;;  %v2192_v14 = vcombine.low %v419_v48, %v422_v47  ;;  %v3866_v47 = vcombine.high %v2985_v55, %v2988_v56  ;;  %v3867_v48 = vcombine.high %v2999_v61, %v3002_v62  ;;  %v3875_v61 = vcombine.high %v3050_v32, %v3053_v35 }
  0x5f   : > { %1305 = vmatprep.mubr.bf16.mxu0 %v2193_v34  ;;  %v426_v34 = vmax.bf16 %v3861_v24, %v330_v59  ;;  %v3868_v24 = vcombine.low %v2985_v55, %v2988_v56  ;;  %v3873_v55 = vcombine.high %v3037_v13, %v3040_v17  ;;  %v3874_v56 = vcombine.low %v3031_v11, %v3034_v12 }
  0x60   : > { %1459 = vmatmul.mubr.bf16.gmra.mrb[24].mxu1 %v2189_v20  ;;  %v3876_v62 = vcombine.low %v3037_v13, %v3040_v17  ;;  %v3881_v13 = vcombine.high %v3085_v6, %v3088_v52  ;;  %v2694_v17 = vld [vmem:[%s3823_s3] sm:$0xff]   ;;  %v3895_v59 = vcombine.low %v3159_v38, %v3162_v43 }
  0x61   : > { %1466 = vmatprep.mubr.bf16.mxu1 %v2195_v25  ;;  %v2200_v51 = vcombine.high %v426_v34, %v429_v53  ;;  %v2199_v20 = vcombine.low %v426_v34, %v429_v53  ;;  %v3871_v25 = vcombine.high %v3031_v11, %v3034_v12  ;;  %v3879_v11 = vcombine.high %v3079_v63, %v3082_v5  ;;  %v3918_v53 = vld [vmem:[#allocation14_spill] sm:$0xff] }
  0x62   : > { %v3880_v12 = vcombine.low %v3073_v57, %v3076_v58  ;;  %2612 = vmatprep.subr.bf16.mxu1 %v2694_v17 }
  0x63   : > { %2613 = vmatpush3.bf16.msra.mxu1 %v2694_v17 }
  0x66   : > { %1306 = vmatmul.mubr.bf16.gmra.mrb[28].mxu0 %v2192_v14  ;;  %v3911_v14 = vld [vmem:[#allocation10_spill] sm:$0xff] }
  0x67   : > { %1313 = vmatprep.mubr.bf16.mxu0 %v2198_v60  ;;  %v3919_v60 = vld [vmem:[#allocation15_spill] sm:$0xff] }
  0x68   : > { %1467 = vmatmul.mubr.bf16.gmra.mrb[28].mxu1 %v2194_v49  ;;  %v3869_v49 = vcombine.high %v3025_v9, %v3028_v10  ;;  %v3877_v9 = vcombine.high %v3073_v57, %v3076_v58  ;;  %v3878_v10 = vcombine.low %v3050_v32, %v3053_v35  ;;  %v3882_v32 = vcombine.low %v3079_v63, %v3082_v5 }
  0x69   : > { %1474 = vmatprep.mubr.bf16.mxu1 %v2200_v51  ;;  %v3883_v35 = vcombine.high %v3098_v36, %v3101_v37  ;;  %v3884_v57 = vcombine.low %v3085_v6, %v3088_v52  ;;  %v3885_v58 = vcombine.high %v3128_v50, %v3131_v27  ;;  %v3887_v63 = vcombine.high %v3137_v8, %v3140_v42 }
  0x6a   : > { %v3888_v5 = vcombine.low %v3128_v50, %v3131_v27  ;;  %v3889_v52 = vcombine.high %v3143_v15, %v3146_v18  ;;  %v3890_v6 = vcombine.low %v3137_v8, %v3140_v42  ;;  %v3891_v36 = vcombine.high %v3159_v38, %v3162_v43  ;;  %v3893_v27 = vld [vmem:[#allocation2_spill] sm:$0xff]  ;;  %v3897_v42 = vld [vmem:[#allocation3_spill] sm:$0xff] }
  0x6b   : > { %v3892_v37 = vcombine.low %v3143_v15, %v3146_v18  ;;  %v3894_v50 = vcombine.low %v3182_v19, %v3893_v27  ;;  %v3896_v8 = vcombine.low %v3190_v31, %v3193_v7  ;;  %v3899_v28 = vcombine.low %v3897_v42, %v3898_v54  ;;  %v3900_v15 = vld [vmem:[#allocation5_spill] sm:$0xff]  ;;  %v3902_v19 = vld [vmem:[#allocation6_spill] sm:$0xff]  ;;  %v3907_v31 = vld [vmem:[#allocation7_spill] sm:$0xff] }
  0x6c   : > { %v3901_v18 = vcombine.low %v3207_v0, %v3900_v15  ;;  %v3903_v1 = vcombine.low %v3213_v39, %v3902_v19  ;;  %v3904_v7 = vcombine.low %v3229_v40, %v3239_v46  ;;  %v3905_v38 = vcombine.low %v3242_v41, %v3245_v44  ;;  %v3908_v0 = vld [vmem:[#allocation8_spill] sm:$0xff]  ;;  %v3913_v46 = vld [vmem:[#allocation11_spill] sm:$0xff] }
  0x6d   : > { %v3906_v43 = vcombine.low %v3253_v21, %v3256_v22  ;;  %v3909_v39 = vcombine.low %v3907_v31, %v3908_v0  ;;  %v3912_v40 = vcombine.low %v3910_v2, %v3911_v14  ;;  %v3914_v44 = vcombine.low %v3285_v3, %v3913_v46  ;;  %v2695_v22 = vld [vmem:[%s3823_s3 + $0x8] sm:$0xff]   ;;  %v3915_v41 = vld [vmem:[#allocation12_spill] sm:$0xff]  ;;  %v3916_v21 = vld [vmem:[#allocation13_spill] sm:$0xff] }
  0x6e   : > { %1314 = vmatmul.mubr.bf16.gmra.mrb[32].mxu0 %v2197_v23  ;;  %2614 = vmatprep.subr.bf16.mxu1 %v2695_v22  ;;  %v3917_v34 = vcombine.low %v3915_v41, %v3916_v21  ;;  %v3920_v51 = vcombine.low %v3918_v53, %v3919_v60  ;;  %v3921_v23 = vld [vmem:[#allocation16_spill] sm:$0xff]  ;;  %v3922_v3 = vld [vmem:[#allocation17_spill] sm:$0xff] }
  0x6f   : > { %1321 = vmatprep.mubr.bf16.mxu0 %v3866_v47  ;;  %2615 = vmatpush3.bf16.msra.mxu1 %v2695_v22 }
  0x70   : > { %1475 = vmatmul.mubr.bf16.gmra.mrb[32].mxu1 %v2199_v20  ;;  %v3923_v20 = vcombine.low %v3921_v23, %v3922_v3 }
  0x71   : > { %1482 = vmatprep.mubr.bf16.mxu1 %v3867_v48  ;;  %v3527_v48 = vld [vmem:[%s3822_s2] ss:$0 sm:$0xff] }
  0x76   : > { %1322 = vmatmul.mubr.bf16.gmra.mrb[36].mxu0 %v3868_v24 }
  0x77   : > { %1329 = vmatprep.mubr.bf16.mxu0 %v3869_v49 }
  0x78   : > { %1483 = vmatmul.mubr.bf16.gmra.mrb[36].mxu1 %v3870_v29 }
  0x79   : > { %1490 = vmatprep.mubr.bf16.mxu1 %v3871_v25 }
  0x7e   : > { %1330 = vmatmul.mubr.bf16.gmra.mrb[40].mxu0 %v3872_v30 }
  0x7f   : > { %1337 = vmatprep.mubr.bf16.mxu0 %v3873_v55 }
  0x80   : > { %1491 = vmatmul.mubr.bf16.gmra.mrb[40].mxu1 %v3874_v56 }
  0x81   : > { %1498 = vmatprep.mubr.bf16.mxu1 %v3875_v61 }
  0x86   : > { %1338 = vmatmul.mubr.bf16.gmra.mrb[44].mxu0 %v3876_v62 }
  0x87   : > { %1345 = vmatprep.mubr.bf16.mxu0 %v3877_v9 }
  0x88   : > { %1499 = vmatmul.mubr.bf16.gmra.mrb[44].mxu1 %v3878_v10 }
  0x89   : > { %1506 = vmatprep.mubr.bf16.mxu1 %v3879_v11 }
  0x8e   : > { %1346 = vmatmul.mubr.bf16.gmra.mrb[48].mxu0 %v3880_v12 }
  0x8f   : > { %1353 = vmatprep.mubr.bf16.mxu0 %v3881_v13 }
  0x90   : > { %1507 = vmatmul.mubr.bf16.gmra.mrb[48].mxu1 %v3882_v32 }
  0x91   : > { %1514 = vmatprep.mubr.bf16.mxu1 %v3883_v35 }
  0x96   : > { %1354 = vmatmul.mubr.bf16.gmra.mrb[52].mxu0 %v3884_v57 }
  0x97   : > { %1361 = vmatprep.mubr.bf16.mxu0 %v3885_v58 }
  0x98   : > { %1515 = vmatmul.mubr.bf16.gmra.mrb[52].mxu1 %v3886_v16 }
  0x99   : > { %1522 = vmatprep.mubr.bf16.mxu1 %v3887_v63 }
  0x9e   : > { %1362 = vmatmul.mubr.bf16.gmra.mrb[56].mxu0 %v3888_v5 }
  0x9f   : > { %1369 = vmatprep.mubr.bf16.mxu0 %v3889_v52 }
  0xa0   : > { %1523 = vmatmul.mubr.bf16.gmra.mrb[56].mxu1 %v3890_v6 }
  0xa1   : > { %1530 = vmatprep.mubr.bf16.mxu1 %v3891_v36 }
  0xa6   : > { %1370 = vmatmul.mubr.bf16.gmra.mrb[60].mxu0 %v3892_v37 }
  0xa7   : > { %2580 = vmatprep.mubr.msk.bf16.mxu0 %vm1168_vm0, %v3894_v50 }
  0xa8   : > { %1531 = vmatmul.mubr.bf16.gmra.mrb[60].mxu1 %v3895_v59 }
  0xae   : > { %2581 = vmatmul.mubr.msk.bf16.vlgmr.msra.gmra.mrb[64].mxu0 %vm1168_vm0, %v3896_v8 }
  0xaf   : > { %2584 = vmatprep.mubr.msk.bf16.mxu0 %vm1168_vm0, %v3899_v28 }
  0xb6   : > { %2585 = vmatmul.mubr.msk.bf16.gmra.mrb[68].mxu0 %vm1168_vm0, %v3901_v18 }
  0xb7   : > { %2588 = vmatprep.mubr.msk.bf16.mxu0 %vm1168_vm0, %v3903_v1 }
  0xbe   : > { %2589 = vmatmul.mubr.msk.bf16.gmra.mrb[72].mxu0 %vm1168_vm0, %v3904_v7 }
  0xbf   : > { %2592 = vmatprep.mubr.msk.bf16.mxu0 %vm1168_vm0, %v3905_v38 }
  0xc6   : > { %2593 = vmatmul.mubr.msk.bf16.gmra.mrb[76].mxu0 %vm1168_vm0, %v3906_v43 }
  0xc7   : > { %2596 = vmatprep.mubr.msk.bf16.mxu0 %vm1168_vm0, %v3909_v39 }
  0xce   : > { %2597 = vmatmul.mubr.msk.bf16.gmra.mrb[80].mxu0 %vm1168_vm0, %v3912_v40 }
  0xcf   : > { %2600 = vmatprep.mubr.msk.bf16.mxu0 %vm1168_vm0, %v3914_v44 }
  0xd6   : > { %2601 = vmatmul.mubr.msk.bf16.gmra.mrb[84].mxu0 %vm1168_vm0, %v3917_v34 }
  0xd7   : > { %2604 = vmatprep.mubr.msk.bf16.mxu0 %vm1168_vm0, %v3920_v51 }
  0xde   : > { %2605 = vmatmul.mubr.msk.bf16.gmra.mrb[88].mxu0 %vm1168_vm0, %v3923_v20 }
  0xdf   : > { %2608 = vmatprep.mubr.msk.bf16.mxu0 %vm1168_vm0, %v2231_v4 }
  0xe6   : > { %2609 = vmatmul.mubr.msk.bf16.gmra.mrb[92].mxu0 %vm1168_vm0, %v2236_v33 }
 0x101   : > { %v2326_v47 = vpop.f32.mrb[0].mxu0 }
 0x102   : > { %v2327_v24 = vpop.f32.mrb[1].mxu0 }
 0x103   : > { %v2328_v49 = vadd.f32 %v2327_v24, %v2326_v47  ;;  %v2329_v29 = vpop.f32.mrb[2].mxu0  ;;  %v2438_v25 = vpop.f32.mrb[0].mxu1 }
 0x104   : > { %v2330_v30 = vpop.f32.mrb[3].mxu0  ;;  %v2439_v61 = vpop.f32.mrb[1].mxu1 }
 0x105   : > { %v1252_v55 = vadd.f32 %v2328_v49, %v3527_v48  ;;  %v2331_v56 = vadd.f32 %v2330_v30, %v2329_v29  ;;  %v2440_v45 = vadd.f32 %v2439_v61, %v2438_v25  ;;  %v2441_v26 = vpop.f32.mrb[2].mxu1 }
 0x106   : > { %v2442_v33 = vpop.f32.mrb[3].mxu1 }
 0x107   : > { %v1255_v4 = vadd.f32 %v2331_v56, %v3527_v48  ;;  %v2443_v62 = vadd.f32 %v2442_v33, %v2441_v26  ;;  %v3531_v9 = vadd.f32 %v2440_v45, %v1252_v55 }
 0x109   : > { %v2332_v10 = vpop.f32.mrb[4].mxu0  ;;  %v3533_v12 = vadd.f32 %v2443_v62, %v1255_v4 }
 0x10a   : > { %v2333_v11 = vpop.f32.mrb[5].mxu0 }
 0x10b   : > { %v2334_v13 = vadd.f32 %v2333_v11, %v2332_v10  ;;  %v2335_v17 = vpop.f32.mrb[6].mxu0  ;;  %v2444_v32 = vpop.f32.mrb[4].mxu1 }
 0x10c   : > { %v2336_v35 = vpop.f32.mrb[7].mxu0  ;;  %v2445_v16 = vpop.f32.mrb[5].mxu1 }
 0x10d   : > { %v1260_v57 = vadd.f32 %v2334_v13, %v3527_v48  ;;  %v2337_v58 = vadd.f32 %v2336_v35, %v2335_v17  ;;  %v2446_v63 = vadd.f32 %v2445_v16, %v2444_v32  ;;  %v2447_v5 = vpop.f32.mrb[6].mxu1 }
 0x10e   : > { %v2448_v6 = vpop.f32.mrb[7].mxu1 }
 0x10f   : > { %v1263_v52 = vadd.f32 %v2337_v58, %v3527_v48  ;;  %v2449_v36 = vadd.f32 %v2448_v6, %v2447_v5  ;;  %v3537_v37 = vadd.f32 %v2446_v63, %v1260_v57 }
 0x111   : > { %v2338_v27 = vpop.f32.mrb[8].mxu0  ;;  %v3539_v59 = vadd.f32 %v2449_v36, %v1263_v52 }
 0x112   : > { %v2339_v50 = vpop.f32.mrb[9].mxu0 }
 0x113   : > { %v2340_v8 = vadd.f32 %v2339_v50, %v2338_v27  ;;  %v2341_v42 = vpop.f32.mrb[10].mxu0  ;;  %v2450_v54 = vpop.f32.mrb[8].mxu1 }
 0x114   : > { %v2342_v28 = vpop.f32.mrb[11].mxu0  ;;  %v2451_v19 = vpop.f32.mrb[9].mxu1 }
 0x115   : > { %v1268_v15 = vadd.f32 %v2340_v8, %v3527_v48  ;;  %v2343_v18 = vadd.f32 %v2342_v28, %v2341_v42  ;;  %v2452_v1 = vadd.f32 %v2451_v19, %v2450_v54  ;;  %v2453_v7 = vpop.f32.mrb[10].mxu1 }
 0x116   : > { %v2454_v43 = vpop.f32.mrb[11].mxu1 }
 0x117   : > { %v1271_v38 = vadd.f32 %v2343_v18, %v3527_v48  ;;  %v2455_v31 = vadd.f32 %v2454_v43, %v2453_v7  ;;  %v3543_v0 = vadd.f32 %v2452_v1, %v1268_v15 }
 0x119   : > { %v2344_v39 = vpop.f32.mrb[12].mxu0  ;;  %v3545_v14 = vadd.f32 %v2455_v31, %v1271_v38 }
 0x11a   : > { %v2345_v2 = vpop.f32.mrb[13].mxu0 }
 0x11b   : > { %v2346_v40 = vadd.f32 %v2345_v2, %v2344_v39  ;;  %v2347_v46 = vpop.f32.mrb[14].mxu0  ;;  %v2456_v44 = vpop.f32.mrb[12].mxu1 }
 0x11c   : > { %v2348_v22 = vpop.f32.mrb[15].mxu0  ;;  %v2457_v34 = vpop.f32.mrb[13].mxu1 }
 0x11d   : > { %v1276_v41 = vadd.f32 %v2346_v40, %v3527_v48  ;;  %v2349_v21 = vadd.f32 %v2348_v22, %v2347_v46  ;;  %v2458_v53 = vadd.f32 %v2457_v34, %v2456_v44  ;;  %v2459_v60 = vpop.f32.mrb[14].mxu1 }
 0x11e   : > { %v2460_v23 = vpop.f32.mrb[15].mxu1 }
 0x11f   : > { %v1279_v51 = vadd.f32 %v2349_v21, %v3527_v48  ;;  %v2461_v3 = vadd.f32 %v2460_v23, %v2459_v60  ;;  %v3549_v20 = vadd.f32 %v2458_v53, %v1276_v41 }
 0x121   : > { %v2350_v47 = vpop.f32.mrb[16].mxu0  ;;  %v3551_v49 = vadd.f32 %v2461_v3, %v1279_v51 }
 0x122   : > { %v2351_v24 = vpop.f32.mrb[17].mxu0 }
 0x123   : > { %v2352_v29 = vadd.f32 %v2351_v24, %v2350_v47  ;;  %v2353_v25 = vpop.f32.mrb[18].mxu0  ;;  %v2462_v30 = vpop.f32.mrb[16].mxu1 }
 0x124   : > { %v2354_v55 = vpop.f32.mrb[19].mxu0  ;;  %v2463_v45 = vpop.f32.mrb[17].mxu1 }
 0x125   : > { %v1284_v56 = vadd.f32 %v2352_v29, %v3527_v48  ;;  %v2355_v61 = vadd.f32 %v2354_v55, %v2353_v25  ;;  %v2464_v26 = vadd.f32 %v2463_v45, %v2462_v30  ;;  %v2465_v4 = vpop.f32.mrb[18].mxu1 }
 0x126   : > { %v2466_v62 = vpop.f32.mrb[19].mxu1 }
 0x127   : > { %v1287_v33 = vadd.f32 %v2355_v61, %v3527_v48  ;;  %v2467_v10 = vadd.f32 %v2466_v62, %v2465_v4  ;;  %v3555_v11 = vadd.f32 %v2464_v26, %v1284_v56 }
 0x129   : > { %v2356_v13 = vpop.f32.mrb[20].mxu0  ;;  %v3557_v32 = vadd.f32 %v2467_v10, %v1287_v33 }
 0x12a   : > { %v2357_v17 = vpop.f32.mrb[21].mxu0 }
 0x12b   : > { %v2358_v35 = vadd.f32 %v2357_v17, %v2356_v13  ;;  %v2359_v57 = vpop.f32.mrb[22].mxu0  ;;  %v2468_v58 = vpop.f32.mrb[20].mxu1 }
 0x12c   : > { %v2360_v16 = vpop.f32.mrb[23].mxu0  ;;  %v2469_v52 = vpop.f32.mrb[21].mxu1 }
 0x12d   : > { %v1292_v63 = vadd.f32 %v2358_v35, %v3527_v48  ;;  %v2361_v5 = vadd.f32 %v2360_v16, %v2359_v57  ;;  %v2470_v6 = vadd.f32 %v2469_v52, %v2468_v58  ;;  %v2471_v36 = vpop.f32.mrb[22].mxu1 }
 0x12e   : > { %v2472_v50 = vpop.f32.mrb[23].mxu1 }
 0x12f   : > { %v1295_v27 = vadd.f32 %v2361_v5, %v3527_v48  ;;  %v2473_v8 = vadd.f32 %v2472_v50, %v2471_v36  ;;  %v3561_v42 = vadd.f32 %v2470_v6, %v1292_v63 }
 0x131   : > { %v2362_v54 = vpop.f32.mrb[24].mxu0  ;;  %v3563_v15 = vadd.f32 %v2473_v8, %v1295_v27 }
 0x132   : > { %v2363_v28 = vpop.f32.mrb[25].mxu0 }
 0x133   : > { %v2364_v18 = vadd.f32 %v2363_v28, %v2362_v54  ;;  %v2365_v19 = vpop.f32.mrb[26].mxu0  ;;  %v2474_v1 = vpop.f32.mrb[24].mxu1 }
 0x134   : > { %v2366_v7 = vpop.f32.mrb[27].mxu0  ;;  %v2475_v31 = vpop.f32.mrb[25].mxu1 }
 0x135   : > { %v1300_v38 = vadd.f32 %v2364_v18, %v3527_v48  ;;  %v2367_v43 = vadd.f32 %v2366_v7, %v2365_v19  ;;  %v2476_v39 = vadd.f32 %v2475_v31, %v2474_v1  ;;  %v2477_v2 = vpop.f32.mrb[26].mxu1 }
 0x136   : > { %v2478_v46 = vpop.f32.mrb[27].mxu1 }
 0x137   : > { %v1303_v40 = vadd.f32 %v2367_v43, %v3527_v48  ;;  %v2479_v44 = vadd.f32 %v2478_v46, %v2477_v2  ;;  %v3567_v22 = vadd.f32 %v2476_v39, %v1300_v38 }
 0x139   : > { %v2368_v41 = vpop.f32.mrb[28].mxu0  ;;  %v3569_v34 = vadd.f32 %v2479_v44, %v1303_v40 }
 0x13a   : > { %v2369_v21 = vpop.f32.mrb[29].mxu0 }
 0x13b   : > { %v2370_v53 = vadd.f32 %v2369_v21, %v2368_v41  ;;  %v2371_v60 = vpop.f32.mrb[30].mxu0  ;;  %v2480_v51 = vpop.f32.mrb[28].mxu1 }
 0x13c   : > { %v2372_v23 = vpop.f32.mrb[31].mxu0  ;;  %v2481_v24 = vpop.f32.mrb[29].mxu1 }
 0x13d   : > { %v1308_v3 = vadd.f32 %v2370_v53, %v3527_v48  ;;  %v2373_v47 = vadd.f32 %v2372_v23, %v2371_v60  ;;  %v2482_v29 = vadd.f32 %v2481_v24, %v2480_v51  ;;  %v2483_v25 = vpop.f32.mrb[30].mxu1 }
 0x13e   : > { %v2484_v55 = vpop.f32.mrb[31].mxu1 }
 0x13f   : > { %v1311_v30 = vadd.f32 %v2373_v47, %v3527_v48  ;;  %v2485_v56 = vadd.f32 %v2484_v55, %v2483_v25  ;;  %v3573_v61 = vadd.f32 %v2482_v29, %v1308_v3 }
 0x141   : > { %v2374_v45 = vpop.f32.mrb[32].mxu0  ;;  %v3575_v4 = vadd.f32 %v2485_v56, %v1311_v30 }
 0x142   : > { %v2375_v26 = vpop.f32.mrb[33].mxu0 }
 0x143   : > { %v2376_v33 = vadd.f32 %v2375_v26, %v2374_v45  ;;  %v2377_v62 = vpop.f32.mrb[34].mxu0  ;;  %v2486_v10 = vpop.f32.mrb[32].mxu1 }
 0x144   : > { %v2378_v13 = vpop.f32.mrb[35].mxu0  ;;  %v2487_v57 = vpop.f32.mrb[33].mxu1 }
 0x145   : > { %v1316_v17 = vadd.f32 %v2376_v33, %v3527_v48  ;;  %v2379_v35 = vadd.f32 %v2378_v13, %v2377_v62  ;;  %v2488_v58 = vadd.f32 %v2487_v57, %v2486_v10  ;;  %v2489_v16 = vpop.f32.mrb[34].mxu1 }
 0x146   : > { %v2490_v5 = vpop.f32.mrb[35].mxu1 }
 0x147   : > { %v1319_v63 = vadd.f32 %v2379_v35, %v3527_v48  ;;  %v2491_v52 = vadd.f32 %v2490_v5, %v2489_v16  ;;  %v3579_v6 = vadd.f32 %v2488_v58, %v1316_v17 }
 0x149   : > { %v2380_v36 = vpop.f32.mrb[36].mxu0  ;;  %v3581_v50 = vadd.f32 %v2491_v52, %v1319_v63 }
 0x14a   : > { %v2381_v27 = vpop.f32.mrb[37].mxu0 }
 0x14b   : > { %v2382_v8 = vadd.f32 %v2381_v27, %v2380_v36  ;;  %v2383_v54 = vpop.f32.mrb[38].mxu0  ;;  %v2492_v28 = vpop.f32.mrb[36].mxu1 }
 0x14c   : > { %v2384_v18 = vpop.f32.mrb[39].mxu0  ;;  %v2493_v7 = vpop.f32.mrb[37].mxu1 }
 0x14d   : > { %v1324_v19 = vadd.f32 %v2382_v8, %v3527_v48  ;;  %v2385_v1 = vadd.f32 %v2384_v18, %v2383_v54  ;;  %v2494_v38 = vadd.f32 %v2493_v7, %v2492_v28  ;;  %v2495_v43 = vpop.f32.mrb[38].mxu1 }
 0x14e   : > { %v2496_v39 = vpop.f32.mrb[39].mxu1 }
 0x14f   : > { %v1327_v31 = vadd.f32 %v2385_v1, %v3527_v48  ;;  %v2497_v2 = vadd.f32 %v2496_v39, %v2495_v43  ;;  %v3585_v40 = vadd.f32 %v2494_v38, %v1324_v19 }
 0x151   : > { %v2386_v46 = vpop.f32.mrb[40].mxu0  ;;  %v3587_v41 = vadd.f32 %v2497_v2, %v1327_v31 }
 0x152   : > { %v2387_v44 = vpop.f32.mrb[41].mxu0 }
 0x153   : > { %v2388_v21 = vadd.f32 %v2387_v44, %v2386_v46  ;;  %v2389_v53 = vpop.f32.mrb[42].mxu0  ;;  %v2498_v60 = vpop.f32.mrb[40].mxu1 }
 0x154   : > { %v2390_v51 = vpop.f32.mrb[43].mxu0  ;;  %v2499_v47 = vpop.f32.mrb[41].mxu1 }
 0x155   : > { %v1332_v23 = vadd.f32 %v2388_v21, %v3527_v48  ;;  %v2391_v3 = vadd.f32 %v2390_v51, %v2389_v53  ;;  %v2500_v24 = vadd.f32 %v2499_v47, %v2498_v60  ;;  %v2501_v29 = vpop.f32.mrb[42].mxu1 }
 0x156   : > { %v2502_v30 = vpop.f32.mrb[43].mxu1 }
 0x157   : > { %v1335_v25 = vadd.f32 %v2391_v3, %v3527_v48  ;;  %v2503_v55 = vadd.f32 %v2502_v30, %v2501_v29  ;;  %v3591_v56 = vadd.f32 %v2500_v24, %v1332_v23 }
 0x159   : > { %v2392_v45 = vpop.f32.mrb[44].mxu0  ;;  %v3593_v33 = vadd.f32 %v2503_v55, %v1335_v25 }
 0x15a   : > { %v2393_v26 = vpop.f32.mrb[45].mxu0 }
 0x15b   : > { %v2394_v62 = vadd.f32 %v2393_v26, %v2392_v45  ;;  %v2395_v10 = vpop.f32.mrb[46].mxu0  ;;  %v2504_v13 = vpop.f32.mrb[44].mxu1 }
 0x15c   : > { %v2396_v17 = vpop.f32.mrb[47].mxu0  ;;  %v2505_v58 = vpop.f32.mrb[45].mxu1 }
 0x15d   : > { %v1340_v35 = vadd.f32 %v2394_v62, %v3527_v48  ;;  %v2397_v57 = vadd.f32 %v2396_v17, %v2395_v10  ;;  %v2506_v16 = vadd.f32 %v2505_v58, %v2504_v13  ;;  %v2507_v63 = vpop.f32.mrb[46].mxu1 }
 0x15e   : > { %v2508_v52 = vpop.f32.mrb[47].mxu1 }
 0x15f   : > { %v1343_v5 = vadd.f32 %v2397_v57, %v3527_v48  ;;  %v2509_v36 = vadd.f32 %v2508_v52, %v2507_v63  ;;  %v3597_v27 = vadd.f32 %v2506_v16, %v1340_v35 }
 0x161   : > { %v2398_v8 = vpop.f32.mrb[48].mxu0  ;;  %v3599_v28 = vadd.f32 %v2509_v36, %v1343_v5 }
 0x162   : > { %v2399_v54 = vpop.f32.mrb[49].mxu0 }
 0x163   : > { %v2400_v18 = vadd.f32 %v2399_v54, %v2398_v8  ;;  %v2401_v19 = vpop.f32.mrb[50].mxu0  ;;  %v2510_v1 = vpop.f32.mrb[48].mxu1 }
 0x164   : > { %v2402_v7 = vpop.f32.mrb[51].mxu0  ;;  %v2511_v31 = vpop.f32.mrb[49].mxu1 }
 0x165   : > { %v1348_v38 = vadd.f32 %v2400_v18, %v3527_v48  ;;  %v2403_v43 = vadd.f32 %v2402_v7, %v2401_v19  ;;  %v2512_v39 = vadd.f32 %v2511_v31, %v2510_v1  ;;  %v2513_v2 = vpop.f32.mrb[50].mxu1 }
 0x166   : > { %v2514_v44 = vpop.f32.mrb[51].mxu1 }
 0x167   : > { %v1351_v46 = vadd.f32 %v2403_v43, %v3527_v48  ;;  %v2515_v21 = vadd.f32 %v2514_v44, %v2513_v2  ;;  %v3603_v53 = vadd.f32 %v2512_v39, %v1348_v38 }
 0x169   : > { %v2404_v60 = vpop.f32.mrb[52].mxu0  ;;  %v3605_v23 = vadd.f32 %v2515_v21, %v1351_v46 }
 0x16a   : > { %v2405_v51 = vpop.f32.mrb[53].mxu0 }
 0x16b   : > { %v2406_v3 = vadd.f32 %v2405_v51, %v2404_v60  ;;  %v2407_v47 = vpop.f32.mrb[54].mxu0  ;;  %v2516_v24 = vpop.f32.mrb[52].mxu1 }
 0x16c   : > { %v2408_v29 = vpop.f32.mrb[55].mxu0  ;;  %v2517_v55 = vpop.f32.mrb[53].mxu1 }
 0x16d   : > { %v1356_v25 = vadd.f32 %v2406_v3, %v3527_v48  ;;  %v2409_v30 = vadd.f32 %v2408_v29, %v2407_v47  ;;  %v2518_v45 = vadd.f32 %v2517_v55, %v2516_v24  ;;  %v2519_v26 = vpop.f32.mrb[54].mxu1 }
 0x16e   : > { %v2520_v10 = vpop.f32.mrb[55].mxu1 }
 0x16f   : > { %v1359_v62 = vadd.f32 %v2409_v30, %v3527_v48  ;;  %v2521_v13 = vadd.f32 %v2520_v10, %v2519_v26  ;;  %v3609_v17 = vadd.f32 %v2518_v45, %v1356_v25 }
 0x171   : > { %v2410_v35 = vpop.f32.mrb[56].mxu0  ;;  %v3611_v58 = vadd.f32 %v2521_v13, %v1359_v62 }
 0x172   : > { %v2411_v57 = vpop.f32.mrb[57].mxu0 }
 0x173   : > { %v2412_v16 = vadd.f32 %v2411_v57, %v2410_v35  ;;  %v2413_v63 = vpop.f32.mrb[58].mxu0  ;;  %v2522_v5 = vpop.f32.mrb[56].mxu1 }
 0x174   : > { %v2414_v52 = vpop.f32.mrb[59].mxu0  ;;  %v2523_v54 = vpop.f32.mrb[57].mxu1 }
 0x175   : > { %v1364_v36 = vadd.f32 %v2412_v16, %v3527_v48  ;;  %v2415_v8 = vadd.f32 %v2414_v52, %v2413_v63  ;;  %v2524_v18 = vadd.f32 %v2523_v54, %v2522_v5  ;;  %v2525_v19 = vpop.f32.mrb[58].mxu1 }
 0x176   : > { %v2526_v7 = vpop.f32.mrb[59].mxu1 }
 0x177   : > { %v1367_v1 = vadd.f32 %v2415_v8, %v3527_v48  ;;  %v2527_v38 = vadd.f32 %v2526_v7, %v2525_v19  ;;  %v3615_v43 = vadd.f32 %v2524_v18, %v1364_v36 }
 0x179   : > { %v2416_v31 = vpop.f32.mrb[60].mxu0  ;;  %v3617_v2 = vadd.f32 %v2527_v38, %v1367_v1 }
 0x17a   : > { %v2417_v39 = vpop.f32.mrb[61].mxu0 }
 0x17b   : > { %v2418_v46 = vadd.f32 %v2417_v39, %v2416_v31  ;;  %v2419_v44 = vpop.f32.mrb[62].mxu0  ;;  %v2528_v21 = vpop.f32.mrb[60].mxu1 }
 0x17c   : > { %v2420_v60 = vpop.f32.mrb[63].mxu0  ;;  %v2529_v47 = vpop.f32.mrb[61].mxu1 }
 0x17d   : > { %v1372_v51 = vadd.f32 %v2418_v46, %v3527_v48  ;;  %v2421_v3 = vadd.f32 %v2420_v60, %v2419_v44  ;;  %v2530_v24 = vadd.f32 %v2529_v47, %v2528_v21  ;;  %v2531_v29 = vpop.f32.mrb[62].mxu1 }
 0x17e   : > { %v2532_v30 = vpop.f32.mrb[63].mxu1 }
 0x17f   : > { %v1375_v25 = vadd.f32 %v2421_v3, %v3527_v48  ;;  %v2533_v55 = vadd.f32 %v2532_v30, %v2531_v29  ;;  %v3621_v45 = vadd.f32 %v2530_v24, %v1372_v51 }
 0x181   : > { %v2582_v26 = vpop.f32.mrb[64].mxu0  ;;  %v3624_v13 = vadd.f32 %v2533_v55, %v1375_v25 }
 0x182   : > { %v1582_v62 = vadd.f32 %v2582_v26, %v3537_v37  ;;  %v1573_v10 = vpop.f32.mrb[65].mxu0 }
 0x183   : > { %v1574_v35 = vadd.f32 %v1573_v10, %v3531_v9  ;;  %v2583_v57 = vpop.f32.mrb[66].mxu0 }
 0x184   : > { %v1585_v16 = vadd.f32 %v2583_v57, %v3539_v59  ;;  %v1576_v63 = vpop.f32.mrb[67].mxu0  ;;  %v1702_v52 = vmax.f32 %v1582_v62, 0.0 }
 0x185   : > { %v1577_v5 = vadd.f32 %v1576_v63, %v3533_v12  ;;  %v1700_v36 = vmax.f32 %v1574_v35, 0.0 }
 0x186   : > { %v1703_v48 = vmax.f32 %v1585_v16, 0.0 }
 0x187   : > { %v1701_v8 = vmax.f32 %v1577_v5, 0.0 }
 0x188   : > { %v1733_v54 = vpack.c.bf16 %v1703_v48, %v1702_v52 }
 0x189   : > { %v1732_v18 = vpack.c.bf16 %v1701_v8, %v1700_v36  ;;  %v2586_v19 = vpop.f32.mrb[68].mxu0 }
 0x18a   : > { %v1598_v37 = vadd.f32 %v2586_v19, %v3549_v20  ;;  %v1589_v1 = vpop.f32.mrb[69].mxu0 }
 0x18b   : > { %v1590_v7 = vadd.f32 %v1589_v1, %v3543_v0  ;;  %v2587_v9 = vpop.f32.mrb[70].mxu0  ;;  %2616 = vmatprep.mubr.msk.bf16.mxu1 %vm1771_vm1, %v1732_v18 }
 0x18c   : > { %v1601_v59 = vadd.f32 %v2587_v9, %v3551_v49  ;;  %v1592_v38 = vpop.f32.mrb[71].mxu0  ;;  %2617 = vmatmul.mubr.msk.bf16.vlgmr.msra.gmra.mrb[64].mxu1 %vm1771_vm1, %v1733_v54  ;;  %v1706_v31 = vmax.f32 %v1598_v37, 0.0 }
 0x18d   : > { %v1593_v12 = vadd.f32 %v1592_v38, %v3545_v14  ;;  %v1704_v46 = vmax.f32 %v1590_v7, 0.0 }
 0x18e   : > { %v1707_v39 = vmax.f32 %v1601_v59, 0.0 }
 0x18f   : > { %v1705_v44 = vmax.f32 %v1593_v12, 0.0 }
 0x190   : > { %v1735_v21 = vpack.c.bf16 %v1707_v39, %v1706_v31 }
 0x191   : > { %v1734_v60 = vpack.c.bf16 %v1705_v44, %v1704_v46  ;;  %v2590_v20 = vpop.f32.mrb[72].mxu0 }
 0x192   : > { %v1614_v51 = vadd.f32 %v2590_v20, %v3561_v42  ;;  %v1605_v0 = vpop.f32.mrb[73].mxu0 }
 0x193   : > { %v1606_v3 = vadd.f32 %v1605_v0, %v3555_v11  ;;  %v2591_v47 = vpop.f32.mrb[74].mxu0  ;;  %2620 = vmatprep.mubr.msk.bf16.mxu1 %vm1771_vm1, %v1734_v60 }
 0x194   : > { %v1617_v49 = vadd.f32 %v2591_v47, %v3563_v15  ;;  %v1608_v24 = vpop.f32.mrb[75].mxu0  ;;  %2621 = vmatmul.mubr.msk.bf16.gmra.mrb[68].mxu1 %vm1771_vm1, %v1735_v21  ;;  %v1710_v29 = vmax.f32 %v1614_v51, 0.0 }
 0x195   : > { %v1609_v14 = vadd.f32 %v1608_v24, %v3557_v32  ;;  %v1708_v30 = vmax.f32 %v1606_v3, 0.0 }
 0x196   : > { %v1711_v25 = vmax.f32 %v1617_v49, 0.0 }
 0x197   : > { %v1709_v55 = vmax.f32 %v1609_v14, 0.0 }
 0x198   : > { %v1737_v26 = vpack.c.bf16 %v1711_v25, %v1710_v29 }
 0x199   : > { %v1736_v62 = vpack.c.bf16 %v1709_v55, %v1708_v30  ;;  %v2594_v42 = vpop.f32.mrb[76].mxu0 }
 0x19a   : > { %v1630_v10 = vadd.f32 %v2594_v42, %v3573_v61  ;;  %v1621_v11 = vpop.f32.mrb[77].mxu0 }
 0x19b   : > { %v1622_v35 = vadd.f32 %v1621_v11, %v3567_v22  ;;  %v2595_v57 = vpop.f32.mrb[78].mxu0  ;;  %2624 = vmatprep.mubr.msk.bf16.mxu1 %vm1771_vm1, %v1736_v62 }
 0x19c   : > { %v1633_v15 = vadd.f32 %v2595_v57, %v3575_v4  ;;  %v1624_v16 = vpop.f32.mrb[79].mxu0  ;;  %2625 = vmatmul.mubr.msk.bf16.gmra.mrb[72].mxu1 %vm1771_vm1, %v1737_v26  ;;  %v1714_v63 = vmax.f32 %v1630_v10, 0.0 }
 0x19d   : > { %v1625_v32 = vadd.f32 %v1624_v16, %v3569_v34  ;;  %v1712_v52 = vmax.f32 %v1622_v35, 0.0 }
 0x19e   : > { %v1715_v5 = vmax.f32 %v1633_v15, 0.0 }
 0x19f   : > { %v1713_v48 = vmax.f32 %v1625_v32, 0.0 }
 0x1a0   : > { %v1739_v36 = vpack.c.bf16 %v1715_v5, %v1714_v63 }
 0x1a1   : > { %v1738_v8 = vpack.c.bf16 %v1713_v48, %v1712_v52  ;;  %v2598_v61 = vpop.f32.mrb[80].mxu0  ;;  %v1981_v48 = vld [vmem:[%s3677_s18] sm:$0xff] }
 0x1a2   : > { %v1646_v54 = vadd.f32 %v2598_v61, %v3585_v40  ;;  %v1637_v22 = vpop.f32.mrb[81].mxu0  ;;  %v1984_v61 = vld [vmem:[%s3677_s18 + $0x18] sm:$0xff] }
 0x1a3   : > { %v1638_v18 = vadd.f32 %v1637_v22, %v3579_v6  ;;  %v2599_v19 = vpop.f32.mrb[82].mxu0  ;;  %2628 = vmatprep.mubr.msk.bf16.mxu1 %vm1771_vm1, %v1738_v8 }
 0x1a4   : > { %v1649_v4 = vadd.f32 %v2599_v19, %v3587_v41  ;;  %v1640_v37 = vpop.f32.mrb[83].mxu0  ;;  %2629 = vmatmul.mubr.msk.bf16.gmra.mrb[76].mxu1 %vm1771_vm1, %v1739_v36  ;;  %v1718_v1 = vmax.f32 %v1646_v54, 0.0  ;;  %v1982_v19 = vld [vmem:[%s3677_s18 + $0x8] sm:$0xff] }
 0x1a5   : > { %v1641_v34 = vadd.f32 %v1640_v37, %v3581_v50  ;;  %v1716_v9 = vmax.f32 %v1638_v18, 0.0 }
 0x1a6   : > { %v1719_v7 = vmax.f32 %v1649_v4, 0.0 }
 0x1a7   : > { %v1717_v59 = vmax.f32 %v1641_v34, 0.0 }
 0x1a8   : > { %v1741_v38 = vpack.c.bf16 %v1719_v7, %v1718_v1 }
 0x1a9   : > { %v1740_v12 = vpack.c.bf16 %v1717_v59, %v1716_v9  ;;  %v2602_v40 = vpop.f32.mrb[84].mxu0  ;;  %v1987_v9 = vld [vmem:[%s3677_s18 + $0x30] sm:$0xff] }
 0x1aa   : > { %v1662_v31 = vadd.f32 %v2602_v40, %v3597_v27  ;;  %v1653_v6 = vpop.f32.mrb[85].mxu0 }
 0x1ab   : > { %v1654_v39 = vadd.f32 %v1653_v6, %v3591_v56  ;;  %v2603_v46 = vpop.f32.mrb[86].mxu0  ;;  %2632 = vmatprep.mubr.msk.bf16.mxu1 %vm1771_vm1, %v1740_v12  ;;  %v1985_v12 = vld [vmem:[%s3677_s18 + $0x20] sm:$0xff]  ;;  %v1988_v6 = vld [vmem:[%s3677_s18 + $0x38] sm:$0xff] }
 0x1ac   : > { %v1665_v41 = vadd.f32 %v2603_v46, %v3599_v28  ;;  %v1656_v44 = vpop.f32.mrb[87].mxu0  ;;  %2633 = vmatmul.mubr.msk.bf16.gmra.mrb[80].mxu1 %vm1771_vm1, %v1741_v38  ;;  %v1722_v21 = vmax.f32 %v1662_v31, 0.0 }
 0x1ad   : > { %v1657_v50 = vadd.f32 %v1656_v44, %v3593_v33  ;;  %v1720_v20 = vmax.f32 %v1654_v39, 0.0  ;;  %v1986_v44 = vld [vmem:[%s3677_s18 + $0x28] sm:$0xff] }
 0x1ae   : > { %v1723_v60 = vmax.f32 %v1665_v41, 0.0 }
 0x1af   : > { %v1721_v51 = vmax.f32 %v1657_v50, 0.0 }
 0x1b0   : > { %v1743_v0 = vpack.c.bf16 %v1723_v60, %v1722_v21 }
 0x1b1   : > { %v1742_v3 = vpack.c.bf16 %v1721_v51, %v1720_v20  ;;  %v2606_v27 = vpop.f32.mrb[88].mxu0 }
 0x1b2   : > { %v1678_v47 = vadd.f32 %v2606_v27, %v3609_v17  ;;  %v1669_v56 = vpop.f32.mrb[89].mxu0 }
 0x1b3   : > { %v1670_v49 = vadd.f32 %v1669_v56, %v3603_v53  ;;  %v2607_v24 = vpop.f32.mrb[90].mxu0  ;;  %2636 = vmatprep.mubr.msk.bf16.mxu1 %vm1771_vm1, %v1742_v3 }
 0x1b4   : > { %v1681_v28 = vadd.f32 %v2607_v24, %v3611_v58  ;;  %v1672_v14 = vpop.f32.mrb[91].mxu0  ;;  %2637 = vmatmul.mubr.msk.bf16.gmra.mrb[84].mxu1 %vm1771_vm1, %v1743_v0  ;;  %v1726_v29 = vmax.f32 %v1678_v47, 0.0  ;;  %v1991_v0 = vld [vmem:[%s3677_s18 + $0x50] sm:$0xff]  ;;  %v1989_v47 = vld [vmem:[%s3677_s18 + $0x40] sm:$0xff]  ;;  %v1992_v24 = vld [vmem:[%s3677_s18 + $0x58] sm:$0xff] }
 0x1b5   : > { %v1673_v33 = vadd.f32 %v1672_v14, %v3605_v23  ;;  %v1724_v30 = vmax.f32 %v1670_v49, 0.0 }
 0x1b6   : > { %v1727_v25 = vmax.f32 %v1681_v28, 0.0 }
 0x1b7   : > { %v1725_v55 = vmax.f32 %v1673_v33, 0.0 }
 0x1b8   : > { %v1745_v26 = vpack.c.bf16 %v1727_v25, %v1726_v29  ;;  %v1990_v29 = vld [vmem:[%s3677_s18 + $0x48] sm:$0xff] }
 0x1b9   : > { %v1744_v62 = vpack.c.bf16 %v1725_v55, %v1724_v30  ;;  %v2610_v17 = vpop.f32.mrb[92].mxu0 }
 0x1ba   : > { %v1694_v42 = vadd.f32 %v2610_v17, %v3621_v45  ;;  %v1685_v53 = vpop.f32.mrb[93].mxu0  ;;  %v1995_v17 = vld [vmem:[%s3677_s18 + $0x70] sm:$0xff] }
 0x1bb   : > { %v1686_v10 = vadd.f32 %v1685_v53, %v3615_v43  ;;  %v2611_v11 = vpop.f32.mrb[94].mxu0  ;;  %2640 = vmatprep.mubr.msk.bf16.mxu1 %vm1771_vm1, %v1744_v62  ;;  %v3682_v43 = vld [vmem:[%s3824_s4] ss:$0 sm:$0xff] }
 0x1bc   : > { %v1697_v58 = vadd.f32 %v2611_v11, %v3624_v13  ;;  %v1688_v35 = vpop.f32.mrb[95].mxu0  ;;  %2641 = vmatmul.mubr.msk.bf16.gmra.mrb[88].mxu1 %vm1771_vm1, %v1745_v26  ;;  %v1730_v57 = vmax.f32 %v1694_v42, 0.0  ;;  %v1983_v13 = vld [vmem:[%s3677_s18 + $0x10] sm:$0xff] }
 0x1bd   : > { %v1689_v23 = vadd.f32 %v1688_v35, %v3617_v2  ;;  %v1728_v16 = vmax.f32 %v1686_v10, 0.0  ;;  %v1993_v10 = vld [vmem:[%s3677_s18 + $0x60] sm:$0xff]  ;;  %v1996_v35 = vld [vmem:[%s3677_s18 + $0x78] sm:$0xff] }
 0x1be   : > { %v1731_v15 = vmax.f32 %v1697_v58, 0.0 }
 0x1bf   : > { %v1729_v32 = vmax.f32 %v1689_v23, 0.0 }
 0x1c0   : > { %v1747_v63 = vpack.c.bf16 %v1731_v15, %v1730_v57 }
 0x1c1   : > { %v1746_v45 = vpack.c.bf16 %v1729_v32, %v1728_v16  ;;  %v1994_v16 = vld [vmem:[%s3677_s18 + $0x68] sm:$0xff] }
 0x1c3   : > { %2644 = vmatprep.mubr.msk.bf16.mxu1 %vm1771_vm1, %v1746_v45 }
 0x1c4   : > { %2645 = vmatmul.mubr.msk.bf16.gmra.mrb[92].mxu1 %vm1771_vm1, %v1747_v63 }
 0x25f   : > { %v2618_v2 = vpop.f32.mrb[64].mxu1 }
 0x260   : > { %v1863_v5 = vadd.f32 %v2618_v2, %v3682_v43  ;;  %v1854_v52 = vpop.f32.mrb[65].mxu1 }
 0x261   : > { %v1855_v36 = vadd.f32 %v3682_v43, %v1854_v52  ;;  %v2619_v8 = vpop.f32.mrb[66].mxu1 }
 0x262   : > { %v2015_v54 = vadd.f32 %v1983_v13, %v1863_v5  ;;  %v1866_v22 = vadd.f32 %v2619_v8, %v3682_v43  ;;  %v1857_v18 = vpop.f32.mrb[67].mxu1  ;;  %v1999_v5 = vld [vmem:[%s3677_s18 + $0x90] sm:$0xff] }
 0x263   : > { %v2013_v4 = vadd.f32 %v1981_v48, %v1855_v36  ;;  %v1858_v37 = vadd.f32 %v3682_v43, %v1857_v18  ;;  %v1997_v36 = vld [vmem:[%s3677_s18 + $0x80] sm:$0xff] }
 0x264   : > { %2047 = vst.msk [vmem:[%s3690_s24 + $0x10] sm:$0xff] %vm1168_vm0, %v2015_v54  ;;  %v2016_v34 = vadd.f32 %v1984_v61, %v1866_v22  ;;  %v2000_v54 = vld [vmem:[%s3677_s18 + $0x98] sm:$0xff] }
 0x265   : > { %2045 = vst.msk [vmem:[%s3690_s24] sm:$0xff] %vm1168_vm0, %v2013_v4  ;;  %v2014_v1 = vadd.f32 %v1982_v19, %v1858_v37  ;;  %v1998_v4 = vld [vmem:[%s3677_s18 + $0x88] sm:$0xff] }
 0x266   : > { %2048 = vst.msk [vmem:[%s3690_s24 + $0x18] sm:$0xff] %vm1168_vm0, %v2016_v34 }
 0x267   : > { %2046 = vst.msk [vmem:[%s3690_s24 + $0x8] sm:$0xff] %vm1168_vm0, %v2014_v1  ;;  %v2622_v7 = vpop.f32.mrb[68].mxu1 }
 0x268   : > { %v1879_v59 = vadd.f32 %v2622_v7, %v3682_v43  ;;  %v1870_v38 = vpop.f32.mrb[69].mxu1 }
 0x269   : > { %v1871_v40 = vadd.f32 %v3682_v43, %v1870_v38  ;;  %v2623_v31 = vpop.f32.mrb[70].mxu1 }
 0x26a   : > { %v2019_v39 = vadd.f32 %v1987_v9, %v1879_v59  ;;  %v1882_v46 = vadd.f32 %v2623_v31, %v3682_v43  ;;  %v1873_v41 = vpop.f32.mrb[71].mxu1  ;;  %v2003_v59 = vld [vmem:[%s3677_s18 + $0xb0] sm:$0xff] }
 0x26b   : > { %v2017_v50 = vadd.f32 %v1985_v12, %v1871_v40  ;;  %v1874_v21 = vadd.f32 %v3682_v43, %v1873_v41  ;;  %v2001_v40 = vld [vmem:[%s3677_s18 + $0xa0] sm:$0xff] }
 0x26c   : > { %2051 = vst.msk [vmem:[%s3690_s24 + $0x30] sm:$0xff] %vm1168_vm0, %v2019_v39  ;;  %v2020_v60 = vadd.f32 %v1988_v6, %v1882_v46  ;;  %v2004_v39 = vld [vmem:[%s3677_s18 + $0xb8] sm:$0xff] }
 0x26d   : > { %2049 = vst.msk [vmem:[%s3690_s24 + $0x20] sm:$0xff] %vm1168_vm0, %v2017_v50  ;;  %v2018_v20 = vadd.f32 %v1986_v44, %v1874_v21  ;;  %v2002_v50 = vld [vmem:[%s3677_s18 + $0xa8] sm:$0xff] }
 0x26e   : > { %2052 = vst.msk [vmem:[%s3690_s24 + $0x38] sm:$0xff] %vm1168_vm0, %v2020_v60 }
 0x26f   : > { %2050 = vst.msk [vmem:[%s3690_s24 + $0x28] sm:$0xff] %vm1168_vm0, %v2018_v20  ;;  %v2626_v51 = vpop.f32.mrb[72].mxu1 }
 0x270   : > { %v1895_v3 = vadd.f32 %v2626_v51, %v3682_v43  ;;  %v1886_v27 = vpop.f32.mrb[73].mxu1 }
 0x271   : > { %v1887_v56 = vadd.f32 %v3682_v43, %v1886_v27  ;;  %v2627_v49 = vpop.f32.mrb[74].mxu1 }
 0x272   : > { %v2023_v28 = vadd.f32 %v1991_v0, %v1895_v3  ;;  %v1898_v14 = vadd.f32 %v2627_v49, %v3682_v43  ;;  %v1889_v33 = vpop.f32.mrb[75].mxu1  ;;  %v2007_v3 = vld [vmem:[%s3677_s18 + $0xd0] sm:$0xff] }
 0x273   : > { %v2021_v25 = vadd.f32 %v1989_v47, %v1887_v56  ;;  %v1890_v30 = vadd.f32 %v3682_v43, %v1889_v33  ;;  %v2005_v56 = vld [vmem:[%s3677_s18 + $0xc0] sm:$0xff] }
 0x274   : > { %2055 = vst.msk [vmem:[%s3690_s24 + $0x50] sm:$0xff] %vm1168_vm0, %v2023_v28  ;;  %v2024_v55 = vadd.f32 %v1992_v24, %v1898_v14  ;;  %v2008_v28 = vld [vmem:[%s3677_s18 + $0xd8] sm:$0xff] }
 0x275   : > { %2053 = vst.msk [vmem:[%s3690_s24 + $0x40] sm:$0xff] %vm1168_vm0, %v2021_v25  ;;  %v2022_v26 = vadd.f32 %v1990_v29, %v1890_v30  ;;  %v2006_v25 = vld [vmem:[%s3677_s18 + $0xc8] sm:$0xff] }
 0x276   : > { %2056 = vst.msk [vmem:[%s3690_s24 + $0x58] sm:$0xff] %vm1168_vm0, %v2024_v55 }
 0x277   : > { %2054 = vst.msk [vmem:[%s3690_s24 + $0x48] sm:$0xff] %vm1168_vm0, %v2022_v26  ;;  %v2630_v62 = vpop.f32.mrb[76].mxu1 }
 0x278   : > { %v1911_v42 = vadd.f32 %v2630_v62, %v3682_v43  ;;  %v1902_v53 = vpop.f32.mrb[77].mxu1 }
 0x279   : > { %v1903_v11 = vadd.f32 %v3682_v43, %v1902_v53  ;;  %v2631_v58 = vpop.f32.mrb[78].mxu1 }
 0x27a   : > { %v2027_v23 = vadd.f32 %v1995_v17, %v1911_v42  ;;  %v1914_v57 = vadd.f32 %v2631_v58, %v3682_v43  ;;  %v1905_v15 = vpop.f32.mrb[79].mxu1  ;;  %v2011_v42 = vld [vmem:[%s3677_s18 + $0xf0] sm:$0xff] }
 0x27b   : > { %v2025_v32 = vadd.f32 %v1993_v10, %v1903_v11  ;;  %v1906_v63 = vadd.f32 %v3682_v43, %v1905_v15  ;;  %v2009_v11 = vld [vmem:[%s3677_s18 + $0xe0] sm:$0xff] }
 0x27c   : > { %2059 = vst.msk [vmem:[%s3690_s24 + $0x70] sm:$0xff] %vm1168_vm0, %v2027_v23  ;;  %v2028_v45 = vadd.f32 %v1996_v35, %v1914_v57  ;;  %v2012_v23 = vld [vmem:[%s3677_s18 + $0xf8] sm:$0xff] }
 0x27d   : > { %2057 = vst.msk [vmem:[%s3690_s24 + $0x60] sm:$0xff] %vm1168_vm0, %v2025_v32  ;;  %v2026_v2 = vadd.f32 %v1994_v16, %v1906_v63  ;;  %v2010_v32 = vld [vmem:[%s3677_s18 + $0xe8] sm:$0xff] }
 0x27e   : > { %2060 = vst.msk [vmem:[%s3690_s24 + $0x78] sm:$0xff] %vm1168_vm0, %v2028_v45 }
 0x27f   : > { %2058 = vst.msk [vmem:[%s3690_s24 + $0x68] sm:$0xff] %vm1168_vm0, %v2026_v2  ;;  %v2634_v13 = vpop.f32.mrb[80].mxu1 }
 0x280   : > { %v1927_v52 = vadd.f32 %v2634_v13, %v3682_v43  ;;  %v1918_v48 = vpop.f32.mrb[81].mxu1 }
 0x281   : > { %v1919_v8 = vadd.f32 %v3682_v43, %v1918_v48  ;;  %v2635_v61 = vpop.f32.mrb[82].mxu1 }
 0x282   : > { %v2031_v22 = vadd.f32 %v1999_v5, %v1927_v52  ;;  %v1930_v18 = vadd.f32 %v2635_v61, %v3682_v43  ;;  %v1921_v19 = vpop.f32.mrb[83].mxu1 }
 0x283   : > { %v2029_v37 = vadd.f32 %v1997_v36, %v1919_v8  ;;  %v1922_v34 = vadd.f32 %v3682_v43, %v1921_v19 }
 0x284   : > { %2063 = vst.msk [vmem:[%s3690_s24 + $0x90] sm:$0xff] %vm1168_vm0, %v2031_v22  ;;  %v2032_v1 = vadd.f32 %v2000_v54, %v1930_v18 }
 0x285   : > { %2061 = vst.msk [vmem:[%s3690_s24 + $0x80] sm:$0xff] %vm1168_vm0, %v2029_v37  ;;  %v2030_v7 = vadd.f32 %v1998_v4, %v1922_v34 }
 0x286   : > { %2064 = vst.msk [vmem:[%s3690_s24 + $0x98] sm:$0xff] %vm1168_vm0, %v2032_v1 }
 0x287   : > { %2062 = vst.msk [vmem:[%s3690_s24 + $0x88] sm:$0xff] %vm1168_vm0, %v2030_v7  ;;  %v2638_v9 = vpop.f32.mrb[84].mxu1 }
 0x288   : > { %v1943_v38 = vadd.f32 %v2638_v9, %v3682_v43  ;;  %v1934_v12 = vpop.f32.mrb[85].mxu1 }
 0x289   : > { %v1935_v31 = vadd.f32 %v3682_v43, %v1934_v12  ;;  %v2639_v6 = vpop.f32.mrb[86].mxu1 }
 0x28a   : > { %v2035_v46 = vadd.f32 %v2003_v59, %v1943_v38  ;;  %v1946_v41 = vadd.f32 %v2639_v6, %v3682_v43  ;;  %v1937_v44 = vpop.f32.mrb[87].mxu1 }
 0x28b   : > { %v2033_v21 = vadd.f32 %v2001_v40, %v1935_v31  ;;  %v1938_v60 = vadd.f32 %v3682_v43, %v1937_v44 }
 0x28c   : > { %2067 = vst.msk [vmem:[%s3690_s24 + $0xb0] sm:$0xff] %vm1168_vm0, %v2035_v46  ;;  %v2036_v20 = vadd.f32 %v2004_v39, %v1946_v41 }
 0x28d   : > { %2065 = vst.msk [vmem:[%s3690_s24 + $0xa0] sm:$0xff] %vm1168_vm0, %v2033_v21  ;;  %v2034_v51 = vadd.f32 %v2002_v50, %v1938_v60 }
 0x28e   : > { %2068 = vst.msk [vmem:[%s3690_s24 + $0xb8] sm:$0xff] %vm1168_vm0, %v2036_v20 }
 0x28f   : > { %2066 = vst.msk [vmem:[%s3690_s24 + $0xa8] sm:$0xff] %vm1168_vm0, %v2034_v51  ;;  %v2642_v0 = vpop.f32.mrb[88].mxu1 }
 0x290   : > { %v1959_v27 = vadd.f32 %v2642_v0, %v3682_v43  ;;  %v1950_v47 = vpop.f32.mrb[89].mxu1 }
 0x291   : > { %v1951_v49 = vadd.f32 %v3682_v43, %v1950_v47  ;;  %v2643_v24 = vpop.f32.mrb[90].mxu1 }
 0x292   : > { %v2039_v14 = vadd.f32 %v2007_v3, %v1959_v27  ;;  %v1962_v33 = vadd.f32 %v2643_v24, %v3682_v43  ;;  %v1953_v29 = vpop.f32.mrb[91].mxu1 }
 0x293   : > { %v2037_v30 = vadd.f32 %v2005_v56, %v1951_v49  ;;  %v1954_v55 = vadd.f32 %v3682_v43, %v1953_v29 }
 0x294   : > { %2071 = vst.msk [vmem:[%s3690_s24 + $0xd0] sm:$0xff] %vm1168_vm0, %v2039_v14  ;;  %v2040_v26 = vadd.f32 %v2008_v28, %v1962_v33 }
 0x295   : > { %2069 = vst.msk [vmem:[%s3690_s24 + $0xc0] sm:$0xff] %vm1168_vm0, %v2037_v30  ;;  %v2038_v62 = vadd.f32 %v2006_v25, %v1954_v55 }
 0x296   : > { %2072 = vst.msk [vmem:[%s3690_s24 + $0xd8] sm:$0xff] %vm1168_vm0, %v2040_v26 }
 0x297   : > { %2070 = vst.msk [vmem:[%s3690_s24 + $0xc8] sm:$0xff] %vm1168_vm0, %v2038_v62  ;;  %v2646_v17 = vpop.f32.mrb[92].mxu1 }
 0x298   : > { %v1975_v53 = vadd.f32 %v2646_v17, %v3682_v43  ;;  %v1966_v10 = vpop.f32.mrb[93].mxu1 }
 0x299   : > { %v1967_v58 = vadd.f32 %v3682_v43, %v1966_v10  ;;  %v2647_v35 = vpop.f32.mrb[94].mxu1 }
 0x29a   : > { %v2043_v57 = vadd.f32 %v2011_v42, %v1975_v53  ;;  %v1978_v15 = vadd.f32 %v2647_v35, %v3682_v43  ;;  %v1969_v16 = vpop.f32.mrb[95].mxu1 }
 0x29b   : > { %v2041_v63 = vadd.f32 %v2009_v11, %v1967_v58  ;;  %v1970_v45 = vadd.f32 %v3682_v43, %v1969_v16 }
 0x29c   : > { %2075 = vst.msk [vmem:[%s3690_s24 + $0xf0] sm:$0xff] %vm1168_vm0, %v2043_v57  ;;  %v2044_v2 = vadd.f32 %v2012_v23, %v1978_v15 }
 0x29d   : > { %2073 = vst.msk [vmem:[%s3690_s24 + $0xe0] sm:$0xff] %vm1168_vm0, %v2041_v63  ;;  %v2042_v13 = vadd.f32 %v2010_v32, %v1970_v45 }
 0x29e   : > { %2076 = vst.msk [vmem:[%s3690_s24 + $0xf8] sm:$0xff] %vm1168_vm0, %v2044_v2 }
 0x29f   : > { %2074 = vst.msk [vmem:[%s3690_s24 + $0xe8] sm:$0xff] %vm1168_vm0, %v2042_v13 }
 0x2a0 PF: > { %s16_s21 = sadd.s32 1, %s2702_s21  }
 0x2a1   : > { %p13_p4 = scmp.ge.s32.totalorder %s16_s21, 4  }
 0x2a3   :  { %15 = sbr.rel (!%p13_p4) target bundleno = 1 (0x1), region = 77 }

// kernel: decoder_forward.8
= control target key start
LH: loop header
LB: loop body
LE: loop exit
PB: predicated region body
PF: predicated region fallthrough
CT: control target
= control target key end

     0   :  { %s2236_s12 = smov 0   ;;  %s3276_s0 = inlined_call_operand.vmem [shape: bf16[512,576], index: 0, kind: input, shape index: {}]   ;;  %s3277_s1 = inlined_call_operand.vmem [shape: bf16[576,128], index: 1, kind: input, shape index: {}]   ;;  %s3278_s2 = inlined_call_operand.vmem [shape: f32[1,128], index: 2, kind: input, shape index: {}]   ;;  %s3279_s3 = inlined_call_operand.vmem [shape: f32[512,128], index: 3, kind: output, shape index: {}]  }
   0x1 LB: > { %s1717_s13 = sadd.s32 4294967295, %s2213_s12   ;;  %p1721_p0 = scmp.ge.s32.totalorder %s2213_s12, 1  ;;  %s2213_s12 = sphi %s2236_s12, %s13_s12  }
   0x2   : > { %p139_p1 = scmp.lt.s32.totalorder %s2213_s12, 3 }
   0x4   : > { %p140_p2 = pnand %p1721_p0, %p139_p1 }
   0x6   : > { %143 = sbr.rel (%p140_p2) target bundleno = 422 (0x1a6), region = 32 }
   0xd   : > { %v2171_v0 = vld [vmem:[%s3277_s1 + $0x40] sm:$0xff]   ;;  %s1722_s16 = sshll.u32 %s1717_s13, 5  ;;  %v2173_v2 = vld [vmem:[%s3277_s1 + $0x48] sm:$0xff]   ;;  %v2175_v4 = vld [vmem:[%s3277_s1 + $0x50] sm:$0xff]   ;;  %v2215_v14 = vmov 0   ;;  %vm1065_vm0 = vcmask 523264  }
   0xe   : > { %v2172_v1 = vld [vmem:[%s3277_s1] sm:$0xff]   ;;  %p165_p3 = scmp.lt.s32.totalorder %s1722_s16, 63  ;;  %1861 = vmatprep.subr.bf16.mxu0 %v2171_v0  ;;  %2145 = vmatprep.subr.bf16.mxu1 %v2171_v0  ;;  %v2174_v3 = vld [vmem:[%s3277_s1 + $0x8] sm:$0xff]   ;;  %v2176_v5 = vld [vmem:[%s3277_s1 + $0x10] sm:$0xff]  }
   0xf   : > { %1862 = vmatpush3.bf16.msra.mxu0 %v2172_v1  ;;  %2153 = vmatpush3.bf16.msra.mxu1 %v2172_v1  ;;  %v2177_v6 = vld [vmem:[%s3277_s1 + $0x58] sm:$0xff]   ;;  %v2179_v8 = vld [vmem:[%s3277_s1 + $0x60] sm:$0xff]   ;;  %v2181_v10 = vld [vmem:[%s3277_s1 + $0x68] sm:$0xff]  }
  0x10   : > { %1863 = vmatprep.subr.bf16.mxu0 %v2173_v2  ;;  %2146 = vmatprep.subr.bf16.mxu1 %v2173_v2  ;;  %s3384_s16 = smov (!%p165_p3, %s1722_s16), 63  ;;  %v2178_v7 = vld [vmem:[%s3277_s1 + $0x18] sm:$0xff]   ;;  %v2180_v9 = vld [vmem:[%s3277_s1 + $0x20] sm:$0xff]   ;;  %v2182_v20 = vld [vmem:[%s3277_s1 + $0x28] sm:$0xff]  }
  0x11   : > { %s2161_s29 = smul.u32 20, %s3384_s16  ;;  %v2183_v22 = vld [vmem:[%s3277_s1 + $0x70] sm:$0xff]   ;;  %v2185_v25 = vld [vmem:[%s3277_s1 + $0x78] sm:$0xff]   ;;  %v2187_v31 = vld [vmem:[%s3277_s1 + $0xc0] sm:$0xff]   ;;  %s1725_s19 = sshll.u32 %s3384_s16, 3 }
  0x12   : > { %v2184_v24 = vld [vmem:[%s3277_s1 + $0x30] sm:$0xff]   ;;  %v2186_v30 = vld [vmem:[%s3277_s1 + $0x38] sm:$0xff]   ;;  %v2190_v32 = vld [vmem:[%s3277_s1 + $0x100] sm:$0xff]   ;;  %s3179_s22 = scalar_lea.vmem %s3279_s3, %s1725_s19 }
  0x13   : > { %1864 = vmatpush3.bf16.msra.mxu0 %v2174_v3  ;;  %2154 = vmatpush3.bf16.msra.mxu1 %v2174_v3  ;;  %s2277_s9 = scalar_lea.vmem %s3276_s0, %s2161_s29  ;;  %v2188_v35 = vld [vmem:[%s3277_s1 + $0x80] sm:$0xff]   ;;  %v2189_v41 = vld [vmem:[%s3277_s1 + $0xc8] sm:$0xff]   ;;  %v2192_v56 = vld [vmem:[%s3277_s1 + $0xd0] sm:$0xff]  }
  0x14   : > { %1865 = vmatprep.subr.bf16.mxu0 %v2175_v4  ;;  %2147 = vmatprep.subr.bf16.mxu1 %v2175_v4  ;;  %v178_v11 = vld [vmem:[%s2277_s9] sm:$0xff]  ;;  %v181_v12 = vld [vmem:[%s2277_s9 + $0x14] sm:$0xff]  ;;  %v184_v26 = vld [vmem:[%s2277_s9 + $0x28] sm:$0xff] }
  0x15   : > { %v250_v13 = vld [vmem:[%s2277_s9 + $0x1e0] sm:$0xff]  ;;  %v274_v15 = vmax.bf16 %v2215_v14, %v178_v11  ;;  %v277_v16 = vmax.bf16 %v2215_v14, %v181_v12  ;;  %v253_v17 = vld [vmem:[%s2277_s9 + $0x1f4] sm:$0xff]  ;;  %v256_v28 = vld [vmem:[%s2277_s9 + $0x208] sm:$0xff]  ;;  %v2319_v33 = vmax.bf16 %v2215_v14, %v184_v26 }
  0x16   : > { %v346_v18 = vmax.bf16 %v2215_v14, %v250_v13  ;;  %v349_v19 = vmax.bf16 %v2215_v14, %v253_v17  ;;  %v187_v27 = vld [vmem:[%s2277_s9 + $0x3c] sm:$0xff]  ;;  %v2328_v36 = vmax.bf16 %v2215_v14, %v256_v28  ;;  %v190_v38 = vld [vmem:[%s2277_s9 + $0x50] sm:$0xff]  ;;  %v193_v42 = vld [vmem:[%s2277_s9 + $0x64] sm:$0xff] }
  0x17   : > { %1866 = vmatpush3.bf16.msra.mxu0 %v2176_v5  ;;  %2155 = vmatpush3.bf16.msra.mxu1 %v2176_v5  ;;  %v1728_v21 = vcombine.high %v274_v15, %v277_v16  ;;  %v259_v29 = vld [vmem:[%s2277_s9 + $0x21c] sm:$0xff]  ;;  %v2322_v34 = vmax.bf16 %v2215_v14, %v187_v27  ;;  %v1727_v39 = vcombine.low %v274_v15, %v277_v16  ;;  %v262_v43 = vld [vmem:[%s2277_s9 + $0x230] sm:$0xff]  ;;  %v265_v45 = vld [vmem:[%s2277_s9 + $0x244] sm:$0xff] }
  0x18   : > { %1867 = vmatprep.subr.bf16.mxu0 %v2177_v6  ;;  %2148 = vmatprep.subr.bf16.mxu1 %v2177_v6  ;;  %v1788_v23 = vcombine.high %v346_v18, %v349_v19  ;;  %v2331_v37 = vmax.bf16 %v2215_v14, %v259_v29  ;;  %v1787_v40 = vcombine.low %v346_v18, %v349_v19  ;;  %v2191_v46 = vld [vmem:[%s3277_s1 + $0x88] sm:$0xff]   ;;  %v196_v48 = vld [vmem:[%s2277_s9 + $0x78] sm:$0xff]  ;;  %v2193_v57 = vld [vmem:[%s3277_s1 + $0x90] sm:$0xff]  }
  0x19   : > { %1146 = vmatprep.mubr.bf16.mxu0 %v1728_v21  ;;  %v1733_v44 = vcombine.high %v2319_v33, %v2322_v34  ;;  %v199_v49 = vld [vmem:[%s2277_s9 + $0x8c] sm:$0xff]  ;;  %v2350_v50 = vmax.bf16 %v2215_v14, %v190_v38  ;;  %v268_v51 = vld [vmem:[%s2277_s9 + $0x258] sm:$0xff]  ;;  %v2354_v52 = vmax.bf16 %v2215_v14, %v193_v42  ;;  %v2357_v53 = vmax.bf16 %v2215_v14, %v262_v43  ;;  %v202_v5 = vld [vmem:[%s2277_s9 + $0xa0] sm:$0xff] }
  0x1a   : > { %1242 = vmatprep.mubr.bf16.mxu1 %v1788_v23  ;;  %v1793_v47 = vcombine.high %v2328_v36, %v2331_v37  ;;  %v2360_v54 = vmax.bf16 %v2215_v14, %v265_v45  ;;  %v271_v55 = vld [vmem:[%s2277_s9 + $0x26c] sm:$0xff]  ;;  %v2370_v58 = vmax.bf16 %v2215_v14, %v196_v48  ;;  %v2373_v59 = vmax.bf16 %v2215_v14, %v199_v49  ;;  %v2194_v1 = vld [vmem:[%s3277_s1 + $0xd8] sm:$0xff]   ;;  %v188_v21 = vld [vmem:[%s2277_s9 + $0x44] sm:$0xff] }
  0x1b   : > { %1868 = vmatpush3.bf16.msra.mxu0 %v2178_v7  ;;  %2156 = vmatpush3.bf16.msra.mxu1 %v2178_v7  ;;  %v1732_v60 = vcombine.low %v2319_v33, %v2322_v34  ;;  %v1792_v61 = vcombine.low %v2328_v36, %v2331_v37  ;;  %v2380_v62 = vmax.bf16 %v2215_v14, %v268_v51  ;;  %v2203_v0 = vld [vmem:[%s3277_s1 + $0x108] sm:$0xff]   ;;  %v205_v6 = vld [vmem:[%s2277_s9 + $0xb4] sm:$0xff]  ;;  %v182_v11 = vld [vmem:[%s2277_s9 + $0x1c] sm:$0xff] }
  0x1c   : > { %1869 = vmatprep.subr.bf16.mxu0 %v2179_v8  ;;  %2149 = vmatprep.subr.bf16.mxu1 %v2179_v8  ;;  %v2383_v63 = vmax.bf16 %v2215_v14, %v271_v55  ;;  %v1738_v2 = vcombine.high %v2350_v50, %v2354_v52  ;;  %v1798_v3 = vcombine.high %v2357_v53, %v2360_v54  ;;  %v208_v12 = vld [vmem:[%s2277_s9 + $0xc8] sm:$0xff]  ;;  %v2195_v13 = vld [vmem:[%s3277_s1 + $0x98] sm:$0xff]   ;;  %v214_v26 = vld [vmem:[%s2277_s9 + $0xf0] sm:$0xff] }
  0x1d   : > { %v1737_v4 = vcombine.low %v2350_v50, %v2354_v52  ;;  %v1797_v7 = vcombine.low %v2357_v53, %v2360_v54  ;;  %v2402_v8 = vmax.bf16 %v2215_v14, %v202_v5  ;;  %v1743_v15 = vcombine.high %v2370_v58, %v2373_v59  ;;  %v211_v19 = vld [vmem:[%s2277_s9 + $0xdc] sm:$0xff]  ;;  %v217_v27 = vld [vmem:[%s2277_s9 + $0x104] sm:$0xff]  ;;  %v2205_v36 = vld [vmem:[%s3277_s1 + $0x110] sm:$0xff]  }
  0x1e   : > { %v1742_v16 = vcombine.low %v2370_v58, %v2373_v59  ;;  %v2421_v18 = vmax.bf16 %v2215_v14, %v182_v11  ;;  %v1803_v23 = vcombine.high %v2380_v62, %v2383_v63  ;;  %v191_v28 = vld [vmem:[%s2277_s9 + $0x58] sm:$0xff]  ;;  %v1802_v29 = vcombine.low %v2380_v62, %v2383_v63  ;;  %v223_v38 = vld [vmem:[%s2277_s9 + $0x12c] sm:$0xff]  ;;  %v226_v49 = vld [vmem:[%s2277_s9 + $0x140] sm:$0xff] }
  0x1f   : > { %1870 = vmatpush3.bf16.msra.mxu0 %v2180_v9  ;;  %2157 = vmatpush3.bf16.msra.mxu1 %v2180_v9  ;;  %v2405_v9 = vmax.bf16 %v2215_v14, %v205_v6  ;;  %v220_v37 = vld [vmem:[%s2277_s9 + $0x118] sm:$0xff]  ;;  %v2470_v42 = vmax.bf16 %v2215_v14, %v191_v28  ;;  %v2486_v48 = vmax.bf16 %v2215_v14, %v223_v38  ;;  %v203_v55 = vld [vmem:[%s2277_s9 + $0xa8] sm:$0xff]  ;;  %v2201_v53 = vld [vmem:[%s3277_s1 + $0xb0] sm:$0xff]  }
  0x20   : > { %1871 = vmatprep.subr.bf16.mxu0 %v2181_v10  ;;  %2150 = vmatprep.subr.bf16.mxu1 %v2181_v10  ;;  %v179_v10 = vld [vmem:[%s2277_s9 + $0x8] sm:$0xff]  ;;  %v229_v51 = vld [vmem:[%s2277_s9 + $0x154] sm:$0xff]  ;;  %v183_v52 = vld [vmem:[%s2277_s9 + $0x24] sm:$0xf] }
  0x21   : > { %v2418_v17 = vmax.bf16 %v2215_v14, %v179_v10  ;;  %v1747_v34 = vcombine.low %v2402_v8, %v2405_v9  ;;  %v232_v10 = vld [vmem:[%s2277_s9 + $0x168] sm:$0xff]  ;;  %v192_v5 = vld [vmem:[%s2277_s9 + $0x60] sm:$0xf]  ;;  %v195_v63 = vld [vmem:[%s2277_s9 + $0x74] sm:$0xf] }
  0x22   : > { %v2199_v50 = vld [vmem:[%s3277_s1 + $0xa8] sm:$0xff]   ;;  %v2554_v54 = vmax.bf16 %v2215_v14, %v232_v10  ;;  %v239_v62 = vld [vmem:[%s2277_s9 + $0x198] sm:$0xff]  ;;  %v207_v58 = vld [vmem:[%s2277_s9 + $0xc4] sm:$0xf] }
  0x23   : > { %1872 = vmatpush3.bf16.msra.mxu0 %v2182_v20  ;;  %2158 = vmatpush3.bf16.msra.mxu1 %v2182_v20  ;;  %v185_v20 = vld [vmem:[%s2277_s9 + $0x30] sm:$0xff]  ;;  %v1729_v33 = vcombine.low %v2418_v17, %v2421_v18  ;;  %v1730_v45 = vcombine.high %v2418_v17, %v2421_v18  ;;  %v189_v11 = vld [vmem:[%s2277_s9 + $0x4c] sm:$0xf]  ;;  %v236_v6 = vld [vmem:[%s2277_s9 + $0x184] sm:$0xff] }
  0x24   : > { %1873 = vmatprep.subr.bf16.mxu0 %v2183_v22  ;;  %2151 = vmatprep.subr.bf16.mxu1 %v2183_v22  ;;  %v2196_v22 = vld [vmem:[%s3277_s1 + $0xe0] sm:$0xff]   ;;  %v2683_v59 = vmax.bf16 %v2215_v14, %v189_v11 }
  0x25   : > { %v240_v17 = vld [vmem:[%s2277_s9 + $0x1a0] sm:$0xf] }
  0x27   : > { %1874 = vmatpush3.bf16.msra.mxu0 %v2184_v24  ;;  %2159 = vmatpush3.bf16.msra.mxu1 %v2184_v24  ;;  %v2432_v24 = vmax.bf16 %v2215_v14, %v208_v12  ;;  %v2512_v12 = vmax.bf16 %v2215_v14, %v226_v49 }
  0x28   : > { %1875 = vmatprep.subr.bf16.mxu0 %v2185_v25  ;;  %2152 = vmatprep.subr.bf16.mxu1 %v2185_v25  ;;  %v2435_v25 = vmax.bf16 %v2215_v14, %v211_v19  ;;  %v2518_v19 = vmax.bf16 %v2215_v14, %v203_v55 }
  0x2b   : > { %1876 = vmatpush3.bf16.msra.mxu0 %v2186_v30  ;;  %2160 = vmatpush3.bf16.msra.mxu1 %v2186_v30  ;;  %v1748_v30 = vcombine.high %v2402_v8, %v2405_v9  ;;  %v3307_v8 = vcombine.high %v2432_v24, %v2435_v25 }
  0x2c   : > { %1973 = vmatprep.subr.bf16.mxu1 %v2187_v31  ;;  %2105 = vmatprep.subr.bf16.mxu0 %v2190_v32  ;;  %v2445_v31 = vmax.bf16 %v2215_v14, %v185_v20  ;;  %v235_v20 = vld [vmem:[%s2277_s9 + $0x17c] sm:$0xff] }
  0x2d   : > { %v2569_v49 = vmax.bf16 %v2215_v14, %v235_v20  ;;  %v2202_v20 = vld [vmem:[%s3277_s1 + $0xf8] sm:$0xff]  }
  0x2e   : > { %1147 = vmatmul.mubr.bf16.vlgmr.msra.gmra.mrb[0].mxu0 %v1727_v39  ;;  %1243 = vmatmul.mubr.bf16.vlgmr.msra.gmra.mrb[0].mxu1 %v1787_v40  ;;  %v2197_v39 = vld [vmem:[%s3277_s1 + $0xa0] sm:$0xff]   ;;  %v2464_v40 = vmax.bf16 %v2215_v14, %v214_v26 }
  0x2f   : > { %1974 = vmatpush3.bf16.msra.mxu1 %v2188_v35  ;;  %2106 = vmatpush3.bf16.msra.mxu0 %v2190_v32  ;;  %v194_v32 = vld [vmem:[%s2277_s9 + $0x6c] sm:$0xff]  ;;  %v2453_v35 = vmax.bf16 %v2215_v14, %v188_v21 }
  0x30   : > { %1975 = vmatprep.subr.bf16.mxu1 %v2189_v41  ;;  %1154 = vmatprep.mubr.bf16.mxu0 %v1733_v44  ;;  %v2467_v41 = vmax.bf16 %v2215_v14, %v217_v27  ;;  %v2473_v43 = vmax.bf16 %v2215_v14, %v194_v32  ;;  %v2198_v44 = vld [vmem:[%s3277_s1 + $0xe8] sm:$0xff]   ;;  %v209_v21 = vld [vmem:[%s2277_s9 + $0xd0] sm:$0xff] }
  0x31   : > { %1250 = vmatprep.mubr.bf16.mxu1 %v1793_v47  ;;  %2107 = vmatprep.subr.bf16.mxu0 %v2203_v0  ;;  %v2483_v47 = vmax.bf16 %v2215_v14, %v220_v37  ;;  %v212_v32 = vld [vmem:[%s2277_s9 + $0xe4] sm:$0xff]  ;;  %v3308_v9 = vcombine.high %v2445_v31, %v2453_v35 }
  0x32   : > { %v241_v37 = vld [vmem:[%s2277_s9 + $0x1a4] sm:$0xff] }
  0x33   : > { %1976 = vmatpush3.bf16.msra.mxu1 %v2191_v46  ;;  %2108 = vmatpush3.bf16.msra.mxu0 %v2203_v0  ;;  %v197_v0 = vld [vmem:[%s2277_s9 + $0x80] sm:$0xff]  ;;  %v2581_v55 = vmax.bf16 %v2215_v14, %v241_v37  ;;  %v227_v37 = vld [vmem:[%s2277_s9 + $0x148] sm:$0xff] }
  0x34   : > { %1977 = vmatprep.subr.bf16.mxu1 %v2192_v56  ;;  %2109 = vmatprep.subr.bf16.mxu0 %v2205_v36  ;;  %v2532_v26 = vmax.bf16 %v2215_v14, %v197_v0  ;;  %v244_v0 = vld [vmem:[%s2277_s9 + $0x1b8] sm:$0xff]  ;;  %v222_v56 = vld [vmem:[%s2277_s9 + $0x128] sm:$0xf] }
  0x35   : > { %v2619_v38 = vmax.bf16 %v2215_v14, %v244_v0  ;;  %v254_v46 = vld [vmem:[%s2277_s9 + $0x1fc] sm:$0xff]  ;;  %v2787_v18 = vmax.bf16 %v2215_v14, %v222_v56  ;;  %v2837_v56 = vmax.bf16 %v2215_v14, %v240_v17  ;;  %v261_v17 = vld [vmem:[%s2277_s9 + $0x22c] sm:$0xf] }
  0x36   : > { %1155 = vmatmul.mubr.bf16.gmra.mrb[4].mxu0 %v1732_v60  ;;  %1251 = vmatmul.mubr.bf16.gmra.mrb[4].mxu1 %v1792_v61 }
  0x37   : > { %1978 = vmatpush3.bf16.msra.mxu1 %v2193_v57  ;;  %1162 = vmatprep.mubr.bf16.mxu0 %v1738_v2  ;;  %v206_v2 = vld [vmem:[%s2277_s9 + $0xbc] sm:$0xff] }
  0x38   : > { %1979 = vmatprep.subr.bf16.mxu1 %v2194_v1  ;;  %1258 = vmatprep.mubr.bf16.mxu1 %v1798_v3  ;;  %v200_v1 = vld [vmem:[%s2277_s9 + $0x94] sm:$0xff]  ;;  %v2538_v28 = vmax.bf16 %v2215_v14, %v206_v2  ;;  %v221_v2 = vld [vmem:[%s2277_s9 + $0x120] sm:$0xff] }
  0x39   : > { %2110 = vmatpush3.bf16.msra.mxu0 %v2205_v36  ;;  %v2535_v27 = vmax.bf16 %v2215_v14, %v200_v1  ;;  %v238_v36 = vld [vmem:[%s2277_s9 + $0x190] sm:$0xff]  ;;  %v245_v3 = vld [vmem:[%s2277_s9 + $0x1c0] sm:$0xff] }
  0x3a   : > { %v247_v1 = vld [vmem:[%s2277_s9 + $0x1cc] sm:$0xff] }
  0x3b   : > { %1980 = vmatpush3.bf16.msra.mxu1 %v2195_v13  ;;  %v2515_v13 = vmax.bf16 %v2215_v14, %v229_v51  ;;  %v2578_v51 = vmax.bf16 %v2215_v14, %v238_v36  ;;  %v224_v36 = vld [vmem:[%s2277_s9 + $0x134] sm:$0xff] }
  0x3c   : > { %1981 = vmatprep.subr.bf16.mxu1 %v2196_v22  ;;  %v2206_v22 = vld [vmem:[%s3277_s1 + $0x118] sm:$0xff]   ;;  %v2631_v10 = vmax.bf16 %v2215_v14, %v224_v36 }
  0x3d   : > { %2111 = vmatprep.subr.bf16.mxu0 %v2206_v22 }
  0x3e   : > { %1163 = vmatmul.mubr.bf16.gmra.mrb[8].mxu0 %v1737_v4  ;;  %1259 = vmatmul.mubr.bf16.gmra.mrb[8].mxu1 %v1797_v7  ;;  %v215_v4 = vld [vmem:[%s2277_s9 + $0xf8] sm:$0xff]  ;;  %v218_v7 = vld [vmem:[%s2277_s9 + $0x10c] sm:$0xff] }
  0x3f   : > { %1982 = vmatpush3.bf16.msra.mxu1 %v2197_v39  ;;  %1170 = vmatprep.mubr.bf16.mxu0 %v1743_v15  ;;  %v2200_v15 = vld [vmem:[%s3277_s1 + $0xf0] sm:$0xff]   ;;  %v230_v39 = vld [vmem:[%s2277_s9 + $0x15c] sm:$0xff] }
  0x40   : > { %1983 = vmatprep.subr.bf16.mxu1 %v2198_v44  ;;  %1266 = vmatprep.mubr.bf16.mxu1 %v1803_v23  ;;  %v2572_v44 = vmax.bf16 %v2215_v14, %v209_v21  ;;  %v2575_v23 = vmax.bf16 %v2215_v14, %v212_v32  ;;  %v2591_v21 = vmax.bf16 %v2215_v14, %v215_v4 }
  0x41   : > { %2112 = vmatpush3.bf16.msra.mxu0 %v2206_v22  ;;  %v2594_v32 = vmax.bf16 %v2215_v14, %v218_v7  ;;  %v2622_v4 = vmax.bf16 %v2215_v14, %v247_v1  ;;  %v2628_v7 = vmax.bf16 %v2215_v14, %v221_v2  ;;  %v2634_v22 = vmax.bf16 %v2215_v14, %v227_v37  ;;  %v186_v1 = vld [vmem:[%s2277_s9 + $0x38] sm:$0xf]  ;;  %v233_v37 = vld [vmem:[%s2277_s9 + $0x170] sm:$0xff] }
  0x42   : > { %v2637_v0 = vmax.bf16 %v2215_v14, %v230_v39  ;;  %v242_v39 = vld [vmem:[%s2277_s9 + $0x1ac] sm:$0xff]  ;;  %v2700_v2 = vmax.bf16 %v2215_v14, %v195_v63 }
  0x43   : > { %1984 = vmatpush3.bf16.msra.mxu1 %v2199_v50  ;;  %v180_v50 = vld [vmem:[%s2277_s9 + $0x10] sm:$0xf]  ;;  %v2726_v61 = vmax.bf16 %v2215_v14, %v242_v39  ;;  %v219_v39 = vld [vmem:[%s2277_s9 + $0x114] sm:$0xf] }
  0x44   : > { %1985 = vmatprep.subr.bf16.mxu1 %v2200_v15  ;;  %v2204_v15 = vld [vmem:[%s3277_s1 + $0xb8] sm:$0xff]   ;;  %v2653_v36 = vmax.bf16 %v2215_v14, %v180_v50  ;;  %v2679_v50 = vmax.bf16 %v2215_v14, %v186_v1  ;;  %v2718_v1 = vmax.bf16 %v2215_v14, %v239_v62  ;;  %v2733_v62 = vmax.bf16 %v2215_v14, %v207_v58 }
  0x46   : > { %1171 = vmatmul.mubr.bf16.gmra.mrb[12].mxu0 %v1742_v16  ;;  %1267 = vmatmul.mubr.bf16.gmra.mrb[12].mxu1 %v1802_v29  ;;  %v198_v16 = vld [vmem:[%s2277_s9 + $0x88] sm:$0xf]  ;;  %v201_v29 = vld [vmem:[%s2277_s9 + $0x9c] sm:$0xf]  ;;  %3302 = vst [vmem:[#allocation4_spill] sm:$0xff] %v2733_v62 }
  0x47   : > { %1986 = vmatpush3.bf16.msra.mxu1 %v2201_v53  ;;  %1178 = vmatprep.mubr.bf16.mxu0 %v1748_v30  ;;  %v2674_v30 = vmax.bf16 %v2215_v14, %v183_v52  ;;  %v2692_v52 = vmax.bf16 %v2215_v14, %v192_v5  ;;  %v204_v53 = vld [vmem:[%s2277_s9 + $0xb0] sm:$0xf]  ;;  %v2703_v11 = vmax.bf16 %v2215_v14, %v198_v16  ;;  %v213_v5 = vld [vmem:[%s2277_s9 + $0xec] sm:$0xf]  ;;  %v216_v16 = vld [vmem:[%s2277_s9 + $0x100] sm:$0xf] }
  0x48   : > { %1987 = vmatprep.subr.bf16.mxu1 %v2202_v20  ;;  %1307 = vmatprep.mubr.bf16.mxu1 %v1730_v45  ;;  %v2686_v20 = vmax.bf16 %v2215_v14, %v233_v37  ;;  %v2689_v45 = vmax.bf16 %v2215_v14, %v236_v6  ;;  %v2706_v6 = vmax.bf16 %v2215_v14, %v201_v29  ;;  %v210_v37 = vld [vmem:[%s2277_s9 + $0xd8] sm:$0xf]  ;;  %v249_v62 = vld [vmem:[%s2277_s9 + $0x1dc] sm:$0xf] }
  0x49   : > { %v248_v29 = vld [vmem:[%s2277_s9 + $0x1d4] sm:$0xff]  ;;  %v2729_v63 = vmax.bf16 %v2215_v14, %v204_v53  ;;  %v2736_v57 = vmax.bf16 %v2215_v14, %v210_v37  ;;  %v2739_v60 = vmax.bf16 %v2215_v14, %v213_v5  ;;  %v225_v53 = vld [vmem:[%s2277_s9 + $0x13c] sm:$0xf]  ;;  %v251_v5 = vld [vmem:[%s2277_s9 + $0x1e8] sm:$0xff] }
  0x4a   : > { %3300 = vst [vmem:[#allocation2_spill] sm:$0xff] %v2706_v6  ;;  %v2758_v37 = vmax.bf16 %v2215_v14, %v248_v29  ;;  %v228_v6 = vld [vmem:[%s2277_s9 + $0x150] sm:$0xf]  ;;  %v234_v29 = vld [vmem:[%s2277_s9 + $0x178] sm:$0xf]  ;;  %v2791_v58 = vmax.bf16 %v2215_v14, %v225_v53 }
  0x4b   : > { %1988 = vmatpush3.bf16.msra.mxu1 %v2204_v15  ;;  %3301 = vst [vmem:[#allocation3_spill] sm:$0xff] %v2729_v63  ;;  %3303 = vst [vmem:[#allocation5_spill] sm:$0xff] %v2736_v57  ;;  %v2742_v15 = vmax.bf16 %v2215_v14, %v245_v3  ;;  %v237_v3 = vld [vmem:[%s2277_s9 + $0x18c] sm:$0xf]  ;;  %v260_v57 = vld [vmem:[%s2277_s9 + $0x224] sm:$0xff] }
  0x4c   : > { %3304 = vst [vmem:[#allocation6_spill] sm:$0xff] %v2739_v60  ;;  %3306 = vst [vmem:[#allocation8_spill] sm:$0xff] %v2758_v37  ;;  %v2794_v60 = vmax.bf16 %v2215_v14, %v251_v5  ;;  %v243_v37 = vld [vmem:[%s2277_s9 + $0x1b4] sm:$0xf]  ;;  %v2811_v5 = vmax.bf16 %v2215_v14, %v234_v29  ;;  %v2834_v63 = vmax.bf16 %v2215_v14, %v260_v57  ;;  %v255_v57 = vld [vmem:[%s2277_s9 + $0x204] sm:$0xf] }
  0x4d   : > { %3305 = vst [vmem:[#allocation7_spill] sm:$0xff] %v2742_v15  ;;  %v246_v15 = vld [vmem:[%s2277_s9 + $0x1c8] sm:$0xf] }
  0x4e   : > { %1179 = vmatmul.mubr.bf16.gmra.mrb[16].mxu0 %v1747_v34  ;;  %1308 = vmatmul.mubr.bf16.vlgmr.msra.gmra.mrb[16].mxu1 %v1729_v33  ;;  %v2774_v33 = vmax.bf16 %v2215_v14, %v216_v16  ;;  %v231_v34 = vld [vmem:[%s2277_s9 + $0x164] sm:$0xf]  ;;  %v257_v16 = vld [vmem:[%s2277_s9 + $0x210] sm:$0xff]  ;;  %3311 = vst [vmem:[#allocation11_spill] sm:$0xff] %v2794_v60  ;;  %3315 = vst [vmem:[#allocation15_spill] sm:$0xff] %v2811_v5  ;;  %v3318_v5 = vcombine.low %v2432_v24, %v2435_v25 }
  0x4f   : > { %1186 = vmatprep.mubr.bf16.mxu0 %v3307_v8  ;;  %1315 = vmatprep.mubr.bf16.mxu1 %v3308_v9  ;;  %v2782_v9 = vmax.bf16 %v2215_v14, %v219_v39  ;;  %v2797_v8 = vmax.bf16 %v2215_v14, %v254_v46  ;;  %v2800_v39 = vmax.bf16 %v2215_v14, %v228_v6  ;;  %v263_v6 = vld [vmem:[%s2277_s9 + $0x238] sm:$0xff]  ;;  %v264_v60 = vld [vmem:[%s2277_s9 + $0x240] sm:$0xf] }
  0x50   : > { %3309 = vst [vmem:[#allocation9_spill] sm:$0xff] %v2774_v33  ;;  %v2808_v53 = vmax.bf16 %v2215_v14, %v231_v34  ;;  %v2814_v46 = vmax.bf16 %v2215_v14, %v237_v3  ;;  %v2826_v29 = vmax.bf16 %v2215_v14, %v257_v16  ;;  %v266_v3 = vld [vmem:[%s2277_s9 + $0x24c] sm:$0xff]  ;;  %v2841_v16 = vmax.bf16 %v2215_v14, %v243_v37  ;;  %v273_v37 = vld [vmem:[%s2277_s9 + $0x27c] sm:$0xf] }
  0x51   : > { %3310 = vst [vmem:[#allocation10_spill] sm:$0xff] %v2782_v9  ;;  %3312 = vst [vmem:[#allocation12_spill] sm:$0xff] %v2797_v8  ;;  %v252_v34 = vld [vmem:[%s2277_s9 + $0x1f0] sm:$0xf]  ;;  %v2844_v8 = vmax.bf16 %v2215_v14, %v246_v15  ;;  %v2847_v9 = vmax.bf16 %v2215_v14, %v249_v62  ;;  %v2850_v33 = vmax.bf16 %v2215_v14, %v263_v6 }
  0x52   : > { %3313 = vst [vmem:[#allocation13_spill] sm:$0xff] %v2800_v39  ;;  %3314 = vst [vmem:[#allocation14_spill] sm:$0xff] %v2808_v53  ;;  %v3319_v15 = vcombine.low %v2445_v31, %v2453_v35  ;;  %v2866_v6 = vmax.bf16 %v2215_v14, %v266_v3  ;;  %v269_v53 = vld [vmem:[%s2277_s9 + $0x260] sm:$0xff]  ;;  %v272_v39 = vld [vmem:[%s2277_s9 + $0x274] sm:$0xff]  ;;  %v3320_v24 = vcombine.high %v2464_v40, %v2467_v41 }
  0x53   : > { %3316 = vst [vmem:[#allocation16_spill] sm:$0xff] %v2814_v46  ;;  %3317 = vst [vmem:[#allocation17_spill] sm:$0xff] %v2847_v9  ;;  %v258_v46 = vld [vmem:[%s2277_s9 + $0x218] sm:$0xf]  ;;  %v3321_v25 = vcombine.high %v2470_v42, %v2473_v43  ;;  %v267_v3 = vld [vmem:[%s2277_s9 + $0x254] sm:$0xf]  ;;  %v2898_v35 = vmax.bf16 %v2215_v14, %v261_v17  ;;  %v2904_v9 = vmax.bf16 %v2215_v14, %v272_v39 }
  0x54   : > { %v2895_v31 = vmax.bf16 %v2215_v14, %v258_v46  ;;  %v2907_v62 = vmax.bf16 %v2215_v14, %v264_v60  ;;  %v2918_v17 = vmax.bf16 %v2215_v14, %v273_v37  ;;  %v3323_v37 = vcombine.low %v2470_v42, %v2473_v43 }
  0x55   : > { %v3327_v42 = vcombine.low %v2512_v12, %v2515_v13  ;;  %v3328_v43 = vcombine.low %v2518_v19, %v2538_v28 }
  0x56   : > { %1187 = vmatmul.mubr.bf16.gmra.mrb[20].mxu0 %v3318_v5  ;;  %1316 = vmatmul.mubr.bf16.gmra.mrb[20].mxu1 %v3319_v15  ;;  %v2882_v5 = vmax.bf16 %v2215_v14, %v252_v34  ;;  %v270_v15 = vld [vmem:[%s2277_s9 + $0x268] sm:$0xf]  ;;  %v2901_v34 = vmax.bf16 %v2215_v14, %v269_v53  ;;  %v1745_v53 = vcombine.high %v2532_v26, %v2535_v27 }
  0x57   : > { %1194 = vmatprep.mubr.bf16.mxu0 %v3320_v24  ;;  %1323 = vmatprep.mubr.bf16.mxu1 %v3321_v25  ;;  %v2890_v24 = vmax.bf16 %v2215_v14, %v255_v57  ;;  %v2912_v25 = vmax.bf16 %v2215_v14, %v267_v3  ;;  %v2915_v46 = vmax.bf16 %v2215_v14, %v270_v15 }
  0x58   : > { %v1796_v39 = vcombine.low %v2895_v31, %v2898_v35  ;;  %v1805_v60 = vcombine.high %v2901_v34, %v2904_v9  ;;  %v3322_v14 = vcombine.low %v2464_v40, %v2467_v41  ;;  %v3324_v31 = vcombine.high %v2483_v47, %v2486_v48 }
  0x59   : > { %v1791_v57 = vcombine.low %v2882_v5, %v2890_v24  ;;  %v1804_v5 = vcombine.low %v2901_v34, %v2904_v9  ;;  %v1801_v3 = vcombine.low %v2907_v62, %v2912_v25  ;;  %v1806_v15 = vcombine.low %v2915_v46, %v2918_v17  ;;  %v3361_v24 = vld [vmem:[#allocation9_spill] sm:$0xff]  ;;  %v3362_v25 = vld [vmem:[#allocation10_spill] sm:$0xff]  ;;  %v3367_v17 = vld [vmem:[#allocation12_spill] sm:$0xff] }
  0x5a   : > { %v1762_v9 = vcombine.low %v2483_v47, %v2486_v48  ;;  %v1744_v62 = vcombine.low %v2532_v26, %v2535_v27  ;;  %v3325_v40 = vcombine.high %v2512_v12, %v2515_v13  ;;  %v3326_v41 = vcombine.high %v2518_v19, %v2538_v28 }
  0x5b   : > { %v3329_v47 = vcombine.high %v2554_v54, %v2569_v49  ;;  %v3330_v48 = vcombine.high %v2572_v44, %v2575_v23  ;;  %v3331_v26 = vcombine.low %v2554_v54, %v2569_v49  ;;  %v3332_v12 = vcombine.low %v2572_v44, %v2575_v23 }
  0x5c   : > { %v3333_v13 = vcombine.high %v2578_v51, %v2581_v55  ;;  %v3334_v19 = vcombine.high %v2591_v21, %v2594_v32  ;;  %v3335_v27 = vcombine.low %v2578_v51, %v2581_v55  ;;  %v3336_v28 = vcombine.low %v2591_v21, %v2594_v32 }
  0x5d   : > { %v3337_v54 = vcombine.high %v2619_v38, %v2622_v4  ;;  %v3338_v49 = vcombine.high %v2628_v7, %v2631_v10  ;;  %v3339_v44 = vcombine.low %v2619_v38, %v2622_v4  ;;  %v3340_v23 = vcombine.low %v2628_v7, %v2631_v10 }
  0x5e   : > { %1195 = vmatmul.mubr.bf16.gmra.mrb[24].mxu0 %v3322_v14  ;;  %1324 = vmatmul.mubr.bf16.gmra.mrb[24].mxu1 %v3323_v37  ;;  %v3341_v51 = vcombine.high %v2634_v22, %v2637_v0  ;;  %v3342_v55 = vcombine.low %v2653_v36, %v2674_v30  ;;  %v3343_v21 = vcombine.low %v2634_v22, %v2637_v0  ;;  %v3348_v22 = vld [vmem:[#allocation2_spill] sm:$0xff]  ;;  %v3351_v36 = vld [vmem:[#allocation3_spill] sm:$0xff]  ;;  %v3369_v14 = vld [vmem:[#allocation13_spill] sm:$0xff] }
  0x5f   : > { %1202 = vmatprep.mubr.bf16.mxu0 %v3324_v31  ;;  %1331 = vmatprep.mubr.bf16.mxu1 %v1745_v53  ;;  %v3344_v38 = vcombine.low %v2679_v50, %v2683_v59  ;;  %v3345_v10 = vcombine.high %v2686_v20, %v2689_v45  ;;  %v3346_v32 = vcombine.low %v2692_v52, %v2700_v2  ;;  %v3352_v59 = vld [vmem:[#allocation4_spill] sm:$0xff]  ;;  %v3355_v50 = vld [vmem:[#allocation5_spill] sm:$0xff]  ;;  %v3358_v52 = vld [vmem:[#allocation7_spill] sm:$0xff] }
  0x60   : > { %v3347_v4 = vcombine.low %v2686_v20, %v2689_v45  ;;  %v3349_v7 = vcombine.low %v2703_v11, %v3348_v22  ;;  %v3350_v0 = vcombine.high %v2718_v1, %v2726_v61  ;;  %v3353_v30 = vcombine.low %v3351_v36, %v3352_v59  ;;  %v3356_v20 = vld [vmem:[#allocation6_spill] sm:$0xff]  ;;  %v3359_v11 = vld [vmem:[#allocation8_spill] sm:$0xff] }
  0x61   : > { %v3354_v2 = vcombine.low %v2718_v1, %v2726_v61  ;;  %v3357_v45 = vcombine.low %v3355_v50, %v3356_v20  ;;  %v3360_v35 = vcombine.high %v3358_v52, %v3359_v11  ;;  %v3363_v34 = vcombine.low %v3361_v24, %v3362_v25  ;;  %v3366_v1 = vld [vmem:[#allocation11_spill] sm:$0xff]  ;;  %v3370_v37 = vld [vmem:[#allocation14_spill] sm:$0xff] }
  0x62   : > { %v3364_v46 = vcombine.low %v3358_v52, %v3359_v11  ;;  %v3365_v61 = vcombine.low %v2787_v18, %v2791_v58  ;;  %v3368_v53 = vcombine.high %v3366_v1, %v3367_v17  ;;  %v3371_v31 = vcombine.low %v3369_v14, %v3370_v37  ;;  %v3106_v14 = vld [vmem:[%s3278_s2] ss:$0 sm:$0xff] }
  0x63   : > { %v3376_v58 = vcombine.high %v2826_v29, %v2834_v63  ;;  %v3377_v18 = vcombine.low %v2837_v56, %v2841_v16  ;;  %v3382_v56 = vcombine.low %v2850_v33, %v2866_v6 }
  0x66   : > { %1203 = vmatmul.mubr.bf16.gmra.mrb[28].mxu0 %v1762_v9  ;;  %1332 = vmatmul.mubr.bf16.gmra.mrb[28].mxu1 %v1744_v62  ;;  %v3372_v9 = vcombine.low %v3366_v1, %v3367_v17  ;;  %v3373_v62 = vld [vmem:[#allocation15_spill] sm:$0xff] }
  0x67   : > { %1210 = vmatprep.mubr.bf16.mxu0 %v3325_v40  ;;  %1339 = vmatprep.mubr.bf16.mxu1 %v3326_v41  ;;  %v3374_v40 = vld [vmem:[#allocation16_spill] sm:$0xff] }
  0x68   : > { %v3375_v41 = vcombine.low %v3373_v62, %v3374_v40 }
  0x6e   : > { %1211 = vmatmul.mubr.bf16.gmra.mrb[32].mxu0 %v3327_v42  ;;  %1340 = vmatmul.mubr.bf16.gmra.mrb[32].mxu1 %v3328_v43  ;;  %v3378_v42 = vcombine.low %v2826_v29, %v2834_v63  ;;  %v3379_v43 = vld [vmem:[#allocation17_spill] sm:$0xff] }
  0x6f   : > { %1218 = vmatprep.mubr.bf16.mxu0 %v3329_v47  ;;  %1347 = vmatprep.mubr.bf16.mxu1 %v3330_v48  ;;  %v3380_v47 = vcombine.low %v2844_v8, %v3379_v43  ;;  %v3381_v48 = vcombine.high %v2850_v33, %v2866_v6 }
  0x76   : > { %1219 = vmatmul.mubr.bf16.gmra.mrb[36].mxu0 %v3331_v26  ;;  %1348 = vmatmul.mubr.bf16.gmra.mrb[36].mxu1 %v3332_v12 }
  0x77   : > { %1226 = vmatprep.mubr.bf16.mxu0 %v3333_v13  ;;  %1355 = vmatprep.mubr.bf16.mxu1 %v3334_v19 }
  0x7e   : > { %1227 = vmatmul.mubr.bf16.gmra.mrb[40].mxu0 %v3335_v27  ;;  %1356 = vmatmul.mubr.bf16.gmra.mrb[40].mxu1 %v3336_v28 }
  0x7f   : > { %1234 = vmatprep.mubr.bf16.mxu0 %v3337_v54  ;;  %1363 = vmatprep.mubr.bf16.mxu1 %v3338_v49 }
  0x86   : > { %1235 = vmatmul.mubr.bf16.gmra.mrb[44].mxu0 %v3339_v44  ;;  %1364 = vmatmul.mubr.bf16.gmra.mrb[44].mxu1 %v3340_v23 }
  0x87   : > { %1371 = vmatprep.mubr.bf16.mxu1 %v3341_v51  ;;  %2113 = vmatprep.mubr.msk.bf16.mxu0 %vm1065_vm0, %v3342_v55 }
  0x8e   : > { %1372 = vmatmul.mubr.bf16.gmra.mrb[48].mxu1 %v3343_v21  ;;  %2114 = vmatmul.mubr.msk.bf16.vlgmr.msra.gmra.mrb[48].mxu0 %vm1065_vm0, %v3344_v38 }
  0x8f   : > { %1379 = vmatprep.mubr.bf16.mxu1 %v3345_v10  ;;  %2117 = vmatprep.mubr.msk.bf16.mxu0 %vm1065_vm0, %v3346_v32 }
  0x96   : > { %1380 = vmatmul.mubr.bf16.gmra.mrb[52].mxu1 %v3347_v4  ;;  %2118 = vmatmul.mubr.msk.bf16.gmra.mrb[52].mxu0 %vm1065_vm0, %v3349_v7 }
  0x97   : > { %1387 = vmatprep.mubr.bf16.mxu1 %v3350_v0  ;;  %2121 = vmatprep.mubr.msk.bf16.mxu0 %vm1065_vm0, %v3353_v30 }
  0x9e   : > { %1388 = vmatmul.mubr.bf16.gmra.mrb[56].mxu1 %v3354_v2  ;;  %2122 = vmatmul.mubr.msk.bf16.gmra.mrb[56].mxu0 %vm1065_vm0, %v3357_v45 }
  0x9f   : > { %1395 = vmatprep.mubr.bf16.mxu1 %v3360_v35  ;;  %2125 = vmatprep.mubr.msk.bf16.mxu0 %vm1065_vm0, %v3363_v34 }
  0xa6   : > { %1396 = vmatmul.mubr.bf16.gmra.mrb[60].mxu1 %v3364_v46  ;;  %2126 = vmatmul.mubr.msk.bf16.gmra.mrb[60].mxu0 %vm1065_vm0, %v3365_v61 }
  0xa7   : > { %1403 = vmatprep.mubr.bf16.mxu1 %v3368_v53  ;;  %2129 = vmatprep.mubr.msk.bf16.mxu0 %vm1065_vm0, %v3371_v31 }
  0xae   : > { %1404 = vmatmul.mubr.bf16.gmra.mrb[64].mxu1 %v3372_v9  ;;  %2130 = vmatmul.mubr.msk.bf16.gmra.mrb[64].mxu0 %vm1065_vm0, %v3375_v41 }
  0xaf   : > { %1411 = vmatprep.mubr.bf16.mxu1 %v3376_v58  ;;  %2133 = vmatprep.mubr.msk.bf16.mxu0 %vm1065_vm0, %v3377_v18 }
  0xb6   : > { %1412 = vmatmul.mubr.bf16.gmra.mrb[68].mxu1 %v3378_v42  ;;  %2134 = vmatmul.mubr.msk.bf16.gmra.mrb[68].mxu0 %vm1065_vm0, %v3380_v47 }
  0xb7   : > { %1419 = vmatprep.mubr.bf16.mxu1 %v3381_v48  ;;  %2137 = vmatprep.mubr.msk.bf16.mxu0 %vm1065_vm0, %v1791_v57 }
  0xbe   : > { %1420 = vmatmul.mubr.bf16.gmra.mrb[72].mxu1 %v3382_v56  ;;  %2138 = vmatmul.mubr.msk.bf16.gmra.mrb[72].mxu0 %vm1065_vm0, %v1796_v39 }
  0xbf   : > { %1427 = vmatprep.mubr.bf16.mxu1 %v1805_v60  ;;  %2141 = vmatprep.mubr.msk.bf16.mxu0 %vm1065_vm0, %v1801_v3 }
  0xc6   : > { %1428 = vmatmul.mubr.bf16.gmra.mrb[76].mxu1 %v1804_v5  ;;  %2142 = vmatmul.mubr.msk.bf16.gmra.mrb[76].mxu0 %vm1065_vm0, %v1806_v15 }
 0x101   : > { %v1949_v63 = vpop.f32.mrb[0].mxu1  ;;  %v1877_v8 = vpop.f32.mrb[0].mxu0 }
 0x102   : > { %v1950_v29 = vpop.f32.mrb[1].mxu1  ;;  %v1878_v16 = vpop.f32.mrb[1].mxu0 }
 0x103   : > { %v3087_v26 = vadd.f32 %v1950_v29, %v1949_v63  ;;  %v1952_v12 = vpop.f32.mrb[2].mxu1  ;;  %v1879_v57 = vadd.f32 %v1878_v16, %v1877_v8  ;;  %v1880_v13 = vpop.f32.mrb[2].mxu0 }
 0x104   : > { %v1953_v19 = vpop.f32.mrb[3].mxu1  ;;  %v1881_v33 = vpop.f32.mrb[3].mxu0 }
 0x105   : > { %v3089_v6 = vadd.f32 %v1953_v19, %v1952_v12  ;;  %v1882_v39 = vadd.f32 %v1881_v33, %v1880_v13  ;;  %v1149_v9 = vadd.f32 %v1879_v57, %v3106_v14 }
 0x107   : > { %v1152_v43 = vadd.f32 %v1882_v39, %v3106_v14 }
 0x109   : > { %v1955_v60 = vpop.f32.mrb[4].mxu1  ;;  %v1883_v27 = vpop.f32.mrb[4].mxu0 }
 0x10a   : > { %v1956_v3 = vpop.f32.mrb[5].mxu1  ;;  %v1884_v5 = vpop.f32.mrb[5].mxu0 }
 0x10b   : > { %v3091_v28 = vadd.f32 %v1956_v3, %v1955_v60  ;;  %v1958_v15 = vpop.f32.mrb[6].mxu1  ;;  %v1885_v54 = vadd.f32 %v1884_v5, %v1883_v27  ;;  %v1886_v49 = vpop.f32.mrb[6].mxu0 }
 0x10c   : > { %v1959_v44 = vpop.f32.mrb[7].mxu1  ;;  %v1887_v23 = vpop.f32.mrb[7].mxu0 }
 0x10d   : > { %v3093_v51 = vadd.f32 %v1959_v44, %v1958_v15  ;;  %v1888_v55 = vadd.f32 %v1887_v23, %v1886_v49  ;;  %v1157_v57 = vadd.f32 %v1885_v54, %v3106_v14 }
 0x10f   : > { %v1160_v39 = vadd.f32 %v1888_v55, %v3106_v14 }
 0x111   : > { %v1961_v21 = vpop.f32.mrb[8].mxu1  ;;  %v1889_v38 = vpop.f32.mrb[8].mxu0 }
 0x112   : > { %v1962_v10 = vpop.f32.mrb[9].mxu1  ;;  %v1890_v32 = vpop.f32.mrb[9].mxu0 }
 0x113   : > { %v3095_v4 = vadd.f32 %v1962_v10, %v1961_v21  ;;  %v1964_v22 = vpop.f32.mrb[10].mxu1  ;;  %v1891_v7 = vadd.f32 %v1890_v32, %v1889_v38  ;;  %v1892_v0 = vpop.f32.mrb[10].mxu0 }
 0x114   : > { %v1965_v36 = vpop.f32.mrb[11].mxu1  ;;  %v1893_v59 = vpop.f32.mrb[11].mxu0 }
 0x115   : > { %v3097_v30 = vadd.f32 %v1965_v36, %v1964_v22  ;;  %v1894_v2 = vadd.f32 %v1893_v59, %v1892_v0  ;;  %v1165_v54 = vadd.f32 %v1891_v7, %v3106_v14 }
 0x117   : > { %v1168_v55 = vadd.f32 %v1894_v2, %v3106_v14 }
 0x119   : > { %v1967_v50 = vpop.f32.mrb[12].mxu1  ;;  %v1895_v20 = vpop.f32.mrb[12].mxu0 }
 0x11a   : > { %v1968_v45 = vpop.f32.mrb[13].mxu1  ;;  %v1896_v52 = vpop.f32.mrb[13].mxu0 }
 0x11b   : > { %v3099_v11 = vadd.f32 %v1968_v45, %v1967_v50  ;;  %v1970_v35 = vpop.f32.mrb[14].mxu1  ;;  %v1897_v24 = vadd.f32 %v1896_v52, %v1895_v20  ;;  %v1898_v25 = vpop.f32.mrb[14].mxu0 }
 0x11c   : > { %v1971_v34 = vpop.f32.mrb[15].mxu1  ;;  %v1899_v46 = vpop.f32.mrb[15].mxu0 }
 0x11d   : > { %v3101_v61 = vadd.f32 %v1971_v34, %v1970_v35  ;;  %v1900_v1 = vadd.f32 %v1899_v46, %v1898_v25  ;;  %v1173_v7 = vadd.f32 %v1897_v24, %v3106_v14 }
 0x11f   : > { %v1176_v2 = vadd.f32 %v1900_v1, %v3106_v14 }
 0x121   : > { %v1989_v17 = vpop.f32.mrb[16].mxu1  ;;  %v1901_v53 = vpop.f32.mrb[16].mxu0 }
 0x122   : > { %v1990_v37 = vpop.f32.mrb[17].mxu1  ;;  %v1902_v31 = vpop.f32.mrb[17].mxu0 }
 0x123   : > { %v1991_v62 = vadd.f32 %v1990_v37, %v1989_v17  ;;  %v1992_v40 = vpop.f32.mrb[18].mxu1  ;;  %v1903_v41 = vadd.f32 %v1902_v31, %v1901_v53  ;;  %v1904_v58 = vpop.f32.mrb[18].mxu0 }
 0x124   : > { %v1993_v18 = vpop.f32.mrb[19].mxu1  ;;  %v1905_v42 = vpop.f32.mrb[19].mxu0 }
 0x125   : > { %v1994_v47 = vadd.f32 %v1993_v18, %v1992_v40  ;;  %v1906_v48 = vadd.f32 %v1905_v42, %v1904_v58  ;;  %v3110_v56 = vadd.f32 %v1991_v62, %v1149_v9  ;;  %v1181_v24 = vadd.f32 %v1903_v41, %v3106_v14 }
 0x127   : > { %v3112_v63 = vadd.f32 %v1994_v47, %v1152_v43  ;;  %v1184_v1 = vadd.f32 %v1906_v48, %v3106_v14 }
 0x129   : > { %v1995_v8 = vpop.f32.mrb[20].mxu1  ;;  %v1907_v29 = vpop.f32.mrb[20].mxu0 }
 0x12a   : > { %v1996_v16 = vpop.f32.mrb[21].mxu1  ;;  %v1908_v12 = vpop.f32.mrb[21].mxu0 }
 0x12b   : > { %v1997_v13 = vadd.f32 %v1996_v16, %v1995_v8  ;;  %v1998_v19 = vpop.f32.mrb[22].mxu1  ;;  %v1909_v33 = vadd.f32 %v1908_v12, %v1907_v29  ;;  %v1910_v60 = vpop.f32.mrb[22].mxu0 }
 0x12c   : > { %v1999_v27 = vpop.f32.mrb[23].mxu1  ;;  %v1911_v3 = vpop.f32.mrb[23].mxu0 }
 0x12d   : > { %v2000_v5 = vadd.f32 %v1999_v27, %v1998_v19  ;;  %v1912_v15 = vadd.f32 %v1911_v3, %v1910_v60  ;;  %v3116_v49 = vadd.f32 %v1997_v13, %v1157_v57 }
 0x12f   : > { %v3118_v44 = vadd.f32 %v2000_v5, %v1160_v39 }
 0x131   : > { %v2001_v23 = vpop.f32.mrb[24].mxu1  ;;  %v1913_v21 = vpop.f32.mrb[24].mxu0 }
 0x132   : > { %v2002_v38 = vpop.f32.mrb[25].mxu1  ;;  %v1914_v10 = vpop.f32.mrb[25].mxu0 }
 0x133   : > { %v2003_v32 = vadd.f32 %v2002_v38, %v2001_v23  ;;  %v2004_v22 = vpop.f32.mrb[26].mxu1  ;;  %v1915_v0 = vadd.f32 %v1914_v10, %v1913_v21  ;;  %v1916_v36 = vpop.f32.mrb[26].mxu0 }
 0x134   : > { %v2005_v59 = vpop.f32.mrb[27].mxu1  ;;  %v1917_v50 = vpop.f32.mrb[27].mxu0 }
 0x135   : > { %v2006_v20 = vadd.f32 %v2005_v59, %v2004_v22  ;;  %v1918_v45 = vadd.f32 %v1917_v50, %v1916_v36  ;;  %v3122_v52 = vadd.f32 %v2003_v32, %v1165_v54  ;;  %v1189_v54 = vadd.f32 %v1909_v33, %v3106_v14 }
 0x137   : > { %v3124_v35 = vadd.f32 %v2006_v20, %v1168_v55  ;;  %v1192_v55 = vadd.f32 %v1912_v15, %v3106_v14 }
 0x139   : > { %v2007_v25 = vpop.f32.mrb[28].mxu1  ;;  %v1919_v34 = vpop.f32.mrb[28].mxu0 }
 0x13a   : > { %v2008_v46 = vpop.f32.mrb[29].mxu1  ;;  %v1920_v17 = vpop.f32.mrb[29].mxu0 }
 0x13b   : > { %v2009_v53 = vadd.f32 %v2008_v46, %v2007_v25  ;;  %v2010_v37 = vpop.f32.mrb[30].mxu1  ;;  %v1921_v31 = vadd.f32 %v1920_v17, %v1919_v34  ;;  %v1922_v9 = vpop.f32.mrb[30].mxu0 }
 0x13c   : > { %v2011_v62 = vpop.f32.mrb[31].mxu1  ;;  %v1923_v40 = vpop.f32.mrb[31].mxu0 }
 0x13d   : > { %v2012_v58 = vadd.f32 %v2011_v62, %v2010_v37  ;;  %v1924_v18 = vadd.f32 %v1923_v40, %v1922_v9  ;;  %v3128_v42 = vadd.f32 %v2009_v53, %v1173_v7  ;;  %v1197_v37 = vadd.f32 %v1915_v0, %v3106_v14 }
 0x13f   : > { %v3130_v43 = vadd.f32 %v2012_v58, %v1176_v2 }
 0x141   : > { %v2013_v47 = vpop.f32.mrb[32].mxu1  ;;  %v1925_v8 = vpop.f32.mrb[32].mxu0 }
 0x142   : > { %v2014_v29 = vpop.f32.mrb[33].mxu1  ;;  %v1926_v16 = vpop.f32.mrb[33].mxu0 }
 0x143   : > { %v2015_v12 = vadd.f32 %v2014_v29, %v2013_v47  ;;  %v2016_v57 = vpop.f32.mrb[34].mxu1  ;;  %v3133_v13 = vadd.f32 %v1926_v16, %v1925_v8  ;;  %v1928_v19 = vpop.f32.mrb[34].mxu0  ;;  %v1200_v47 = vadd.f32 %v1918_v45, %v3106_v14 }
 0x144   : > { %v2017_v60 = vpop.f32.mrb[35].mxu1  ;;  %v1929_v27 = vpop.f32.mrb[35].mxu0 }
 0x145   : > { %v2018_v3 = vadd.f32 %v2017_v60, %v2016_v57  ;;  %v3136_v39 = vadd.f32 %v1929_v27, %v1928_v19  ;;  %v3138_v5 = vadd.f32 %v2015_v12, %v1181_v24  ;;  %v1205_v60 = vadd.f32 %v1921_v31, %v3106_v14 }
 0x147   : > { %v3140_v23 = vadd.f32 %v2018_v3, %v1184_v1 }
 0x149   : > { %v2019_v21 = vpop.f32.mrb[36].mxu1  ;;  %v1931_v38 = vpop.f32.mrb[36].mxu0 }
 0x14a   : > { %v2020_v10 = vpop.f32.mrb[37].mxu1  ;;  %v1932_v41 = vpop.f32.mrb[37].mxu0 }
 0x14b   : > { %v2021_v32 = vadd.f32 %v2020_v10, %v2019_v21  ;;  %v2022_v22 = vpop.f32.mrb[38].mxu1  ;;  %v3143_v36 = vadd.f32 %v1932_v41, %v1931_v38  ;;  %v1934_v59 = vpop.f32.mrb[38].mxu0  ;;  %v1208_v10 = vadd.f32 %v1924_v18, %v3106_v14 }
 0x14c   : > { %v2023_v50 = vpop.f32.mrb[39].mxu1  ;;  %v1935_v48 = vpop.f32.mrb[39].mxu0 }
 0x14d   : > { %v2024_v20 = vadd.f32 %v2023_v50, %v2022_v22  ;;  %v3146_v25 = vadd.f32 %v1935_v48, %v1934_v59  ;;  %v3148_v34 = vadd.f32 %v2021_v32, %v1189_v54 }
 0x14f   : > { %v3150_v46 = vadd.f32 %v2024_v20, %v1192_v55  ;;  %v1213_v20 = vadd.f32 %v3133_v13, %v3106_v14 }
 0x151   : > { %v2025_v17 = vpop.f32.mrb[40].mxu1  ;;  %v1937_v7 = vpop.f32.mrb[40].mxu0 }
 0x152   : > { %v2026_v53 = vpop.f32.mrb[41].mxu1  ;;  %v1938_v33 = vpop.f32.mrb[41].mxu0 }
 0x153   : > { %v2027_v9 = vadd.f32 %v2026_v53, %v2025_v17  ;;  %v2028_v62 = vpop.f32.mrb[42].mxu1  ;;  %v3153_v40 = vadd.f32 %v1938_v33, %v1937_v7  ;;  %v1940_v2 = vpop.f32.mrb[42].mxu0 }
 0x154   : > { %v2029_v58 = vpop.f32.mrb[43].mxu1  ;;  %v1941_v15 = vpop.f32.mrb[43].mxu0 }
 0x155   : > { %v2030_v8 = vadd.f32 %v2029_v58, %v2028_v62  ;;  %v3156_v29 = vadd.f32 %v1941_v15, %v1940_v2  ;;  %v3158_v16 = vadd.f32 %v2027_v9, %v1197_v37 }
 0x157   : > { %v3160_v24 = vadd.f32 %v2030_v8, %v1200_v47 }
 0x159   : > { %v2031_v12 = vpop.f32.mrb[44].mxu1  ;;  %v1943_v57 = vpop.f32.mrb[44].mxu0 }
 0x15a   : > { %v2032_v0 = vpop.f32.mrb[45].mxu1  ;;  %v1944_v19 = vpop.f32.mrb[45].mxu0 }
 0x15b   : > { %v2033_v27 = vadd.f32 %v2032_v0, %v2031_v12  ;;  %v2034_v1 = vpop.f32.mrb[46].mxu1  ;;  %v3163_v3 = vadd.f32 %v1944_v19, %v1943_v57  ;;  %v1946_v21 = vpop.f32.mrb[46].mxu0 }
 0x15c   : > { %v2035_v45 = vpop.f32.mrb[47].mxu1  ;;  %v1947_v38 = vpop.f32.mrb[47].mxu0 }
 0x15d   : > { %v2036_v41 = vadd.f32 %v2035_v45, %v2034_v1  ;;  %v3166_v54 = vadd.f32 %v1947_v38, %v1946_v21  ;;  %v3168_v32 = vadd.f32 %v2033_v27, %v1205_v60  ;;  %v1224_v21 = vadd.f32 %v3146_v25, %v3106_v14 }
 0x15f   : > { %v3170_v22 = vadd.f32 %v2036_v41, %v1208_v10 }
 0x161   : > { %v2037_v59 = vpop.f32.mrb[48].mxu1  ;;  %v2115_v50 = vpop.f32.mrb[48].mxu0 }
 0x162   : > { %v1479_v31 = vadd.f32 %v2115_v50, %v3116_v49  ;;  %v2038_v48 = vpop.f32.mrb[49].mxu1  ;;  %v1470_v55 = vpop.f32.mrb[49].mxu0  ;;  %v1216_v49 = vadd.f32 %v3136_v39, %v3106_v14 }
 0x163   : > { %v2039_v18 = vadd.f32 %v2038_v48, %v2037_v59  ;;  %v1471_v17 = vadd.f32 %v1470_v55, %v3110_v56  ;;  %v2040_v7 = vpop.f32.mrb[50].mxu1  ;;  %v2116_v53 = vpop.f32.mrb[50].mxu0 }
 0x164   : > { %v1599_v33 = vmax.f32 %v1479_v31, 0.0  ;;  %v1482_v13 = vadd.f32 %v2116_v53, %v3118_v44  ;;  %v2041_v37 = vpop.f32.mrb[51].mxu1  ;;  %v1473_v9 = vpop.f32.mrb[51].mxu0 }
 0x165   : > { %v1597_v62 = vmax.f32 %v1471_v17, 0.0  ;;  %v2042_v2 = vadd.f32 %v2041_v37, %v2040_v7  ;;  %v1474_v58 = vadd.f32 %v1473_v9, %v3112_v63  ;;  %v3186_v15 = vadd.f32 %v2039_v18, %v1213_v20 }
 0x166   : > { %1631 = vst [vmem:[%s3179_s22 + $0x10] sm:$0xff] %v1599_v33  ;;  %v1600_v56 = vmax.f32 %v1482_v13, 0.0  ;;  %v1221_v63 = vadd.f32 %v3143_v36, %v3106_v14  ;;  %v1229_v17 = vadd.f32 %v3153_v40, %v3106_v14  ;;  %v1232_v33 = vadd.f32 %v3156_v29, %v3106_v14 }
 0x167   : > { %1629 = vst [vmem:[%s3179_s22] sm:$0xff] %v1597_v62  ;;  %v1598_v47 = vmax.f32 %v1474_v58, 0.0  ;;  %v3190_v8 = vadd.f32 %v2042_v2, %v1216_v49 }
 0x168   : > { %1632 = vst [vmem:[%s3179_s22 + $0x18] sm:$0xff] %v1600_v56 }
 0x169   : > { %1630 = vst [vmem:[%s3179_s22 + $0x8] sm:$0xff] %v1598_v47  ;;  %v2043_v39 = vpop.f32.mrb[52].mxu1  ;;  %v2119_v12 = vpop.f32.mrb[52].mxu0 }
 0x16a   : > { %v1495_v44 = vadd.f32 %v2119_v12, %v3128_v42  ;;  %v2044_v57 = vpop.f32.mrb[53].mxu1  ;;  %v1486_v0 = vpop.f32.mrb[53].mxu0 }
 0x16b   : > { %v2045_v19 = vadd.f32 %v2044_v57, %v2043_v39  ;;  %v1487_v60 = vadd.f32 %v1486_v0, %v3122_v52  ;;  %v2046_v27 = vpop.f32.mrb[54].mxu1  ;;  %v2120_v1 = vpop.f32.mrb[54].mxu0 }
 0x16c   : > { %v1603_v45 = vmax.f32 %v1495_v44, 0.0  ;;  %v1498_v42 = vadd.f32 %v2120_v1, %v3130_v43  ;;  %v2047_v38 = vpop.f32.mrb[55].mxu1  ;;  %v1489_v10 = vpop.f32.mrb[55].mxu0 }
 0x16d   : > { %v1601_v41 = vmax.f32 %v1487_v60, 0.0  ;;  %v2048_v59 = vadd.f32 %v2047_v38, %v2046_v27  ;;  %v1490_v36 = vadd.f32 %v1489_v10, %v3124_v35  ;;  %v1382_v50 = vadd.f32 %v2045_v19, %v1221_v63 }
 0x16e   : > { %1635 = vst [vmem:[%s3179_s22 + $0x30] sm:$0xff] %v1603_v45  ;;  %v1604_v31 = vmax.f32 %v1498_v42, 0.0  ;;  %v1240_v60 = vadd.f32 %v3166_v54, %v3106_v14 }
 0x16f   : > { %1633 = vst [vmem:[%s3179_s22 + $0x20] sm:$0xff] %v1601_v41  ;;  %v1602_v52 = vmax.f32 %v1490_v36, 0.0  ;;  %v3204_v48 = vadd.f32 %v2048_v59, %v1224_v21 }
 0x170   : > { %1636 = vst [vmem:[%s3179_s22 + $0x38] sm:$0xff] %v1604_v31 }
 0x171   : > { %1634 = vst [vmem:[%s3179_s22 + $0x28] sm:$0xff] %v1602_v52  ;;  %v2049_v55 = vpop.f32.mrb[56].mxu1  ;;  %v2123_v25 = vpop.f32.mrb[56].mxu0  ;;  %v1245_v52 = vadd.f32 %v3087_v26, %v3106_v14 }
 0x172   : > { %v1511_v20 = vadd.f32 %v2123_v25, %v3148_v34  ;;  %v2050_v43 = vpop.f32.mrb[57].mxu1  ;;  %v1502_v18 = vpop.f32.mrb[57].mxu0 }
 0x173   : > { %v2051_v35 = vadd.f32 %v2050_v43, %v2049_v55  ;;  %v1503_v7 = vadd.f32 %v1502_v18, %v3138_v5  ;;  %v2052_v53 = vpop.f32.mrb[58].mxu1  ;;  %v2124_v49 = vpop.f32.mrb[58].mxu0  ;;  %v1248_v43 = vadd.f32 %v3089_v6, %v3106_v14 }
 0x174   : > { %v1607_v13 = vmax.f32 %v1511_v20, 0.0  ;;  %v1514_v34 = vadd.f32 %v2124_v49, %v3150_v46  ;;  %v2053_v37 = vpop.f32.mrb[59].mxu1  ;;  %v1505_v9 = vpop.f32.mrb[59].mxu0 }
 0x175   : > { %v1605_v62 = vmax.f32 %v1503_v7, 0.0  ;;  %v2054_v2 = vadd.f32 %v2053_v37, %v2052_v53  ;;  %v1506_v40 = vadd.f32 %v1505_v9, %v3140_v23  ;;  %v3216_v58 = vadd.f32 %v2051_v35, %v1229_v17 }
 0x176   : > { %1639 = vst [vmem:[%s3179_s22 + $0x50] sm:$0xff] %v1607_v13  ;;  %v1608_v5 = vmax.f32 %v1514_v34, 0.0  ;;  %v1237_v23 = vadd.f32 %v3163_v3, %v3106_v14 }
 0x177   : > { %1637 = vst [vmem:[%s3179_s22 + $0x40] sm:$0xff] %v1605_v62  ;;  %v1606_v56 = vmax.f32 %v1506_v40, 0.0  ;;  %v3220_v47 = vadd.f32 %v2054_v2, %v1232_v33  ;;  %v1253_v62 = vadd.f32 %v3091_v28, %v3106_v14 }
 0x178   : > { %1640 = vst [vmem:[%s3179_s22 + $0x58] sm:$0xff] %v1608_v5 }
 0x179   : > { %1638 = vst [vmem:[%s3179_s22 + $0x48] sm:$0xff] %v1606_v56  ;;  %v2055_v29 = vpop.f32.mrb[60].mxu1  ;;  %v2127_v39 = vpop.f32.mrb[60].mxu0  ;;  %v1256_v56 = vadd.f32 %v3093_v51, %v3106_v14 }
 0x17a   : > { %v1527_v46 = vadd.f32 %v2127_v39, %v3168_v32  ;;  %v2056_v12 = vpop.f32.mrb[61].mxu1  ;;  %v1518_v44 = vpop.f32.mrb[61].mxu0 }
 0x17b   : > { %v2057_v57 = vadd.f32 %v2056_v12, %v2055_v29  ;;  %v1519_v0 = vadd.f32 %v1518_v44, %v3158_v16  ;;  %v2058_v63 = vpop.f32.mrb[62].mxu1  ;;  %v2128_v19 = vpop.f32.mrb[62].mxu0 }
 0x17c   : > { %v1611_v27 = vmax.f32 %v1527_v46, 0.0  ;;  %v1530_v32 = vadd.f32 %v2128_v19, %v3170_v22  ;;  %v2059_v1 = vpop.f32.mrb[63].mxu1  ;;  %v1521_v21 = vpop.f32.mrb[63].mxu0 }
 0x17d   : > { %v1609_v45 = vmax.f32 %v1519_v0, 0.0  ;;  %v2060_v42 = vadd.f32 %v2059_v1, %v2058_v63  ;;  %v1522_v3 = vadd.f32 %v1521_v21, %v3160_v24  ;;  %v1398_v38 = vadd.f32 %v2057_v57, %v1237_v23 }
 0x17e   : > { %1643 = vst [vmem:[%s3179_s22 + $0x70] sm:$0xff] %v1611_v27  ;;  %v1612_v10 = vmax.f32 %v1530_v32, 0.0  ;;  %v1261_v1 = vadd.f32 %v3095_v4, %v3106_v14 }
 0x17f   : > { %1641 = vst [vmem:[%s3179_s22 + $0x60] sm:$0xff] %v1609_v45  ;;  %v1610_v16 = vmax.f32 %v1522_v3, 0.0  ;;  %v1401_v41 = vadd.f32 %v2060_v42, %v1240_v60  ;;  %v1264_v3 = vadd.f32 %v3097_v30, %v3106_v14 }
 0x180   : > { %1644 = vst [vmem:[%s3179_s22 + $0x78] sm:$0xff] %v1612_v10 }
 0x181   : > { %1642 = vst [vmem:[%s3179_s22 + $0x68] sm:$0xff] %v1610_v16  ;;  %v2061_v59 = vpop.f32.mrb[64].mxu1  ;;  %v2131_v36 = vpop.f32.mrb[64].mxu0 }
 0x182   : > { %v1543_v54 = vadd.f32 %v2131_v36, %v1382_v50  ;;  %v2062_v31 = vpop.f32.mrb[65].mxu1  ;;  %v1534_v22 = vpop.f32.mrb[65].mxu0 }
 0x183   : > { %v2063_v55 = vadd.f32 %v2062_v31, %v2061_v59  ;;  %v1535_v24 = vadd.f32 %v1534_v22, %v3186_v15  ;;  %v2064_v25 = vpop.f32.mrb[66].mxu1  ;;  %v2132_v20 = vpop.f32.mrb[66].mxu0 }
 0x184   : > { %v1615_v18 = vmax.f32 %v1543_v54, 0.0  ;;  %v1546_v50 = vadd.f32 %v2132_v20, %v3204_v48  ;;  %v2065_v17 = vpop.f32.mrb[67].mxu1  ;;  %v1537_v35 = vpop.f32.mrb[67].mxu0  ;;  %v1269_v20 = vadd.f32 %v3099_v11, %v3106_v14 }
 0x185   : > { %v1613_v7 = vmax.f32 %v1535_v24, 0.0  ;;  %v2066_v53 = vadd.f32 %v2065_v17, %v2064_v25  ;;  %v1538_v26 = vadd.f32 %v1537_v35, %v3190_v8  ;;  %v1406_v49 = vadd.f32 %v2063_v55, %v1245_v52 }
 0x186   : > { %1647 = vst [vmem:[%s3179_s22 + $0x90] sm:$0xff] %v1615_v18  ;;  %v1616_v33 = vmax.f32 %v1546_v50, 0.0  ;;  %v1272_v35 = vadd.f32 %v3101_v61, %v3106_v14 }
 0x187   : > { %1645 = vst [vmem:[%s3179_s22 + $0x80] sm:$0xff] %v1613_v7  ;;  %v1614_v15 = vmax.f32 %v1538_v26, 0.0  ;;  %v1409_v13 = vadd.f32 %v2066_v53, %v1248_v43 }
 0x188   : > { %1648 = vst [vmem:[%s3179_s22 + $0x98] sm:$0xff] %v1616_v33 }
 0x189   : > { %1646 = vst [vmem:[%s3179_s22 + $0x88] sm:$0xff] %v1614_v15  ;;  %v2067_v34 = vpop.f32.mrb[68].mxu1  ;;  %v2135_v37 = vpop.f32.mrb[68].mxu0 }
 0x18a   : > { %v1559_v6 = vadd.f32 %v2135_v37, %v1398_v38  ;;  %v2068_v9 = vpop.f32.mrb[69].mxu1  ;;  %v1550_v48 = vpop.f32.mrb[69].mxu0 }
 0x18b   : > { %v2069_v2 = vadd.f32 %v2068_v9, %v2067_v34  ;;  %v1551_v8 = vadd.f32 %v1550_v48, %v3216_v58  ;;  %v2070_v40 = vpop.f32.mrb[70].mxu1  ;;  %v2136_v5 = vpop.f32.mrb[70].mxu0 }
 0x18c   : > { %v1619_v29 = vmax.f32 %v1559_v6, 0.0  ;;  %v1562_v39 = vadd.f32 %v2136_v5, %v1401_v41  ;;  %v2071_v46 = vpop.f32.mrb[71].mxu1  ;;  %v1553_v12 = vpop.f32.mrb[71].mxu0 }
 0x18d   : > { %v1617_v44 = vmax.f32 %v1551_v8, 0.0  ;;  %v2072_v23 = vadd.f32 %v2071_v46, %v2070_v40  ;;  %v1554_v57 = vadd.f32 %v1553_v12, %v3220_v47  ;;  %v1414_v28 = vadd.f32 %v2069_v2, %v1253_v62 }
 0x18e   : > { %1651 = vst [vmem:[%s3179_s22 + $0xb0] sm:$0xff] %v1619_v29  ;;  %v1620_v0 = vmax.f32 %v1562_v39, 0.0 }
 0x18f   : > { %1649 = vst [vmem:[%s3179_s22 + $0xa0] sm:$0xff] %v1617_v44  ;;  %v1618_v58 = vmax.f32 %v1554_v57, 0.0  ;;  %v1417_v63 = vadd.f32 %v2072_v23, %v1256_v56 }
 0x190   : > { %1652 = vst [vmem:[%s3179_s22 + $0xb8] sm:$0xff] %v1620_v0 }
 0x191   : > { %1650 = vst [vmem:[%s3179_s22 + $0xa8] sm:$0xff] %v1618_v58  ;;  %v2073_v19 = vpop.f32.mrb[72].mxu1  ;;  %v2139_v60 = vpop.f32.mrb[72].mxu0 }
 0x192   : > { %v1575_v27 = vadd.f32 %v2139_v60, %v1414_v28  ;;  %v2074_v51 = vpop.f32.mrb[73].mxu1  ;;  %v1566_v32 = vpop.f32.mrb[73].mxu0 }
 0x193   : > { %v2075_v21 = vadd.f32 %v2074_v51, %v2073_v19  ;;  %v1567_v47 = vadd.f32 %v1566_v32, %v1406_v49  ;;  %v2076_v45 = vpop.f32.mrb[74].mxu1  ;;  %v2140_v42 = vpop.f32.mrb[74].mxu0 }
 0x194   : > { %v1623_v38 = vmax.f32 %v1575_v27, 0.0  ;;  %v1578_v10 = vadd.f32 %v2140_v42, %v1417_v63  ;;  %v2077_v16 = vpop.f32.mrb[75].mxu1  ;;  %v1569_v41 = vpop.f32.mrb[75].mxu0 }
 0x195   : > { %v1621_v59 = vmax.f32 %v1567_v47, 0.0  ;;  %v2078_v36 = vadd.f32 %v2077_v16, %v2076_v45  ;;  %v1570_v54 = vadd.f32 %v1569_v41, %v1409_v13  ;;  %v1422_v31 = vadd.f32 %v2075_v21, %v1261_v1 }
 0x196   : > { %1655 = vst [vmem:[%s3179_s22 + $0xd0] sm:$0xff] %v1623_v38  ;;  %v1624_v4 = vmax.f32 %v1578_v10, 0.0 }
 0x197   : > { %1653 = vst [vmem:[%s3179_s22 + $0xc0] sm:$0xff] %v1621_v59  ;;  %v1622_v22 = vmax.f32 %v1570_v54, 0.0  ;;  %v1425_v52 = vadd.f32 %v2078_v36, %v1264_v3 }
 0x198   : > { %1656 = vst [vmem:[%s3179_s22 + $0xd8] sm:$0xff] %v1624_v4 }
 0x199   : > { %1654 = vst [vmem:[%s3179_s22 + $0xc8] sm:$0xff] %v1622_v22  ;;  %v2079_v55 = vpop.f32.mrb[76].mxu1  ;;  %v2143_v24 = vpop.f32.mrb[76].mxu0 }
 0x19a   : > { %v2080_v25 = vpop.f32.mrb[77].mxu1  ;;  %v1582_v30 = vpop.f32.mrb[77].mxu0 }
 0x19b   : > { %v2081_v43 = vadd.f32 %v2080_v25, %v2079_v55  ;;  %v1583_v18 = vadd.f32 %v1582_v30, %v1422_v31  ;;  %v2082_v50 = vpop.f32.mrb[78].mxu1  ;;  %v2144_v17 = vpop.f32.mrb[78].mxu0 }
 0x19c   : > { %v2083_v7 = vpop.f32.mrb[79].mxu1  ;;  %v1585_v53 = vpop.f32.mrb[79].mxu0 }
 0x19d   : > { %v1430_v26 = vadd.f32 %v2081_v43, %v1269_v20  ;;  %v1625_v49 = vmax.f32 %v1583_v18, 0.0  ;;  %v2084_v33 = vadd.f32 %v2083_v7, %v2082_v50  ;;  %v1586_v15 = vadd.f32 %v1585_v53, %v1425_v52 }
 0x19f   : > { %v1591_v13 = vadd.f32 %v2143_v24, %v1430_v26  ;;  %1657 = vst [vmem:[%s3179_s22 + $0xe0] sm:$0xff] %v1625_v49  ;;  %v1433_v34 = vadd.f32 %v2084_v33, %v1272_v35  ;;  %v1626_v11 = vmax.f32 %v1586_v15, 0.0 }
 0x1a1   : > { %v1627_v37 = vmax.f32 %v1591_v13, 0.0  ;;  %v1594_v6 = vadd.f32 %v2144_v17, %v1433_v34  ;;  %1658 = vst [vmem:[%s3179_s22 + $0xe8] sm:$0xff] %v1626_v11 }
 0x1a3   : > { %1659 = vst [vmem:[%s3179_s22 + $0xf0] sm:$0xff] %v1627_v37  ;;  %v1628_v9 = vmax.f32 %v1594_v6, 0.0 }
 0x1a5   : > { %1660 = vst [vmem:[%s3179_s22 + $0xf8] sm:$0xff] %v1628_v9 }
 0x1a6 PF: > { %s13_s12 = sadd.s32 1, %s2213_s12  }
 0x1a7   : > { %p10_p4 = scmp.ge.s32.totalorder %s13_s12, 4  }
 0x1a9   :  { %12 = sbr.rel (!%p10_p4) target bundleno = 1 (0x1), region = 62 }

// kernel: decoder_forward.9
= control target key start
LH: loop header
LB: loop body
LE: loop exit
PB: predicated region body
PF: predicated region fallthrough
CT: control target
= control target key end

     0   :  { %s2210_s12 = smov 0   ;;  %s2760_s0 = inlined_call_operand.vmem [shape: bf16[2048,288], index: 0, kind: input, shape index: {}]   ;;  %s2761_s1 = inlined_call_operand.vmem [shape: bf16[288,12], index: 1, kind: input, shape index: {}]   ;;  %s2762_s2 = inlined_call_operand.vmem [shape: f32[1,12], index: 2, kind: input, shape index: {}]   ;;  %s2763_s3 = inlined_call_operand.vmem [shape: f32[2048,12], index: 3, kind: output, shape index: {}]  }
   0x1 LB: > { %s1733_s13 = sadd.s32 4294967295, %s2187_s12   ;;  %p1737_p0 = scmp.ge.s32.totalorder %s2187_s12, 1  ;;  %s2187_s12 = sphi %s2210_s12, %s13_s12  }
   0x2   : > { %p139_p1 = scmp.lt.s32.totalorder %s2187_s12, 5 }
   0x4   : > { %p140_p2 = pnand %p1737_p0, %p139_p1 }
   0x5   : > { %v2035_v0 = vld [vmem:[%s2761_s1] sm:$0xff] (!%p140_p2)   ;;  %v2189_v1 = vmov (!%p140_p2), 0   ;;  %s1738_s16 = sshll.u32 (!%p140_p2), %s1733_s13, 6  ;;  %v2036_v2 = vld [vmem:[%s2761_s1 + $0x8] sm:$0xff] (!%p140_p2)   ;;  %v2037_v3 = vld [vmem:[%s2761_s1 + $0x10] sm:$0xff] (!%p140_p2)   ;;  %vm937_vm0 = vcmask (!%p140_p2), 261120  }
   0x6   : > { %143 = sbr.rel (%p140_p2) target bundleno = 473 (0x1d9), region = 32  ;;  %1034 = vmatprep.subr.bf16.mxu0 (!%p140_p2), %v2189_v1  ;;  %1993 = vmatprep.subr.bf16.mxu1 (!%p140_p2), %v2189_v1  ;;  %p165_p3 = scmp.lt.s32.totalorder (!%p140_p2), %s1738_s16, 255  ;;  %v2038_v4 = vld [vmem:[%s2761_s1 + $0x18] sm:$0xff] (!%p140_p2)   ;;  %v2039_v5 = vld [vmem:[%s2761_s1 + $0x20] sm:$0xff] (!%p140_p2)   ;;  %v2040_v7 = vld [vmem:[%s2761_s1 + $0x28] sm:$0xff] (!%p140_p2)   ;;  %vm1612_vm1 = vcmask (!%p140_p2), 97280  }
   0x7   : > { %1035 = vmatpush1.bf16.msra.mxu0 (!%p140_p2), %v2035_v0  ;;  %2009 = vmatpush1.bf16.msra.mxu1 (!%p140_p2), %v2035_v0  ;;  %v2041_v9 = vld [vmem:[%s2761_s1 + $0x30] sm:$0xff] (!%p140_p2)   ;;  %v2042_v10 = vld [vmem:[%s2761_s1 + $0x38] sm:$0xff] (!%p140_p2)   ;;  %v2043_v11 = vld [vmem:[%s2761_s1 + $0x40] sm:$0xff] (!%p140_p2)  }
   0x8   : > { %1036 = vmatprep.subr.bf16.mxu0 (!%p140_p2), %v2189_v1  ;;  %1994 = vmatprep.subr.bf16.mxu1 (!%p140_p2), %v2189_v1  ;;  %v2044_v12 = vld [vmem:[%s2761_s1 + $0x48] sm:$0xff] (!%p140_p2)   ;;  %v2045_v13 = vld [vmem:[%s2761_s1 + $0x50] sm:$0xff] (!%p140_p2)   ;;  %v2046_v14 = vld [vmem:[%s2761_s1 + $0x58] sm:$0xff] (!%p140_p2)  }
   0x9   : > { %v2047_v15 = vld [vmem:[%s2761_s1 + $0x60] sm:$0xff] (!%p140_p2)   ;;  %v2048_v16 = vld [vmem:[%s2761_s1 + $0x68] sm:$0xff] (!%p140_p2)   ;;  %v2049_v17 = vld [vmem:[%s2761_s1 + $0x70] sm:$0xff] (!%p140_p2)  }
   0xa   : > { %v2050_v18 = vld [vmem:[%s2761_s1 + $0x78] sm:$0xff] (!%p140_p2)   ;;  %v2057_v19 = vld [vmem:[%s2761_s1 + $0x80] sm:$0xff] (!%p140_p2)   ;;  %v2082_v24 = vld [vmem:[%s2761_s1 + $0x88] sm:$0xff] (!%p140_p2)  }
   0xb   : > { %1037 = vmatpush1.bf16.msra.mxu0 (!%p140_p2), %v2036_v2  ;;  %2010 = vmatpush1.bf16.msra.mxu1 (!%p140_p2), %v2036_v2 }
   0xc   : > { %1038 = vmatprep.subr.bf16.mxu0 (!%p140_p2), %v2189_v1  ;;  %1995 = vmatprep.subr.bf16.mxu1 (!%p140_p2), %v2189_v1 }
   0xd   : > { %s2765_s16 = smov (!%p165_p3, %s1738_s16), 255 }
   0xe   : > { %s2025_s23 = smul.u32 12, %s2765_s16  ;;  %s1741_s5 = sshll.u32 %s2765_s16, 3 }
   0xf   : > { %1039 = vmatpush1.bf16.msra.mxu0 %v2037_v3  ;;  %2011 = vmatpush1.bf16.msra.mxu1 %v2037_v3  ;;  %s2514_s8 = scalar_lea.vmem %s2763_s3, %s1741_s5 }
  0x10   : > { %1040 = vmatprep.subr.bf16.mxu0 %v2189_v1  ;;  %1996 = vmatprep.subr.bf16.mxu1 %v2189_v1  ;;  %s2247_s28 = scalar_lea.vmem %s2760_s0, %s2025_s23 }
  0x11   : > { %v2053_v6 = vld [vmem:[%s2247_s28 + $0x4] ss:$12 sps:$4 sm:$0xff]   ;;  %v2051_v20 = vld [vmem:[%s2247_s28] ss:$12 sps:$4 sm:$0xff]   ;;  %v2058_v22 = vld [vmem:[%s2247_s28 + $0x1c] ss:$12 sps:$4 sm:$0xff]  }
  0x12   : > { %v2056_v8 = vld [vmem:[%s2247_s28 + $0x244] ss:$12 sps:$4 sm:$0xff]   ;;  %1066 = vmatprep.mubr.bf16.mxu0 %v2053_v6  ;;  %v2054_v21 = vld [vmem:[%s2247_s28 + $0x240] ss:$12 sps:$4 sm:$0xff]   ;;  %v2060_v23 = vld [vmem:[%s2247_s28 + $0x25c] ss:$12 sps:$4 sm:$0xff]  }
  0x13   : > { %1041 = vmatpush1.bf16.msra.mxu0 %v2038_v4  ;;  %2012 = vmatpush1.bf16.msra.mxu1 %v2038_v4  ;;  %v2062_v25 = vld [vmem:[%s2247_s28 + $0x18] ss:$12 sps:$4 sm:$0xff]   ;;  %v2064_v27 = vld [vmem:[%s2247_s28 + $0x34] ss:$12 sps:$4 sm:$0xff]   ;;  %v2068_v29 = vld [vmem:[%s2247_s28 + $0x30] ss:$12 sps:$4 sm:$0xff]  }
  0x14   : > { %1042 = vmatprep.subr.bf16.mxu0 %v2189_v1  ;;  %1997 = vmatprep.subr.bf16.mxu1 %v2189_v1  ;;  %v2063_v26 = vld [vmem:[%s2247_s28 + $0x258] ss:$12 sps:$4 sm:$0xff]   ;;  %v2066_v28 = vld [vmem:[%s2247_s28 + $0x274] ss:$12 sps:$4 sm:$0xff]   ;;  %v2069_v30 = vld [vmem:[%s2247_s28 + $0x270] ss:$12 sps:$4 sm:$0xff]  }
  0x15   : > { %1258 = vmatprep.mubr.bf16.mxu1 %v2056_v8  ;;  %v2070_v31 = vld [vmem:[%s2247_s28 + $0x4c] ss:$12 sps:$4 sm:$0xff]   ;;  %v2074_v33 = vld [vmem:[%s2247_s28 + $0x48] ss:$12 sps:$4 sm:$0xff]   ;;  %v2076_v35 = vld [vmem:[%s2247_s28 + $0x64] ss:$12 sps:$4 sm:$0xff]  }
  0x16   : > { %v2072_v32 = vld [vmem:[%s2247_s28 + $0x28c] ss:$12 sps:$4 sm:$0xff]   ;;  %v2075_v34 = vld [vmem:[%s2247_s28 + $0x288] ss:$12 sps:$4 sm:$0xff]   ;;  %v2078_v36 = vld [vmem:[%s2247_s28 + $0x2a4] ss:$12 sps:$4 sm:$0xff]  }
  0x17   : > { %1043 = vmatpush1.bf16.msra.mxu0 %v2039_v5  ;;  %2013 = vmatpush1.bf16.msra.mxu1 %v2039_v5  ;;  %v2080_v37 = vld [vmem:[%s2247_s28 + $0x60] ss:$12 sps:$4 sm:$0xff]   ;;  %v2083_v39 = vld [vmem:[%s2247_s28 + $0x7c] ss:$12 sps:$4 sm:$0xff]   ;;  %v2087_v41 = vld [vmem:[%s2247_s28 + $0x78] ss:$12 sps:$4 sm:$0xff]  }
  0x18   : > { %1044 = vmatprep.subr.bf16.mxu0 %v2189_v1  ;;  %1998 = vmatprep.subr.bf16.mxu1 %v2189_v1  ;;  %v2081_v38 = vld [vmem:[%s2247_s28 + $0x2a0] ss:$12 sps:$4 sm:$0xff]   ;;  %v2085_v40 = vld [vmem:[%s2247_s28 + $0x2bc] ss:$12 sps:$4 sm:$0xff]   ;;  %v2088_v42 = vld [vmem:[%s2247_s28 + $0x2b8] ss:$12 sps:$4 sm:$0xff]  }
  0x19   : > { %v2089_v43 = vld [vmem:[%s2247_s28 + $0x94] ss:$12 sps:$4 sm:$0xff]   ;;  %v2093_v45 = vld [vmem:[%s2247_s28 + $0x90] ss:$12 sps:$4 sm:$0xff]   ;;  %v2095_v47 = vld [vmem:[%s2247_s28 + $0xac] ss:$12 sps:$4 sm:$0xff]  }
  0x1a   : > { %v2091_v44 = vld [vmem:[%s2247_s28 + $0x2d4] ss:$12 sps:$4 sm:$0xff]   ;;  %v2094_v46 = vld [vmem:[%s2247_s28 + $0x2d0] ss:$12 sps:$4 sm:$0xff]   ;;  %v2097_v48 = vld [vmem:[%s2247_s28 + $0x2ec] ss:$12 sps:$4 sm:$0xff]  }
  0x1b   : > { %1045 = vmatpush1.bf16.msra.mxu0 %v2040_v7  ;;  %2014 = vmatpush1.bf16.msra.mxu1 %v2040_v7  ;;  %v2099_v49 = vld [vmem:[%s2247_s28 + $0xa8] ss:$12 sps:$4 sm:$0xff]   ;;  %v2101_v51 = vld [vmem:[%s2247_s28 + $0xc4] ss:$12 sps:$4 sm:$0xff]   ;;  %v2104_v53 = vld [vmem:[%s2247_s28 + $0xc0] ss:$12 sps:$4 sm:$0xff]  }
  0x1c   : > { %1046 = vmatprep.subr.bf16.mxu0 %v2189_v1  ;;  %1999 = vmatprep.subr.bf16.mxu1 %v2189_v1  ;;  %v2100_v50 = vld [vmem:[%s2247_s28 + $0x2e8] ss:$12 sps:$4 sm:$0xff]   ;;  %v2105_v54 = vld [vmem:[%s2247_s28 + $0x20] ss:$12 sps:$4 sm:$0xff]   ;;  %v2108_v56 = vld [vmem:[%s2247_s28 + $0x38] ss:$12 sps:$4 sm:$0xff]  }
  0x1d   : > { %v2103_v52 = vld [vmem:[%s2247_s28 + $0x8] ss:$12 sps:$4 sm:$0xff]   ;;  %v2109_v57 = vld [vmem:[%s2247_s28 + $0xd8] ss:$12 sps:$4 sm:$0xff]   ;;  %v2110_v58 = vld [vmem:[%s2247_s28 + $0x50] ss:$12 sps:$4 sm:$0xff]  }
  0x1e   : > { %v2106_v55 = vld [vmem:[%s2247_s28 + $0xdc] ss:$12 sps:$4 sm:$0xff]   ;;  %v2111_v59 = vld [vmem:[%s2247_s28 + $0xf4] ss:$12 sps:$4 sm:$0xff]   ;;  %v2116_v63 = vld [vmem:[%s2247_s28 + $0x10c] ss:$12 sps:$4 sm:$0xff]  }
  0x1f   : > { %1047 = vmatpush1.bf16.msra.mxu0 %v2041_v9  ;;  %2015 = vmatpush1.bf16.msra.mxu1 %v2041_v9  ;;  %v2113_v60 = vld [vmem:[%s2247_s28 + $0x68] ss:$12 sps:$4 sm:$0xff]   ;;  %v2114_v61 = vld [vmem:[%s2247_s28 + $0xf0] ss:$12 sps:$4 sm:$0xff]   ;;  %v2115_v62 = vld [vmem:[%s2247_s28 + $0x80] ss:$12 sps:$4 sm:$0xff]  }
  0x20   : > { %1048 = vmatprep.subr.bf16.mxu0 %v2189_v1  ;;  %2000 = vmatprep.subr.bf16.mxu1 %v2189_v1  ;;  %v2118_v0 = vld [vmem:[%s2247_s28 + $0x98] ss:$12 sps:$4 sm:$0xff]   ;;  %v2120_v2 = vld [vmem:[%s2247_s28 + $0xb0] ss:$12 sps:$4 sm:$0xff]   ;;  %v2123_v4 = vld [vmem:[%s2247_s28 + $0xc8] ss:$12 sps:$4 sm:$0xff]  }
  0x21   : > { %v2121_v3 = vld [vmem:[%s2247_s28 + $0x124] ss:$12 sps:$4 sm:$0xff]   ;;  %v2124_v5 = vld [vmem:[%s2247_s28 + $0x120] ss:$12 sps:$4 sm:$0xff]   ;;  %v2126_v7 = vld [vmem:[%s2247_s28 + $0x13c] ss:$12 sps:$4 sm:$0xff]  }
  0x22   : > { %v2125_v6 = vld [vmem:[%s2247_s28 + $0xe0] ss:$12 sps:$4 sm:$0xff]   ;;  %v2128_v8 = vld [vmem:[%s2247_s28 + $0xf8] ss:$12 sps:$4 sm:$0xff]  }
  0x23   : > { %1049 = vmatpush1.bf16.msra.mxu0 %v2042_v10  ;;  %2016 = vmatpush1.bf16.msra.mxu1 %v2042_v10  ;;  %v2129_v9 = vld [vmem:[%s2247_s28 + $0x138] ss:$12 sps:$4 sm:$0xff]   ;;  %v2130_v10 = vld [vmem:[%s2247_s28 + $0x110] ss:$12 sps:$4 sm:$0xff]  }
  0x24   : > { %1050 = vmatprep.subr.bf16.mxu0 %v2189_v1  ;;  %2001 = vmatprep.subr.bf16.mxu1 %v2189_v1 }
  0x27   : > { %1051 = vmatpush1.bf16.msra.mxu0 %v2043_v11  ;;  %2017 = vmatpush1.bf16.msra.mxu1 %v2043_v11  ;;  %v2131_v11 = vld [vmem:[%s2247_s28 + $0x154] ss:$12 sps:$4 sm:$0xff]  }
  0x28   : > { %1052 = vmatprep.subr.bf16.mxu0 %v2189_v1  ;;  %2002 = vmatprep.subr.bf16.mxu1 %v2189_v1 }
  0x2b   : > { %1053 = vmatpush1.bf16.msra.mxu0 %v2044_v12  ;;  %2018 = vmatpush1.bf16.msra.mxu1 %v2044_v12  ;;  %v2133_v12 = vld [vmem:[%s2247_s28 + $0x128] ss:$12 sps:$4 sm:$0xff]  }
  0x2c   : > { %1054 = vmatprep.subr.bf16.mxu0 %v2189_v1  ;;  %2003 = vmatprep.subr.bf16.mxu1 %v2189_v1 }
  0x2f   : > { %1055 = vmatpush1.bf16.msra.mxu0 %v2045_v13  ;;  %2019 = vmatpush1.bf16.msra.mxu1 %v2045_v13  ;;  %v2134_v13 = vld [vmem:[%s2247_s28 + $0x150] ss:$12 sps:$4 sm:$0xff]  }
  0x30   : > { %1056 = vmatprep.subr.bf16.mxu0 %v2189_v1  ;;  %2004 = vmatprep.subr.bf16.mxu1 %v2189_v1 }
  0x33   : > { %1057 = vmatpush1.bf16.msra.mxu0 %v2046_v14  ;;  %2020 = vmatpush1.bf16.msra.mxu1 %v2046_v14  ;;  %v2135_v14 = vld [vmem:[%s2247_s28 + $0x140] ss:$12 sps:$4 sm:$0xff]  }
  0x34   : > { %1058 = vmatprep.subr.bf16.mxu0 %v2189_v1  ;;  %2005 = vmatprep.subr.bf16.mxu1 %v2189_v1 }
  0x37   : > { %1059 = vmatpush1.bf16.msra.mxu0 %v2047_v15  ;;  %2021 = vmatpush1.bf16.msra.mxu1 %v2047_v15  ;;  %v2136_v15 = vld [vmem:[%s2247_s28 + $0x16c] ss:$12 sps:$4 sm:$0xff]  }
  0x38   : > { %1060 = vmatprep.subr.bf16.mxu0 %v2189_v1  ;;  %2006 = vmatprep.subr.bf16.mxu1 %v2189_v1 }
  0x3b   : > { %1061 = vmatpush1.bf16.msra.mxu0 %v2048_v16  ;;  %2022 = vmatpush1.bf16.msra.mxu1 %v2048_v16  ;;  %v2138_v16 = vld [vmem:[%s2247_s28 + $0x158] ss:$12 sps:$4 sm:$0xff]  }
  0x3c   : > { %1062 = vmatprep.subr.bf16.mxu0 %v2189_v1  ;;  %2007 = vmatprep.subr.bf16.mxu1 %v2189_v1 }
  0x3f   : > { %1063 = vmatpush1.bf16.msra.mxu0 %v2049_v17  ;;  %2023 = vmatpush1.bf16.msra.mxu1 %v2049_v17  ;;  %v2139_v17 = vld [vmem:[%s2247_s28 + $0x168] ss:$12 sps:$4 sm:$0xff]  }
  0x40   : > { %1064 = vmatprep.subr.bf16.mxu0 %v2189_v1  ;;  %2008 = vmatprep.subr.bf16.mxu1 %v2189_v1  ;;  %v2119_v1 = vld [vmem:[%s2247_s28 + $0x108] ss:$12 sps:$4 sm:$0xff]  }
  0x43   : > { %1065 = vmatpush1.bf16.msra.mxu0 %v2050_v18  ;;  %2024 = vmatpush1.bf16.msra.mxu1 %v2050_v18  ;;  %v2140_v18 = vld [vmem:[%s2247_s28 + $0x170] ss:$12 sps:$4 sm:$0xff]  }
  0x44   : > { %1925 = vmatprep.subr.bf16.mxu1 %v2057_v19 }
  0x46   : > { %1067 = vmatmul.mubr.bf16.vlgmr.msra.gmra.mrb[0].mxu0 %v2051_v20  ;;  %1259 = vmatmul.mubr.bf16.vlgmr.msra.gmra.mrb[0].mxu1 %v2054_v21  ;;  %v2143_v20 = vld [vmem:[%s2247_s28 + $0x188] ss:$12 sps:$4 sm:$0xff]   ;;  %v2144_v21 = vld [vmem:[%s2247_s28 + $0x180] ss:$12 sps:$4 sm:$0xff]  }
  0x47   : > { %1926 = vmatpush3.bf16.msra.mxu1 %v2057_v19  ;;  %1074 = vmatprep.mubr.bf16.mxu0 %v2058_v22  ;;  %v2141_v19 = vld [vmem:[%s2247_s28 + $0x184] ss:$12 sps:$4 sm:$0xff]   ;;  %v2145_v22 = vld [vmem:[%s2247_s28 + $0x1a0] ss:$12 sps:$4 sm:$0xff]  }
  0x48   : > { %1266 = vmatprep.mubr.bf16.mxu1 %v2060_v23  ;;  %1927 = vmatprep.subr.bf16.mxu1 %v2082_v24  ;;  %v2146_v23 = vld [vmem:[%s2247_s28 + $0x19c] ss:$12 sps:$4 sm:$0xff]  }
  0x4b   : > { %1928 = vmatpush3.bf16.msra.mxu1 %v2082_v24  ;;  %v2148_v24 = vld [vmem:[%s2247_s28 + $0x1b8] ss:$12 sps:$4 sm:$0xff]  }
  0x4e   : > { %1075 = vmatmul.mubr.bf16.gmra.mrb[4].mxu0 %v2062_v25  ;;  %1267 = vmatmul.mubr.bf16.gmra.mrb[4].mxu1 %v2063_v26  ;;  %v2149_v25 = vld [vmem:[%s2247_s28 + $0x198] ss:$12 sps:$4 sm:$0xff]   ;;  %v2150_v26 = vld [vmem:[%s2247_s28 + $0x1d0] ss:$12 sps:$4 sm:$0xff]  }
  0x4f   : > { %1082 = vmatprep.mubr.bf16.mxu0 %v2064_v27  ;;  %1274 = vmatprep.mubr.bf16.mxu1 %v2066_v28  ;;  %v2151_v27 = vld [vmem:[%s2247_s28 + $0x1b4] ss:$12 sps:$4 sm:$0xff]  }
  0x50   : > { %v2153_v28 = vld [vmem:[%s2247_s28 + $0x1e8] ss:$12 sps:$4 sm:$0xff]  }
  0x56   : > { %1083 = vmatmul.mubr.bf16.gmra.mrb[8].mxu0 %v2068_v29  ;;  %1275 = vmatmul.mubr.bf16.gmra.mrb[8].mxu1 %v2069_v30  ;;  %v2154_v29 = vld [vmem:[%s2247_s28 + $0x1b0] ss:$12 sps:$4 sm:$0xff]   ;;  %v2155_v30 = vld [vmem:[%s2247_s28 + $0x200] ss:$12 sps:$4 sm:$0xff]  }
  0x57   : > { %1090 = vmatprep.mubr.bf16.mxu0 %v2070_v31  ;;  %1282 = vmatprep.mubr.bf16.mxu1 %v2072_v32  ;;  %v2156_v31 = vld [vmem:[%s2247_s28 + $0x1cc] ss:$12 sps:$4 sm:$0xff]  }
  0x58   : > { %v2158_v32 = vld [vmem:[%s2247_s28 + $0x218] ss:$12 sps:$4 sm:$0xff]  }
  0x5e   : > { %1091 = vmatmul.mubr.bf16.gmra.mrb[12].mxu0 %v2074_v33  ;;  %1283 = vmatmul.mubr.bf16.gmra.mrb[12].mxu1 %v2075_v34  ;;  %v2159_v33 = vld [vmem:[%s2247_s28 + $0x1c8] ss:$12 sps:$4 sm:$0xff]   ;;  %v2160_v34 = vld [vmem:[%s2247_s28 + $0x230] ss:$12 sps:$4 sm:$0xff]  }
  0x5f   : > { %1098 = vmatprep.mubr.bf16.mxu0 %v2076_v35  ;;  %1290 = vmatprep.mubr.bf16.mxu1 %v2078_v36  ;;  %v2161_v35 = vld [vmem:[%s2247_s28 + $0x1e4] ss:$12 sps:$4 sm:$0xff]   ;;  %v2163_v36 = vld [vmem:[%s2247_s28 + $0x248] ss:$12 sps:$4 sm:$0xff]  }
  0x66   : > { %1099 = vmatmul.mubr.bf16.gmra.mrb[16].mxu0 %v2080_v37  ;;  %1291 = vmatmul.mubr.bf16.gmra.mrb[16].mxu1 %v2081_v38  ;;  %v2164_v37 = vld [vmem:[%s2247_s28 + $0x1e0] ss:$12 sps:$4 sm:$0xff]  }
  0x67   : > { %1106 = vmatprep.mubr.bf16.mxu0 %v2083_v39  ;;  %1298 = vmatprep.mubr.bf16.mxu1 %v2085_v40  ;;  %v2165_v38 = vld [vmem:[%s2247_s28 + $0x260] ss:$12 sps:$4 sm:$0xff]   ;;  %v2166_v39 = vld [vmem:[%s2247_s28 + $0x1fc] ss:$12 sps:$4 sm:$0xff]   ;;  %v2168_v40 = vld [vmem:[%s2247_s28 + $0x278] ss:$12 sps:$4 sm:$0xff]  }
  0x6e   : > { %1107 = vmatmul.mubr.bf16.gmra.mrb[20].mxu0 %v2087_v41  ;;  %1299 = vmatmul.mubr.bf16.gmra.mrb[20].mxu1 %v2088_v42  ;;  %v2169_v41 = vld [vmem:[%s2247_s28 + $0x1f8] ss:$12 sps:$4 sm:$0xff]   ;;  %v2170_v42 = vld [vmem:[%s2247_s28 + $0x290] ss:$12 sps:$4 sm:$0xff]  }
  0x6f   : > { %1114 = vmatprep.mubr.bf16.mxu0 %v2089_v43  ;;  %1306 = vmatprep.mubr.bf16.mxu1 %v2091_v44  ;;  %v2171_v43 = vld [vmem:[%s2247_s28 + $0x214] ss:$12 sps:$4 sm:$0xff]  }
  0x70   : > { %v2173_v44 = vld [vmem:[%s2247_s28 + $0x2a8] ss:$12 sps:$4 sm:$0xff]  }
  0x76   : > { %1115 = vmatmul.mubr.bf16.gmra.mrb[24].mxu0 %v2093_v45  ;;  %1307 = vmatmul.mubr.bf16.gmra.mrb[24].mxu1 %v2094_v46  ;;  %v2174_v45 = vld [vmem:[%s2247_s28 + $0x210] ss:$12 sps:$4 sm:$0xff]   ;;  %v2175_v46 = vld [vmem:[%s2247_s28 + $0x2c0] ss:$12 sps:$4 sm:$0xff]  }
  0x77   : > { %1122 = vmatprep.mubr.bf16.mxu0 %v2095_v47  ;;  %1314 = vmatprep.mubr.bf16.mxu1 %v2097_v48  ;;  %v2176_v47 = vld [vmem:[%s2247_s28 + $0x22c] ss:$12 sps:$4 sm:$0xff]  }
  0x78   : > { %v2178_v48 = vld [vmem:[%s2247_s28 + $0x2d8] ss:$12 sps:$4 sm:$0xff]  }
  0x7e   : > { %1123 = vmatmul.mubr.bf16.gmra.mrb[28].mxu0 %v2099_v49  ;;  %1315 = vmatmul.mubr.bf16.gmra.mrb[28].mxu1 %v2100_v50  ;;  %v2179_v49 = vld [vmem:[%s2247_s28 + $0x228] ss:$12 sps:$4 sm:$0xff]   ;;  %v2180_v50 = vld [vmem:[%s2247_s28 + $0x2f0] ss:$12 sps:$4 sm:$0xff]  }
  0x7f   : > { %1130 = vmatprep.mubr.bf16.mxu0 %v2101_v51  ;;  %1929 = vmatprep.mubr.msk.bf16.mxu1 %vm937_vm0, %v2103_v52 }
  0x86   : > { %1131 = vmatmul.mubr.bf16.gmra.mrb[32].mxu0 %v2104_v53  ;;  %1930 = vmatmul.mubr.msk.bf16.vlgmr.msra.gmra.mrb[32].mxu1 %vm937_vm0, %v2105_v54 }
  0x87   : > { %1138 = vmatprep.mubr.bf16.mxu0 %v2106_v55  ;;  %1933 = vmatprep.mubr.msk.bf16.mxu1 %vm937_vm0, %v2108_v56 }
  0x8e   : > { %1139 = vmatmul.mubr.bf16.gmra.mrb[36].mxu0 %v2109_v57  ;;  %1934 = vmatmul.mubr.msk.bf16.gmra.mrb[36].mxu1 %vm937_vm0, %v2110_v58 }
  0x8f   : > { %1146 = vmatprep.mubr.bf16.mxu0 %v2111_v59  ;;  %1937 = vmatprep.mubr.msk.bf16.mxu1 %vm937_vm0, %v2113_v60 }
  0x96   : > { %1147 = vmatmul.mubr.bf16.gmra.mrb[40].mxu0 %v2114_v61  ;;  %1938 = vmatmul.mubr.msk.bf16.gmra.mrb[40].mxu1 %vm937_vm0, %v2115_v62 }
  0x97   : > { %1154 = vmatprep.mubr.bf16.mxu0 %v2116_v63  ;;  %1941 = vmatprep.mubr.msk.bf16.mxu1 %vm937_vm0, %v2118_v0 }
  0x9e   : > { %1155 = vmatmul.mubr.bf16.gmra.mrb[44].mxu0 %v2119_v1  ;;  %1942 = vmatmul.mubr.msk.bf16.gmra.mrb[44].mxu1 %vm937_vm0, %v2120_v2 }
  0x9f   : > { %1162 = vmatprep.mubr.bf16.mxu0 %v2121_v3  ;;  %1945 = vmatprep.mubr.msk.bf16.mxu1 %vm937_vm0, %v2123_v4 }
  0xa6   : > { %1163 = vmatmul.mubr.bf16.gmra.mrb[48].mxu0 %v2124_v5  ;;  %1946 = vmatmul.mubr.msk.bf16.gmra.mrb[48].mxu1 %vm937_vm0, %v2125_v6 }
  0xa7   : > { %1170 = vmatprep.mubr.bf16.mxu0 %v2126_v7  ;;  %1949 = vmatprep.mubr.msk.bf16.mxu1 %vm937_vm0, %v2128_v8 }
  0xae   : > { %1171 = vmatmul.mubr.bf16.gmra.mrb[52].mxu0 %v2129_v9  ;;  %1950 = vmatmul.mubr.msk.bf16.gmra.mrb[52].mxu1 %vm937_vm0, %v2130_v10 }
  0xaf   : > { %1178 = vmatprep.mubr.bf16.mxu0 %v2131_v11  ;;  %1953 = vmatprep.mubr.msk.bf16.mxu1 %vm937_vm0, %v2133_v12 }
  0xb6   : > { %1179 = vmatmul.mubr.bf16.gmra.mrb[56].mxu0 %v2134_v13  ;;  %1954 = vmatmul.mubr.msk.bf16.gmra.mrb[56].mxu1 %vm937_vm0, %v2135_v14 }
  0xb7   : > { %1186 = vmatprep.mubr.bf16.mxu0 %v2136_v15  ;;  %1957 = vmatprep.mubr.msk.bf16.mxu1 %vm937_vm0, %v2138_v16 }
  0xbe   : > { %1187 = vmatmul.mubr.bf16.gmra.mrb[60].mxu0 %v2139_v17  ;;  %1958 = vmatmul.mubr.msk.bf16.gmra.mrb[60].mxu1 %vm937_vm0, %v2140_v18 }
  0xbf   : > { %1194 = vmatprep.mubr.bf16.mxu0 %v2141_v19  ;;  %1961 = vmatprep.mubr.msk.bf16.mxu1 %vm937_vm0, %v2143_v20 }
  0xc6   : > { %1195 = vmatmul.mubr.bf16.gmra.mrb[64].mxu0 %v2144_v21  ;;  %1962 = vmatmul.mubr.msk.bf16.gmra.mrb[64].mxu1 %vm937_vm0, %v2145_v22 }
  0xc7   : > { %1202 = vmatprep.mubr.bf16.mxu0 %v2146_v23  ;;  %1965 = vmatprep.mubr.msk.bf16.mxu1 %vm937_vm0, %v2148_v24 }
  0xce   : > { %1203 = vmatmul.mubr.bf16.gmra.mrb[68].mxu0 %v2149_v25  ;;  %1966 = vmatmul.mubr.msk.bf16.gmra.mrb[68].mxu1 %vm937_vm0, %v2150_v26 }
  0xcf   : > { %1210 = vmatprep.mubr.bf16.mxu0 %v2151_v27  ;;  %1969 = vmatprep.mubr.msk.bf16.mxu1 %vm937_vm0, %v2153_v28 }
  0xd6   : > { %1211 = vmatmul.mubr.bf16.gmra.mrb[72].mxu0 %v2154_v29  ;;  %1970 = vmatmul.mubr.msk.bf16.gmra.mrb[72].mxu1 %vm937_vm0, %v2155_v30 }
  0xd7   : > { %1218 = vmatprep.mubr.bf16.mxu0 %v2156_v31  ;;  %1973 = vmatprep.mubr.msk.bf16.mxu1 %vm937_vm0, %v2158_v32 }
  0xde   : > { %1219 = vmatmul.mubr.bf16.gmra.mrb[76].mxu0 %v2159_v33  ;;  %1974 = vmatmul.mubr.msk.bf16.gmra.mrb[76].mxu1 %vm937_vm0, %v2160_v34 }
  0xdf   : > { %1226 = vmatprep.mubr.bf16.mxu0 %v2161_v35  ;;  %1977 = vmatprep.mubr.msk.bf16.mxu1 %vm937_vm0, %v2163_v36 }
  0xe6   : > { %1227 = vmatmul.mubr.bf16.gmra.mrb[80].mxu0 %v2164_v37  ;;  %1978 = vmatmul.mubr.msk.bf16.gmra.mrb[80].mxu1 %vm937_vm0, %v2165_v38 }
  0xe7   : > { %1234 = vmatprep.mubr.bf16.mxu0 %v2166_v39  ;;  %1981 = vmatprep.mubr.msk.bf16.mxu1 %vm937_vm0, %v2168_v40 }
  0xee   : > { %1235 = vmatmul.mubr.bf16.gmra.mrb[84].mxu0 %v2169_v41  ;;  %1982 = vmatmul.mubr.msk.bf16.gmra.mrb[84].mxu1 %vm937_vm0, %v2170_v42 }
  0xef   : > { %1242 = vmatprep.mubr.bf16.mxu0 %v2171_v43  ;;  %1985 = vmatprep.mubr.msk.bf16.mxu1 %vm937_vm0, %v2173_v44 }
  0xf6   : > { %1243 = vmatmul.mubr.bf16.gmra.mrb[88].mxu0 %v2174_v45  ;;  %1986 = vmatmul.mubr.msk.bf16.gmra.mrb[88].mxu1 %vm937_vm0, %v2175_v46 }
  0xf7   : > { %1250 = vmatprep.mubr.bf16.mxu0 %v2176_v47  ;;  %1989 = vmatprep.mubr.msk.bf16.mxu1 %vm937_vm0, %v2178_v48 }
  0xfe   : > { %1251 = vmatmul.mubr.bf16.gmra.mrb[92].mxu0 %v2179_v49  ;;  %1990 = vmatmul.mubr.msk.bf16.gmra.mrb[92].mxu1 %vm937_vm0, %v2180_v50 }
 0x119   : > { %v2440_v51 = vpop.f32.mrb[0].mxu0  ;;  %v2442_v52 = vpop.f32.mrb[0].mxu1 }
 0x11a   : > { %v1070_v53 = vpop.f32.mrb[1].mxu0  ;;  %v1262_v54 = vpop.f32.mrb[1].mxu1 }
 0x11b   : > { %v2444_v55 = vpop.f32.mrb[2].mxu0  ;;  %v2446_v56 = vpop.f32.mrb[2].mxu1  ;;  %v2503_v53 = vld [vmem:[%s2762_s2] ss:$0 sm:$0xff] }
 0x11c   : > { %v1073_v57 = vpop.f32.mrb[3].mxu0  ;;  %v1265_v58 = vpop.f32.mrb[3].mxu1 }
 0x11d   : > { %v1069_v57 = vadd.f32 %v2503_v53, %v2440_v51  ;;  %v1072_v51 = vadd.f32 %v2503_v53, %v2444_v55 }
 0x121   : > { %v1076_v59 = vpop.f32.mrb[4].mxu0  ;;  %v2448_v60 = vpop.f32.mrb[4].mxu1 }
 0x122   : > { %v1078_v61 = vpop.f32.mrb[5].mxu0  ;;  %v1270_v62 = vpop.f32.mrb[5].mxu1  ;;  %v1077_v54 = vadd.f32 %v2503_v53, %v1076_v59 }
 0x123   : > { %v1079_v63 = vpop.f32.mrb[6].mxu0  ;;  %v2450_v0 = vpop.f32.mrb[6].mxu1 }
 0x124   : > { %v1081_v1 = vpop.f32.mrb[7].mxu0  ;;  %v1273_v2 = vpop.f32.mrb[7].mxu1  ;;  %v1080_v62 = vadd.f32 %v2503_v53, %v1079_v63 }
 0x129   : > { %v2452_v3 = vpop.f32.mrb[8].mxu0  ;;  %v2454_v4 = vpop.f32.mrb[8].mxu1 }
 0x12a   : > { %v1086_v5 = vpop.f32.mrb[9].mxu0  ;;  %v1278_v6 = vpop.f32.mrb[9].mxu1  ;;  %v1085_v63 = vadd.f32 %v2503_v53, %v2452_v3 }
 0x12b   : > { %v2456_v7 = vpop.f32.mrb[10].mxu0  ;;  %v2458_v8 = vpop.f32.mrb[10].mxu1 }
 0x12c   : > { %v1089_v9 = vpop.f32.mrb[11].mxu0  ;;  %v1281_v10 = vpop.f32.mrb[11].mxu1 }
 0x131   : > { %v2460_v11 = vpop.f32.mrb[12].mxu0  ;;  %v2462_v12 = vpop.f32.mrb[12].mxu1 }
 0x132   : > { %v1094_v13 = vpop.f32.mrb[13].mxu0  ;;  %v1286_v14 = vpop.f32.mrb[13].mxu1  ;;  %v1093_v55 = vadd.f32 %v2503_v53, %v2460_v11 }
 0x133   : > { %v2464_v15 = vpop.f32.mrb[14].mxu0  ;;  %v2466_v16 = vpop.f32.mrb[14].mxu1 }
 0x134   : > { %v1097_v17 = vpop.f32.mrb[15].mxu0  ;;  %v1289_v18 = vpop.f32.mrb[15].mxu1 }
 0x139   : > { %v2468_v19 = vpop.f32.mrb[16].mxu0  ;;  %v2470_v20 = vpop.f32.mrb[16].mxu1 }
 0x13a   : > { %v1102_v21 = vpop.f32.mrb[17].mxu0  ;;  %v1294_v22 = vpop.f32.mrb[17].mxu1 }
 0x13b   : > { %v2472_v23 = vpop.f32.mrb[18].mxu0  ;;  %v2474_v24 = vpop.f32.mrb[18].mxu1  ;;  %v1096_v22 = vadd.f32 %v2503_v53, %v2464_v15 }
 0x13c   : > { %v1105_v25 = vpop.f32.mrb[19].mxu0  ;;  %v1297_v26 = vpop.f32.mrb[19].mxu1 }
 0x141   : > { %v2476_v27 = vpop.f32.mrb[20].mxu0  ;;  %v2478_v28 = vpop.f32.mrb[20].mxu1 }
 0x142   : > { %v1110_v29 = vpop.f32.mrb[21].mxu0  ;;  %v1302_v30 = vpop.f32.mrb[21].mxu1  ;;  %v1109_v15 = vadd.f32 %v2503_v53, %v2476_v27 }
 0x143   : > { %v2480_v31 = vpop.f32.mrb[22].mxu0  ;;  %v2482_v32 = vpop.f32.mrb[22].mxu1  ;;  %v1088_v30 = vadd.f32 %v2503_v53, %v2456_v7  ;;  %v1101_v7 = vadd.f32 %v2503_v53, %v2468_v19 }
 0x144   : > { %v1113_v33 = vpop.f32.mrb[23].mxu0  ;;  %v1305_v34 = vpop.f32.mrb[23].mxu1 }
 0x149   : > { %v2484_v35 = vpop.f32.mrb[24].mxu0  ;;  %v2486_v36 = vpop.f32.mrb[24].mxu1 }
 0x14a   : > { %v1118_v37 = vpop.f32.mrb[25].mxu0  ;;  %v1310_v38 = vpop.f32.mrb[25].mxu1 }
 0x14b   : > { %v2488_v39 = vpop.f32.mrb[26].mxu0  ;;  %v2490_v40 = vpop.f32.mrb[26].mxu1 }
 0x14c   : > { %v1121_v41 = vpop.f32.mrb[27].mxu0  ;;  %v1313_v42 = vpop.f32.mrb[27].mxu1 }
 0x151   : > { %v2492_v43 = vpop.f32.mrb[28].mxu0  ;;  %v2494_v44 = vpop.f32.mrb[28].mxu1 }
 0x152   : > { %v1126_v45 = vpop.f32.mrb[29].mxu0  ;;  %v1318_v46 = vpop.f32.mrb[29].mxu1 }
 0x153   : > { %v2496_v47 = vpop.f32.mrb[30].mxu0  ;;  %v2498_v48 = vpop.f32.mrb[30].mxu1  ;;  %v1112_v46 = vadd.f32 %v2503_v53, %v2480_v31  ;;  %v1125_v31 = vadd.f32 %v2503_v53, %v2492_v43 }
 0x154   : > { %v1129_v49 = vpop.f32.mrb[31].mxu0  ;;  %v1321_v50 = vpop.f32.mrb[31].mxu1 }
 0x159   : > { %v2509_v58 = vpop.f32.mrb[32].mxu0  ;;  %v1931_v61 = vpop.f32.mrb[32].mxu1 }
 0x15a   : > { %v1366_v1 = vadd.f32 %v1931_v61, %v1077_v54  ;;  %v1134_v59 = vpop.f32.mrb[33].mxu0  ;;  %v1357_v2 = vpop.f32.mrb[33].mxu1 }
 0x15b   : > { %v1358_v5 = vadd.f32 %v1357_v2, %v1069_v57  ;;  %v2519_v6 = vpop.f32.mrb[34].mxu0  ;;  %v1932_v9 = vpop.f32.mrb[34].mxu1  ;;  %v1104_v57 = vadd.f32 %v2503_v53, %v2472_v23  ;;  %v1117_v23 = vadd.f32 %v2503_v53, %v2484_v35 }
 0x15c   : > { %1615 = vst.msk [vmem:[%s2514_s8 + $0x10] sm:$0xff] %vm1612_vm1, %v1366_v1  ;;  %v1369_v10 = vadd.f32 %v1932_v9, %v1080_v62  ;;  %v1137_v13 = vpop.f32.mrb[35].mxu0  ;;  %v1360_v14 = vpop.f32.mrb[35].mxu1  ;;  %v1128_v9 = vadd.f32 %v2503_v53, %v2496_v47 }
 0x15d   : > { %1613 = vst.msk [vmem:[%s2514_s8] sm:$0xff] %vm1612_vm1, %v1358_v5  ;;  %v1361_v17 = vadd.f32 %v1360_v14, %v1072_v51 }
 0x15e   : > { %1616 = vst.msk [vmem:[%s2514_s8 + $0x18] sm:$0xff] %vm1612_vm1, %v1369_v10 }
 0x15f   : > { %1614 = vst.msk [vmem:[%s2514_s8 + $0x8] sm:$0xff] %vm1612_vm1, %v1361_v17  ;;  %v1120_v17 = vadd.f32 %v2503_v53, %v2488_v39  ;;  %v1133_v39 = vadd.f32 %v2503_v53, %v2509_v58 }
 0x161   : > { %v1140_v18 = vpop.f32.mrb[36].mxu0  ;;  %v1935_v21 = vpop.f32.mrb[36].mxu1 }
 0x162   : > { %v1382_v25 = vadd.f32 %v1935_v21, %v1093_v55  ;;  %v1142_v26 = vpop.f32.mrb[37].mxu0  ;;  %v1373_v29 = vpop.f32.mrb[37].mxu1  ;;  %v1141_v47 = vadd.f32 %v2503_v53, %v1140_v18 }
 0x163   : > { %v1374_v33 = vadd.f32 %v1373_v29, %v1085_v63  ;;  %v1143_v34 = vpop.f32.mrb[38].mxu0  ;;  %v1936_v11 = vpop.f32.mrb[38].mxu1 }
 0x164   : > { %1619 = vst.msk [vmem:[%s2514_s8 + $0x30] sm:$0xff] %vm1612_vm1, %v1382_v25  ;;  %v1385_v37 = vadd.f32 %v1936_v11, %v1096_v22  ;;  %v1145_v3 = vpop.f32.mrb[39].mxu0  ;;  %v1376_v38 = vpop.f32.mrb[39].mxu1 }
 0x165   : > { %1617 = vst.msk [vmem:[%s2514_s8 + $0x20] sm:$0xff] %vm1612_vm1, %v1374_v33  ;;  %v1377_v41 = vadd.f32 %v1376_v38, %v1088_v30  ;;  %v1144_v30 = vadd.f32 %v2503_v53, %v1143_v34  ;;  %v1136_v3 = vadd.f32 %v2503_v53, %v2519_v6 }
 0x166   : > { %1620 = vst.msk [vmem:[%s2514_s8 + $0x38] sm:$0xff] %vm1612_vm1, %v1385_v37 }
 0x167   : > { %1618 = vst.msk [vmem:[%s2514_s8 + $0x28] sm:$0xff] %vm1612_vm1, %v1377_v41 }
 0x169   : > { %v1148_v42 = vpop.f32.mrb[40].mxu0  ;;  %v1939_v45 = vpop.f32.mrb[40].mxu1 }
 0x16a   : > { %v1398_v49 = vadd.f32 %v1939_v45, %v1109_v15  ;;  %v1150_v50 = vpop.f32.mrb[41].mxu0  ;;  %v1389_v54 = vpop.f32.mrb[41].mxu1  ;;  %v1149_v6 = vadd.f32 %v2503_v53, %v1148_v42 }
 0x16b   : > { %v1390_v61 = vadd.f32 %v1389_v54, %v1101_v7  ;;  %v1151_v62 = vpop.f32.mrb[42].mxu0  ;;  %v1940_v27 = vpop.f32.mrb[42].mxu1 }
 0x16c   : > { %1623 = vst.msk [vmem:[%s2514_s8 + $0x50] sm:$0xff] %vm1612_vm1, %v1398_v49  ;;  %v1401_v1 = vadd.f32 %v1940_v27, %v1112_v46  ;;  %v1153_v19 = vpop.f32.mrb[43].mxu0  ;;  %v1392_v59 = vpop.f32.mrb[43].mxu1  ;;  %v1152_v27 = vadd.f32 %v2503_v53, %v1151_v62 }
 0x16d   : > { %1621 = vst.msk [vmem:[%s2514_s8 + $0x40] sm:$0xff] %vm1612_vm1, %v1390_v61  ;;  %v1393_v2 = vadd.f32 %v1392_v59, %v1104_v57 }
 0x16e   : > { %1624 = vst.msk [vmem:[%s2514_s8 + $0x58] sm:$0xff] %vm1612_vm1, %v1401_v1 }
 0x16f   : > { %1622 = vst.msk [vmem:[%s2514_s8 + $0x48] sm:$0xff] %vm1612_vm1, %v1393_v2 }
 0x171   : > { %v1156_v51 = vpop.f32.mrb[44].mxu0  ;;  %v1943_v5 = vpop.f32.mrb[44].mxu1 }
 0x172   : > { %v1414_v10 = vadd.f32 %v1943_v5, %v1125_v31  ;;  %v1158_v13 = vpop.f32.mrb[45].mxu0  ;;  %v1405_v14 = vpop.f32.mrb[45].mxu1  ;;  %v1157_v34 = vadd.f32 %v2503_v53, %v1156_v51 }
 0x173   : > { %v1406_v55 = vadd.f32 %v1405_v14, %v1117_v23  ;;  %v1159_v63 = vpop.f32.mrb[46].mxu0  ;;  %v1944_v43 = vpop.f32.mrb[46].mxu1 }
 0x174   : > { %1627 = vst.msk [vmem:[%s2514_s8 + $0x70] sm:$0xff] %vm1612_vm1, %v1414_v10  ;;  %v1417_v21 = vadd.f32 %v1944_v43, %v1128_v9  ;;  %v1161_v35 = vpop.f32.mrb[47].mxu0  ;;  %v1408_v22 = vpop.f32.mrb[47].mxu1  ;;  %v1160_v50 = vadd.f32 %v2503_v53, %v1159_v63 }
 0x175   : > { %1625 = vst.msk [vmem:[%s2514_s8 + $0x60] sm:$0xff] %vm1612_vm1, %v1406_v55  ;;  %v1409_v25 = vadd.f32 %v1408_v22, %v1120_v17 }
 0x176   : > { %1628 = vst.msk [vmem:[%s2514_s8 + $0x78] sm:$0xff] %vm1612_vm1, %v1417_v21 }
 0x177   : > { %1626 = vst.msk [vmem:[%s2514_s8 + $0x68] sm:$0xff] %vm1612_vm1, %v1409_v25 }
 0x179   : > { %v1164_v26 = vpop.f32.mrb[48].mxu0  ;;  %v1947_v29 = vpop.f32.mrb[48].mxu1 }
 0x17a   : > { %v1430_v33 = vadd.f32 %v1947_v29, %v1141_v47  ;;  %v1166_v11 = vpop.f32.mrb[49].mxu0  ;;  %v1421_v37 = vpop.f32.mrb[49].mxu1  ;;  %v1165_v62 = vadd.f32 %v2503_v53, %v1164_v26 }
 0x17b   : > { %v1422_v38 = vadd.f32 %v1421_v37, %v1133_v39  ;;  %v1167_v41 = vpop.f32.mrb[50].mxu0  ;;  %v1948_v15 = vpop.f32.mrb[50].mxu1 }
 0x17c   : > { %1631 = vst.msk [vmem:[%s2514_s8 + $0x90] sm:$0xff] %vm1612_vm1, %v1430_v33  ;;  %v1433_v18 = vadd.f32 %v1948_v15, %v1144_v30  ;;  %v1169_v7 = vpop.f32.mrb[51].mxu0  ;;  %v1424_v58 = vpop.f32.mrb[51].mxu1  ;;  %v1168_v55 = vadd.f32 %v2503_v53, %v1167_v41 }
 0x17d   : > { %1629 = vst.msk [vmem:[%s2514_s8 + $0x80] sm:$0xff] %vm1612_vm1, %v1422_v38  ;;  %v1425_v45 = vadd.f32 %v1424_v58, %v1136_v3 }
 0x17e   : > { %1632 = vst.msk [vmem:[%s2514_s8 + $0x98] sm:$0xff] %vm1612_vm1, %v1433_v18 }
 0x17f   : > { %1630 = vst.msk [vmem:[%s2514_s8 + $0x88] sm:$0xff] %vm1612_vm1, %v1425_v45 }
 0x181   : > { %v1172_v46 = vpop.f32.mrb[52].mxu0  ;;  %v1951_v49 = vpop.f32.mrb[52].mxu1 }
 0x182   : > { %v1446_v54 = vadd.f32 %v1951_v49, %v1157_v34  ;;  %v1174_v57 = vpop.f32.mrb[53].mxu0  ;;  %v1437_v61 = vpop.f32.mrb[53].mxu1  ;;  %v1173_v51 = vadd.f32 %v2503_v53, %v1172_v46 }
 0x183   : > { %v1438_v1 = vadd.f32 %v1437_v61, %v1149_v6  ;;  %v1175_v19 = vpop.f32.mrb[54].mxu0  ;;  %v1952_v59 = vpop.f32.mrb[54].mxu1 }
 0x184   : > { %1635 = vst.msk [vmem:[%s2514_s8 + $0xb0] sm:$0xff] %vm1612_vm1, %v1446_v54  ;;  %v1449_v2 = vadd.f32 %v1952_v59, %v1160_v50  ;;  %v1177_v31 = vpop.f32.mrb[55].mxu0  ;;  %v1440_v23 = vpop.f32.mrb[55].mxu1  ;;  %v1176_v10 = vadd.f32 %v2503_v53, %v1175_v19 }
 0x185   : > { %1633 = vst.msk [vmem:[%s2514_s8 + $0xa0] sm:$0xff] %vm1612_vm1, %v1438_v1  ;;  %v1441_v42 = vadd.f32 %v1440_v23, %v1152_v27 }
 0x186   : > { %1636 = vst.msk [vmem:[%s2514_s8 + $0xb8] sm:$0xff] %vm1612_vm1, %v1449_v2 }
 0x187   : > { %1634 = vst.msk [vmem:[%s2514_s8 + $0xa8] sm:$0xff] %vm1612_vm1, %v1441_v42 }
 0x189   : > { %v1180_v5 = vpop.f32.mrb[56].mxu0  ;;  %v1955_v9 = vpop.f32.mrb[56].mxu1 }
 0x18a   : > { %v1462_v13 = vadd.f32 %v1955_v9, %v1173_v51  ;;  %v1182_v14 = vpop.f32.mrb[57].mxu0  ;;  %v1453_v17 = vpop.f32.mrb[57].mxu1  ;;  %v1181_v39 = vadd.f32 %v2503_v53, %v1180_v5 }
 0x18b   : > { %v1454_v63 = vadd.f32 %v1453_v17, %v1165_v62  ;;  %v1183_v43 = vpop.f32.mrb[58].mxu0  ;;  %v1956_v21 = vpop.f32.mrb[58].mxu1 }
 0x18c   : > { %1639 = vst.msk [vmem:[%s2514_s8 + $0xd0] sm:$0xff] %vm1612_vm1, %v1462_v13  ;;  %v1465_v35 = vadd.f32 %v1956_v21, %v1176_v10  ;;  %v1185_v22 = vpop.f32.mrb[59].mxu0  ;;  %v1456_v25 = vpop.f32.mrb[59].mxu1  ;;  %v1184_v37 = vadd.f32 %v2503_v53, %v1183_v43 }
 0x18d   : > { %1637 = vst.msk [vmem:[%s2514_s8 + $0xc0] sm:$0xff] %vm1612_vm1, %v1454_v63  ;;  %v1457_v47 = vadd.f32 %v1456_v25, %v1168_v55 }
 0x18e   : > { %1640 = vst.msk [vmem:[%s2514_s8 + $0xd8] sm:$0xff] %vm1612_vm1, %v1465_v35 }
 0x18f   : > { %1638 = vst.msk [vmem:[%s2514_s8 + $0xc8] sm:$0xff] %vm1612_vm1, %v1457_v47 }
 0x191   : > { %v1188_v26 = vpop.f32.mrb[60].mxu0  ;;  %v1959_v29 = vpop.f32.mrb[60].mxu1 }
 0x192   : > { %v1189_v30 = vadd.f32 %v2503_v53, %v1188_v26  ;;  %v1190_v33 = vpop.f32.mrb[61].mxu0  ;;  %v1469_v11 = vpop.f32.mrb[61].mxu1 }
 0x193   : > { %v1470_v3 = vadd.f32 %v1469_v11, %v1181_v39  ;;  %v1191_v38 = vpop.f32.mrb[62].mxu0  ;;  %v1960_v41 = vpop.f32.mrb[62].mxu1 }
 0x194   : > { %v1478_v15 = vadd.f32 %v1959_v29, %v1189_v30  ;;  %v1192_v18 = vadd.f32 %v2503_v53, %v1191_v38  ;;  %v1193_v7 = vpop.f32.mrb[63].mxu0  ;;  %v1472_v58 = vpop.f32.mrb[63].mxu1 }
 0x195   : > { %1641 = vst.msk [vmem:[%s2514_s8 + $0xe0] sm:$0xff] %vm1612_vm1, %v1470_v3  ;;  %v1473_v45 = vadd.f32 %v1472_v58, %v1184_v37 }
 0x196   : > { %1643 = vst.msk [vmem:[%s2514_s8 + $0xf0] sm:$0xff] %vm1612_vm1, %v1478_v15  ;;  %v1481_v34 = vadd.f32 %v1960_v41, %v1192_v18 }
 0x197   : > { %1642 = vst.msk [vmem:[%s2514_s8 + $0xe8] sm:$0xff] %vm1612_vm1, %v1473_v45 }
 0x198   : > { %1644 = vst.msk [vmem:[%s2514_s8 + $0xf8] sm:$0xff] %vm1612_vm1, %v1481_v34 }
 0x199   : > { %v1196_v6 = vpop.f32.mrb[64].mxu0  ;;  %v1963_v46 = vpop.f32.mrb[64].mxu1 }
 0x19a   : > { %v1197_v49 = vadd.f32 %v2503_v53, %v1196_v6  ;;  %v1198_v50 = vpop.f32.mrb[65].mxu0  ;;  %v1485_v54 = vpop.f32.mrb[65].mxu1 }
 0x19b   : > { %v1199_v57 = vpop.f32.mrb[66].mxu0  ;;  %v1964_v61 = vpop.f32.mrb[66].mxu1 }
 0x19c   : > { %v1486_v27 = vadd.f32 %v1485_v54, %v1197_v49  ;;  %v1200_v1 = vadd.f32 %v2503_v53, %v1199_v57  ;;  %v1201_v19 = vpop.f32.mrb[67].mxu0  ;;  %v1488_v59 = vpop.f32.mrb[67].mxu1  ;;  %v1261_v49 = vadd.f32 %v2503_v53, %v2442_v52  ;;  %v1272_v57 = vadd.f32 %v2503_v53, %v2450_v0 }
 0x19e   : > { %1645 = vst.msk [vmem:[%s2514_s8 + $0x100] sm:$0xff] %vm1612_vm1, %v1486_v27  ;;  %v1489_v2 = vadd.f32 %v1488_v59, %v1200_v1 }
 0x1a0   : > { %1646 = vst.msk [vmem:[%s2514_s8 + $0x108] sm:$0xff] %vm1612_vm1, %v1489_v2 }
 0x1a1   : > { %v1204_v31 = vpop.f32.mrb[68].mxu0  ;;  %v1967_v23 = vpop.f32.mrb[68].mxu1 }
 0x1a2   : > { %v1205_v42 = vadd.f32 %v2503_v53, %v1204_v31  ;;  %v1206_v51 = vpop.f32.mrb[69].mxu0  ;;  %v1501_v62 = vpop.f32.mrb[69].mxu1 }
 0x1a3   : > { %v1207_v5 = vpop.f32.mrb[70].mxu0  ;;  %v1968_v9 = vpop.f32.mrb[70].mxu1 }
 0x1a4   : > { %v1494_v10 = vadd.f32 %v1963_v46, %v1205_v42  ;;  %v1208_v13 = vadd.f32 %v2503_v53, %v1207_v5  ;;  %v1209_v14 = vpop.f32.mrb[71].mxu0  ;;  %v1504_v17 = vpop.f32.mrb[71].mxu1  ;;  %v1269_v46 = vadd.f32 %v2503_v53, %v2448_v60  ;;  %v1264_v60 = vadd.f32 %v2503_v53, %v2446_v56 }
 0x1a5   : > { %v1285_v56 = vadd.f32 %v2503_v53, %v2462_v12  ;;  %v1288_v14 = vadd.f32 %v2503_v53, %v2466_v16  ;;  %v1280_v12 = vadd.f32 %v2503_v53, %v2458_v8 }
 0x1a6   : > { %1647 = vst.msk [vmem:[%s2514_s8 + $0x110] sm:$0xff] %vm1612_vm1, %v1494_v10  ;;  %v1497_v55 = vadd.f32 %v1964_v61, %v1208_v13 }
 0x1a8   : > { %1648 = vst.msk [vmem:[%s2514_s8 + $0x118] sm:$0xff] %vm1612_vm1, %v1497_v55 }
 0x1a9   : > { %v1212_v63 = vpop.f32.mrb[72].mxu0  ;;  %v2639_v43 = vpop.f32.mrb[72].mxu1 }
 0x1aa   : > { %v1213_v21 = vadd.f32 %v2503_v53, %v1212_v63  ;;  %v1214_v35 = vpop.f32.mrb[73].mxu0  ;;  %v1517_v22 = vpop.f32.mrb[73].mxu1 }
 0x1ab   : > { %v1215_v25 = vpop.f32.mrb[74].mxu0  ;;  %v2642_v47 = vpop.f32.mrb[74].mxu1 }
 0x1ac   : > { %v1502_v39 = vadd.f32 %v1501_v62, %v1213_v21  ;;  %v1216_v26 = vadd.f32 %v2503_v53, %v1215_v25  ;;  %v1217_v29 = vpop.f32.mrb[75].mxu0  ;;  %v1520_v30 = vpop.f32.mrb[75].mxu1 }
 0x1ae   : > { %1649 = vst.msk [vmem:[%s2514_s8 + $0x120] sm:$0xff] %vm1612_vm1, %v1502_v39  ;;  %v1505_v33 = vadd.f32 %v1504_v17, %v1216_v26 }
 0x1b0   : > { %1650 = vst.msk [vmem:[%s2514_s8 + $0x128] sm:$0xff] %vm1612_vm1, %v1505_v33  ;;  %v1293_v33 = vadd.f32 %v2503_v53, %v2470_v20 }
 0x1b1   : > { %v1220_v11 = vpop.f32.mrb[76].mxu0  ;;  %v2649_v37 = vpop.f32.mrb[76].mxu1 }
 0x1b2   : > { %v1221_v3 = vadd.f32 %v2503_v53, %v1220_v11  ;;  %v1222_v38 = vpop.f32.mrb[77].mxu0  ;;  %v2652_v41 = vpop.f32.mrb[77].mxu1 }
 0x1b3   : > { %v1223_v15 = vpop.f32.mrb[78].mxu0  ;;  %v2654_v18 = vpop.f32.mrb[78].mxu1  ;;  %v1304_v38 = vadd.f32 %v2503_v53, %v2482_v32 }
 0x1b4   : > { %v1510_v7 = vadd.f32 %v1967_v23, %v1221_v3  ;;  %v1224_v58 = vadd.f32 %v2503_v53, %v1223_v15  ;;  %v1225_v45 = vpop.f32.mrb[79].mxu0  ;;  %v2657_v34 = vpop.f32.mrb[79].mxu1 }
 0x1b6   : > { %1651 = vst.msk [vmem:[%s2514_s8 + $0x130] sm:$0xff] %vm1612_vm1, %v1510_v7  ;;  %v1513_v6 = vadd.f32 %v1968_v9, %v1224_v58  ;;  %v1277_v9 = vadd.f32 %v2503_v53, %v2454_v4 }
 0x1b8   : > { %1652 = vst.msk [vmem:[%s2514_s8 + $0x138] sm:$0xff] %vm1612_vm1, %v1513_v6 }
 0x1b9   : > { %v1228_v50 = vpop.f32.mrb[80].mxu0  ;;  %v1979_v54 = vpop.f32.mrb[80].mxu1 }
 0x1ba   : > { %v1229_v61 = vadd.f32 %v2503_v53, %v1228_v50  ;;  %v1558_v27 = vadd.f32 %v1979_v54, %v1269_v46  ;;  %v1230_v1 = vpop.f32.mrb[81].mxu0  ;;  %v1549_v19 = vpop.f32.mrb[81].mxu1 }
 0x1bb   : > { %v1550_v59 = vadd.f32 %v1549_v19, %v1261_v49  ;;  %v1231_v52 = vpop.f32.mrb[82].mxu0  ;;  %v1980_v2 = vpop.f32.mrb[82].mxu1  ;;  %v1320_v19 = vadd.f32 %v2503_v53, %v2498_v48 }
 0x1bc   : > { %v1518_v31 = vadd.f32 %v1517_v22, %v1229_v61  ;;  %1663 = vst.msk [vmem:[%s2514_s8 + $0x190] sm:$0xff] %vm1612_vm1, %v1558_v27  ;;  %v1232_v0 = vadd.f32 %v2503_v53, %v1231_v52  ;;  %v1561_v23 = vadd.f32 %v1980_v2, %v1272_v57  ;;  %v1233_v42 = vpop.f32.mrb[83].mxu0  ;;  %v1552_v51 = vpop.f32.mrb[83].mxu1  ;;  %v1309_v61 = vadd.f32 %v2503_v53, %v2486_v36 }
 0x1bd   : > { %1661 = vst.msk [vmem:[%s2514_s8 + $0x180] sm:$0xff] %vm1612_vm1, %v1550_v59  ;;  %v1553_v62 = vadd.f32 %v1552_v51, %v1264_v60 }
 0x1be   : > { %1653 = vst.msk [vmem:[%s2514_s8 + $0x140] sm:$0xff] %vm1612_vm1, %v1518_v31  ;;  %v1521_v5 = vadd.f32 %v1520_v30, %v1232_v0  ;;  %1664 = vst.msk [vmem:[%s2514_s8 + $0x198] sm:$0xff] %vm1612_vm1, %v1561_v23 }
 0x1bf   : > { %1662 = vst.msk [vmem:[%s2514_s8 + $0x188] sm:$0xff] %vm1612_vm1, %v1553_v62 }
 0x1c0   : > { %1654 = vst.msk [vmem:[%s2514_s8 + $0x148] sm:$0xff] %vm1612_vm1, %v1521_v5 }
 0x1c1   : > { %v1236_v10 = vpop.f32.mrb[84].mxu0  ;;  %v1983_v13 = vpop.f32.mrb[84].mxu1 }
 0x1c2   : > { %v1237_v17 = vadd.f32 %v2503_v53, %v1236_v10  ;;  %v1574_v55 = vadd.f32 %v1983_v13, %v1285_v56  ;;  %v1238_v63 = vpop.f32.mrb[85].mxu0  ;;  %v1565_v21 = vpop.f32.mrb[85].mxu1 }
 0x1c3   : > { %v1566_v35 = vadd.f32 %v1565_v21, %v1277_v9  ;;  %v1239_v4 = vpop.f32.mrb[86].mxu0  ;;  %v1984_v22 = vpop.f32.mrb[86].mxu1 }
 0x1c4   : > { %v1526_v25 = vadd.f32 %v2639_v43, %v1237_v17  ;;  %1667 = vst.msk [vmem:[%s2514_s8 + $0x1b0] sm:$0xff] %vm1612_vm1, %v1574_v55  ;;  %v1240_v16 = vadd.f32 %v2503_v53, %v1239_v4  ;;  %v1577_v39 = vadd.f32 %v1984_v22, %v1288_v14  ;;  %v1241_v26 = vpop.f32.mrb[87].mxu0  ;;  %v1568_v29 = vpop.f32.mrb[87].mxu1  ;;  %v1301_v43 = vadd.f32 %v2503_v53, %v2478_v28 }
 0x1c5   : > { %1665 = vst.msk [vmem:[%s2514_s8 + $0x1a0] sm:$0xff] %vm1612_vm1, %v1566_v35  ;;  %v1569_v30 = vadd.f32 %v1568_v29, %v1280_v12  ;;  %v1296_v28 = vadd.f32 %v2503_v53, %v2474_v24 }
 0x1c6   : > { %1655 = vst.msk [vmem:[%s2514_s8 + $0x150] sm:$0xff] %vm1612_vm1, %v1526_v25  ;;  %v1529_v8 = vadd.f32 %v2642_v47, %v1240_v16  ;;  %1668 = vst.msk [vmem:[%s2514_s8 + $0x1b8] sm:$0xff] %vm1612_vm1, %v1577_v39 }
 0x1c7   : > { %1666 = vst.msk [vmem:[%s2514_s8 + $0x1a8] sm:$0xff] %vm1612_vm1, %v1569_v30 }
 0x1c8   : > { %1656 = vst.msk [vmem:[%s2514_s8 + $0x158] sm:$0xff] %vm1612_vm1, %v1529_v8 }
 0x1c9   : > { %v1244_v11 = vpop.f32.mrb[88].mxu0  ;;  %v1987_v3 = vpop.f32.mrb[88].mxu1 }
 0x1ca   : > { %v1245_v47 = vadd.f32 %v2503_v53, %v1244_v11  ;;  %v1590_v15 = vadd.f32 %v1987_v3, %v1301_v43  ;;  %v1246_v7 = vpop.f32.mrb[89].mxu0  ;;  %v1581_v58 = vpop.f32.mrb[89].mxu1 }
 0x1cb   : > { %v1582_v45 = vadd.f32 %v1581_v58, %v1293_v33  ;;  %v1247_v20 = vpop.f32.mrb[90].mxu0  ;;  %v1988_v6 = vpop.f32.mrb[90].mxu1 }
 0x1cc   : > { %v1534_v46 = vadd.f32 %v2652_v41, %v1245_v47  ;;  %1671 = vst.msk [vmem:[%s2514_s8 + $0x1d0] sm:$0xff] %vm1612_vm1, %v1590_v15  ;;  %v1248_v32 = vadd.f32 %v2503_v53, %v1247_v20  ;;  %v1593_v49 = vadd.f32 %v1988_v6, %v1304_v38  ;;  %v1249_v50 = vpop.f32.mrb[91].mxu0  ;;  %v1584_v54 = vpop.f32.mrb[91].mxu1  ;;  %v1317_v41 = vadd.f32 %v2503_v53, %v2494_v44 }
 0x1cd   : > { %1669 = vst.msk [vmem:[%s2514_s8 + $0x1c0] sm:$0xff] %vm1612_vm1, %v1582_v45  ;;  %v1585_v57 = vadd.f32 %v1584_v54, %v1296_v28  ;;  %v1312_v44 = vadd.f32 %v2503_v53, %v2490_v40 }
 0x1ce   : > { %1657 = vst.msk [vmem:[%s2514_s8 + $0x160] sm:$0xff] %vm1612_vm1, %v1534_v46  ;;  %v1537_v24 = vadd.f32 %v2657_v34, %v1248_v32  ;;  %1672 = vst.msk [vmem:[%s2514_s8 + $0x1d8] sm:$0xff] %vm1612_vm1, %v1593_v49 }
 0x1cf   : > { %1670 = vst.msk [vmem:[%s2514_s8 + $0x1c8] sm:$0xff] %vm1612_vm1, %v1585_v57 }
 0x1d0   : > { %1658 = vst.msk [vmem:[%s2514_s8 + $0x168] sm:$0xff] %vm1612_vm1, %v1537_v24 }
 0x1d1   : > { %v1252_v27 = vpop.f32.mrb[92].mxu0  ;;  %v1991_v1 = vpop.f32.mrb[92].mxu1 }
 0x1d2   : > { %v1253_v34 = vadd.f32 %v2503_v53, %v1252_v27  ;;  %v1606_v60 = vadd.f32 %v1991_v1, %v1317_v41  ;;  %v1254_v59 = vpop.f32.mrb[93].mxu0  ;;  %v1597_v52 = vpop.f32.mrb[93].mxu1 }
 0x1d3   : > { %v1598_v2 = vadd.f32 %v1597_v52, %v1309_v61  ;;  %v1255_v36 = vpop.f32.mrb[94].mxu0  ;;  %v1992_v31 = vpop.f32.mrb[94].mxu1 }
 0x1d4   : > { %v1542_v0 = vadd.f32 %v2649_v37, %v1253_v34  ;;  %1675 = vst.msk [vmem:[%s2514_s8 + $0x1f0] sm:$0xff] %vm1612_vm1, %v1606_v60  ;;  %v1256_v48 = vadd.f32 %v2503_v53, %v1255_v36  ;;  %v1609_v23 = vadd.f32 %v1992_v31, %v1320_v19  ;;  %v1257_v42 = vpop.f32.mrb[95].mxu0  ;;  %v1600_v51 = vpop.f32.mrb[95].mxu1 }
 0x1d5   : > { %1673 = vst.msk [vmem:[%s2514_s8 + $0x1e0] sm:$0xff] %vm1612_vm1, %v1598_v2  ;;  %v1601_v62 = vadd.f32 %v1600_v51, %v1312_v44 }
 0x1d6   : > { %1659 = vst.msk [vmem:[%s2514_s8 + $0x170] sm:$0xff] %vm1612_vm1, %v1542_v0  ;;  %v1545_v40 = vadd.f32 %v2654_v18, %v1256_v48  ;;  %1676 = vst.msk [vmem:[%s2514_s8 + $0x1f8] sm:$0xff] %vm1612_vm1, %v1609_v23 }
 0x1d7   : > { %1674 = vst.msk [vmem:[%s2514_s8 + $0x1e8] sm:$0xff] %vm1612_vm1, %v1601_v62 }
 0x1d8   : > { %1660 = vst.msk [vmem:[%s2514_s8 + $0x178] sm:$0xff] %vm1612_vm1, %v1545_v40 }
 0x1d9 PF: > { %s13_s12 = sadd.s32 1, %s2187_s12  }
 0x1da   : > { %p10_p4 = scmp.ge.s32.totalorder %s13_s12, 6  }
 0x1dc   :  { %12 = sbr.rel (!%p10_p4) target bundleno = 1 (0x1), region = 62 }

</bundles_post_ra>
